<compile_context>
chip_gen: v7x
topology: tpu7x:2x2x1
jax: 0.10.0
libtpu: 0.0.40
codegen_flags: <defaults>
</compile_context>

<pallas_src>
import functools

import jax
import jax.numpy as jnp
from jax import lax
from jax.experimental import pallas as pl
from jax.experimental.pallas import tpu as pltpu

LANE = 128


def _round_up(x, m):
    return (x + m - 1) // m * m


def _pick_row_tile(H, max_th=32):
    """Largest multiple-of-4 row-strip height <= max_th that divides H and leaves
    >= 2 strips (so the grid has enough steps to pipeline); falls back to H."""
    cands = [t for t in range(4, max_th + 1, 4) if H % t == 0 and H // t >= 2]
    if cands:
        return max(cands)
    if H % 4 == 0:
        return H
    raise ValueError("this kernel's row tiling requires H % 4 == 0")


def _double_conv_kernel(x_top_ref, x_halo_ref, w1_ref, s1_ref, w2_ref, s2_ref,
                        o_ref, *, TH, W, H):
    """Fused (conv3x3 + BN + ReLU) x 2 for one TH-row output strip of one image.

    x_top_ref : (TH,  W+4, Cpi) bf16  padded-input rows [s*TH, s*TH+TH)
    x_halo_ref: (4,   W+4, Cpi) bf16  padded-input rows [s*TH+TH, s*TH+TH+4)  (bottom halo)
    w1_ref    : (3, 3*Cpi, Cpm) bf16  dy-major weights, dx folded into K, BN scale folded in
    s1_ref    : (1, Cpm)        f32   per-channel shift = (bias - mean)*scale + beta
    w2_ref    : (3, 3*Cpm, Cpo) bf16
    s2_ref    : (1, Cpo)        f32
    o_ref     : (TH, W, Cpo)    f32
    """
    s = pl.program_id(1)
    Cpi = x_top_ref.shape[-1]
    Cpm = w1_ref.shape[-1]
    Cpo = w2_ref.shape[-1]
    Wm = W + 2  # mid-activation strip width (1-col halo on each side)

    # (TH+4, W+4, Cpi) input strip incl. 2-row halos (borders already zero-padded).
    xs = jnp.concatenate([x_top_ref[...], x_halo_ref[...]], axis=0)

    # ---- stage 1: conv3x3 (BN scale folded into w) + shift + ReLU -> mid (bf16) ----
    # im2col over the kernel-width taps: lane-aligned concat -> K = 3*Cpi.
    b1 = jnp.concatenate(
        [xs[:, 0:Wm, :], xs[:, 1:Wm + 1, :], xs[:, 2:Wm + 2, :]], axis=-1)

    m1 = (TH + 2) * Wm
    acc1 = jnp.zeros((m1, Cpm), jnp.float32)
    for dy in range(3):                      # 3 fat matmuls instead of 9 thin ones
        a = b1[dy:dy + TH + 2].reshape(m1, 3 * Cpi)
        acc1 = acc1 + jnp.dot(a, w1_ref[dy], preferred_element_type=jnp.float32)

    mid = jnp.maximum(acc1 + s1_ref[...], 0.0).reshape(TH + 2, Wm, Cpm)

    # Positions outside the real image are conv-2's zero padding, not computed values.
    r = lax.broadcasted_iota(jnp.int32, (TH + 2, Wm, Cpm), 0)
    c = lax.broadcasted_iota(jnp.int32, (TH + 2, Wm, Cpm), 1)
    row_g = s * TH + r - 1
    valid = (row_g >= 0) & (row_g < H) & (c >= 1) & (c <= W)
    mid = jnp.where(valid, mid, 0.0).astype(jnp.bfloat16)

    # TODO(synk): nn.Dropout is identity in eval mode; train-mode masking not emitted.

    # ---- stage 2: conv3x3 (BN scale folded into w) + shift + ReLU -> output strip ----
    b2 = jnp.concatenate(
        [mid[:, 0:W, :], mid[:, 1:W + 1, :], mid[:, 2:W + 2, :]], axis=-1)

    m2 = TH * W
    acc2 = jnp.zeros((m2, Cpo), jnp.float32)
    for dy in range(3):
        a = b2[dy:dy + TH].reshape(m2, 3 * Cpm)
        acc2 = acc2 + jnp.dot(a, w2_ref[dy], preferred_element_type=jnp.float32)

    out = jnp.maximum(acc2 + s2_ref[...], 0.0)
    o_ref[...] = out.reshape(TH, W, Cpo).astype(o_ref.dtype)


def _fold_stage(w_oihw, b, gamma, beta, mean, var, cin_p, cout_p, eps):
    """BN(eval) folded into the conv: bf16 weights (3, 3*cin_p, cout_p) with the dx
    taps folded into K and the BN scale multiplied in, plus the f32 per-channel shift."""
    cout, cin = w_oihw.shape[0], w_oihw.shape[1]
    scale = gamma / jnp.sqrt(var + eps)
    shift = (b - mean) * scale + beta
    wf = w_oihw * scale[:, None, None, None]            # fold BN scale into the weights
    w = jnp.transpose(wf, (2, 3, 1, 0))                 # (dy, dx, Cin, Cout)
    w = jnp.pad(w, ((0, 0), (0, 0), (0, cin_p - cin), (0, cout_p - cout)))
    w = w.reshape(3, 3 * cin_p, cout_p).astype(jnp.bfloat16)
    shift = jnp.pad(shift, (0, cout_p - cout)).reshape(1, cout_p).astype(jnp.float32)
    return w, shift


def double_conv_forward(x_nchw, params, *, eps=1e-5):
    """DoubleConv forward. x_nchw: (N, Cin, H, W) -> (N, Cout, H, W)."""
    N, Cin, H, W = x_nchw.shape
    Cmid, Cout = params["w1"].shape[0], params["w2"].shape[0]
    Cpi, Cpm, Cpo = (_round_up(c, LANE) for c in (Cin, Cmid, Cout))
    TH = _pick_row_tile(H)
    S = H // TH
    Wp = W + 4  # input width incl. the fused 2-col halo

    # Layout glue (one copy): NCHW -> NHWC, 2-px spatial halo for the fused double conv,
    # channels padded to the lane width, cast to bf16 for the MXU.
    x = jnp.transpose(x_nchw, (0, 2, 3, 1))
    x = jnp.pad(x, ((0, 0), (2, 2), (2, 2), (0, Cpi - Cin))).astype(jnp.bfloat16)

    w1p, s1 = _fold_stage(params["w1"], params["b1"], params["gamma1"],
                          params["beta1"], params["mean1"], params["var1"],
                          Cpi, Cpm, eps)
    w2p, s2 = _fold_stage(params["w2"], params["b2"], params["gamma2"],
                          params["beta2"], params["mean2"], params["var2"],
                          Cpm, Cpo, eps)

    kernel = functools.partial(_double_conv_kernel, TH=TH, W=W, H=H)
    out = pl.pallas_call(
        kernel,
        out_shape=jax.ShapeDtypeStruct((N, H, W, Cpo), jnp.float32),
        grid_spec=pltpu.PrefetchScalarGridSpec(
            num_scalar_prefetch=0,
            grid=(N, S),
            in_specs=[
                # main TH-row slab of the padded input for strip s
                pl.BlockSpec((pl.Squeezed(), TH, Wp, Cpi),
                             lambda n, s: (n, s, 0, 0)),
                # 4-row bottom halo of the SAME array: block size 4 => element offset
                # (s+1)*TH, so adjacent strips overlap without manual DMA.
                pl.BlockSpec((pl.Squeezed(), 4, Wp, Cpi),
                             lambda n, s: (n, (s + 1) * (TH // 4), 0, 0)),
                pl.BlockSpec((3, 3 * Cpi, Cpm), lambda n, s: (0, 0, 0)),
                pl.BlockSpec((1, Cpm), lambda n, s: (0, 0)),
                pl.BlockSpec((3, 3 * Cpm, Cpo), lambda n, s: (0, 0, 0)),
                pl.BlockSpec((1, Cpo), lambda n, s: (0, 0)),
            ],
            out_specs=pl.BlockSpec((pl.Squeezed(), TH, W, Cpo),
                                   lambda n, s: (n, s, 0, 0)),
        ),
        compiler_params=pltpu.CompilerParams(
            dimension_semantics=("parallel", "parallel"),
            vmem_limit_bytes=32 * 1024 * 1024),
    )(x, x, w1p, s1, w2p, s2)

    out = out[:, :, :, :Cout]                   # drop lane padding
    return jnp.transpose(out, (0, 3, 1, 2))     # NHWC -> NCHW


# ----------------------------- references & test ------------------------------

def _ref_stage(x, w, b, gamma, beta, mean, var, eps, bf16):
    scale = gamma / jnp.sqrt(var + eps)
    shift = (b - mean) * scale + beta
    wf = w * scale[:, None, None, None]
    if bf16:
        wf = wf.astype(jnp.bfloat16).astype(jnp.float32)
        x = x.astype(jnp.bfloat16).astype(jnp.float32)
    y = lax.conv_general_dilated(x, wf, (1, 1), ((1, 1), (1, 1)),
                                 dimension_numbers=("NCHW", "OIHW", "NCHW"))
    return jnp.maximum(y + shift[None, :, None, None], 0.0)


def _reference_forward(x, params, eps=1e-5, bf16=False):
    p = params
    y = _ref_stage(x, p["w1"], p["b1"], p["gamma1"], p["beta1"],
                   p["mean1"], p["var1"], eps, bf16)
    return _ref_stage(y, p["w2"], p["b2"], p["gamma2"], p["beta2"],
                      p["mean2"], p["var2"], eps, bf16)


def init_params(key, in_channels, mid_channels, out_channels):
    k1, k2, k3, k4 = jax.random.split(key, 4)
    return {
        "w1": jax.random.normal(k1, (mid_channels, in_channels, 3, 3), jnp.float32) * 0.1,
        "b1": jax.random.normal(k2, (mid_channels,), jnp.float32) * 0.1,
        "gamma1": jnp.ones((mid_channels,), jnp.float32),
        "beta1": jnp.zeros((mid_channels,), jnp.float32),
        "mean1": jnp.zeros((mid_channels,), jnp.float32),
        "var1": jnp.ones((mid_channels,), jnp.float32),
        "w2": jax.random.normal(k3, (out_channels, mid_channels, 3, 3), jnp.float32) * 0.1,
        "b2": jax.random.normal(k4, (out_channels,), jnp.float32) * 0.1,
        "gamma2": jnp.ones((out_channels,), jnp.float32),
        "beta2": jnp.zeros((out_channels,), jnp.float32),
        "mean2": jnp.zeros((out_channels,), jnp.float32),
        "var2": jnp.ones((out_channels,), jnp.float32),
    }


if __name__ == "__main__":
    N, Cin, H, W = 2, 4, 16, 16
    Cmid, Cout = 8, 8  # mid_channels defaults to out_channels

    key = jax.random.PRNGKey(0)
    kx, kp = jax.random.split(key)
    x = jax.random.normal(kx, (N, Cin, H, W), jnp.float32)
    params = init_params(kp, Cin, Cmid, Cout)

    out = jax.jit(double_conv_forward)(x, params)
    out = jax.block_until_ready(out)
    assert out.shape == (N, Cout, H, W)

    ref_bf16 = _reference_forward(x, params, bf16=True)    # mirrors the kernel's bf16 math
    ref_f32 = _reference_forward(x, params, bf16=False)    # the module's f32 semantics
    assert jnp.allclose(out, ref_bf16, atol=1e-3, rtol=1e-3), "mismatch vs bf16 reference"
    assert jnp.allclose(out, ref_f32, atol=5e-2, rtol=5e-2), "mismatch vs f32 reference"

    print("KERNEL_OK")
</pallas_src>

<mosaic_0001>
module attributes {stable_mosaic.version = 11 : i64} {
  func.func @_double_conv_kernel(%arg0: i32, %arg1: i32, %arg2: memref<1x8x20x128xbf16, #tpu.memory_space<vmem>>, %arg3: memref<1x4x20x128xbf16, #tpu.memory_space<vmem>>, %arg4: memref<3x384x128xbf16, #tpu.memory_space<vmem>>, %arg5: memref<1x128xf32, #tpu.memory_space<vmem>>, %arg6: memref<3x384x128xbf16, #tpu.memory_space<vmem>>, %arg7: memref<1x128xf32, #tpu.memory_space<vmem>>, %arg8: memref<1x8x16x128xf32, #tpu.memory_space<vmem>>) attributes {dimension_semantics = [#tpu.dimension_semantics<parallel>, #tpu.dimension_semantics<parallel>], iteration_bounds = array<i64: 2, 2>, scalar_prefetch = 0 : i64, scratch_operands = 0 : i64, tpu.core_type = #tpu.core_type<tc>, window_params = [{transform_indices = @transform_0, window_bounds = array<i64: 1, 8, 20, 128>}, {transform_indices = @transform_1, window_bounds = array<i64: 1, 4, 20, 128>}, {pipeline_mode = #tpu.pipeline_mode<synchronous>, transform_indices = @transform_2, window_bounds = array<i64: 3, 384, 128>}, {pipeline_mode = #tpu.pipeline_mode<synchronous>, transform_indices = @transform_3, window_bounds = array<i64: 1, 128>}, {pipeline_mode = #tpu.pipeline_mode<synchronous>, transform_indices = @transform_4, window_bounds = array<i64: 3, 384, 128>}, {pipeline_mode = #tpu.pipeline_mode<synchronous>, transform_indices = @transform_5, window_bounds = array<i64: 1, 128>}, {transform_indices = @transform_6, window_bounds = array<i64: 1, 8, 16, 128>}]} {
    %c0 = arith.constant 0 : index
    %c0_0 = arith.constant 0 : index
    %c0_1 = arith.constant 0 : index
    %c0_2 = arith.constant 0 : index
    %0 = vector.load %arg2[%c0, %c0_0, %c0_1, %c0_2] : memref<1x8x20x128xbf16, #tpu.memory_space<vmem>>, vector<1x8x20x128xbf16>
    %1 = vector.shape_cast %0 : vector<1x8x20x128xbf16> to vector<8x20x128xbf16>
    %c0_3 = arith.constant 0 : index
    %c0_4 = arith.constant 0 : index
    %c0_5 = arith.constant 0 : index
    %c0_6 = arith.constant 0 : index
    %2 = vector.load %arg3[%c0_3, %c0_4, %c0_5, %c0_6] : memref<1x4x20x128xbf16, #tpu.memory_space<vmem>>, vector<1x4x20x128xbf16>
    %3 = vector.shape_cast %2 : vector<1x4x20x128xbf16> to vector<4x20x128xbf16>
    %4 = tpu.concatenate %1, %3 in 0 : vector<8x20x128xbf16>, vector<4x20x128xbf16> -> vector<12x20x128xbf16>
    %5 = vector.extract_strided_slice %4 {offsets = [0, 0, 0], sizes = [12, 18, 128], strides = [1, 1, 1]} : vector<12x20x128xbf16> to vector<12x18x128xbf16>
    %6 = vector.extract_strided_slice %4 {offsets = [0, 1, 0], sizes = [12, 18, 128], strides = [1, 1, 1]} : vector<12x20x128xbf16> to vector<12x18x128xbf16>
    %7 = vector.extract_strided_slice %4 {offsets = [0, 2, 0], sizes = [12, 18, 128], strides = [1, 1, 1]} : vector<12x20x128xbf16> to vector<12x18x128xbf16>
    %8 = tpu.concatenate %5, %6, %7 in 2 : vector<12x18x128xbf16>, vector<12x18x128xbf16>, vector<12x18x128xbf16> -> vector<12x18x384xbf16>
    %cst = arith.constant 0.000000e+00 : f32
    %9 = vector.broadcast %cst : f32 to vector<180x128xf32>
    %10 = vector.extract_strided_slice %8 {offsets = [0, 0, 0], sizes = [10, 18, 384], strides = [1, 1, 1]} : vector<12x18x384xbf16> to vector<10x18x384xbf16>
    %11 = vector.shape_cast %10 : vector<10x18x384xbf16> to vector<180x384xbf16>
    %c0_7 = arith.constant 0 : index
    %c0_8 = arith.constant 0 : index
    %c0_9 = arith.constant 0 : index
    %12 = vector.load %arg4[%c0_7, %c0_8, %c0_9] : memref<3x384x128xbf16, #tpu.memory_space<vmem>>, vector<1x384x128xbf16>
    %13 = vector.shape_cast %12 : vector<1x384x128xbf16> to vector<384x128xbf16>
    %cst_10 = arith.constant dense<0.000000e+00> : vector<180x128xf32>
    %14 = tpu.matmul %11, %13, %cst_10 {dimension_numbers = #tpu.dot_dimension_numbers<[1], [0], [0], [1], [0, 0, 1, 1], [], []>} : vector<180x384xbf16>, vector<384x128xbf16>, vector<180x128xf32> -> vector<180x128xf32>
    %15 = arith.addf %9, %14 : vector<180x128xf32>
    %16 = vector.extract_strided_slice %8 {offsets = [1, 0, 0], sizes = [10, 18, 384], strides = [1, 1, 1]} : vector<12x18x384xbf16> to vector<10x18x384xbf16>
    %17 = vector.shape_cast %16 : vector<10x18x384xbf16> to vector<180x384xbf16>
    %c1 = arith.constant 1 : index
    %c0_11 = arith.constant 0 : index
    %c0_12 = arith.constant 0 : index
    %18 = vector.load %arg4[%c1, %c0_11, %c0_12] : memref<3x384x128xbf16, #tpu.memory_space<vmem>>, vector<1x384x128xbf16>
    %19 = vector.shape_cast %18 : vector<1x384x128xbf16> to vector<384x128xbf16>
    %cst_13 = arith.constant dense<0.000000e+00> : vector<180x128xf32>
    %20 = tpu.matmul %17, %19, %cst_13 {dimension_numbers = #tpu.dot_dimension_numbers<[1], [0], [0], [1], [0, 0, 1, 1], [], []>} : vector<180x384xbf16>, vector<384x128xbf16>, vector<180x128xf32> -> vector<180x128xf32>
    %21 = arith.addf %15, %20 : vector<180x128xf32>
    %22 = vector.extract_strided_slice %8 {offsets = [2, 0, 0], sizes = [10, 18, 384], strides = [1, 1, 1]} : vector<12x18x384xbf16> to vector<10x18x384xbf16>
    %23 = vector.shape_cast %22 : vector<10x18x384xbf16> to vector<180x384xbf16>
    %c2 = arith.constant 2 : index
    %c0_14 = arith.constant 0 : index
    %c0_15 = arith.constant 0 : index
    %24 = vector.load %arg4[%c2, %c0_14, %c0_15] : memref<3x384x128xbf16, #tpu.memory_space<vmem>>, vector<1x384x128xbf16>
    %25 = vector.shape_cast %24 : vector<1x384x128xbf16> to vector<384x128xbf16>
    %cst_16 = arith.constant dense<0.000000e+00> : vector<180x128xf32>
    %26 = tpu.matmul %23, %25, %cst_16 {dimension_numbers = #tpu.dot_dimension_numbers<[1], [0], [0], [1], [0, 0, 1, 1], [], []>} : vector<180x384xbf16>, vector<384x128xbf16>, vector<180x128xf32> -> vector<180x128xf32>
    %27 = arith.addf %21, %26 : vector<180x128xf32>
    %c0_17 = arith.constant 0 : index
    %c0_18 = arith.constant 0 : index
    %28 = vector.load %arg5[%c0_17, %c0_18] : memref<1x128xf32, #tpu.memory_space<vmem>>, vector<1x128xf32>
    %29 = vector.broadcast %28 : vector<1x128xf32> to vector<180x128xf32>
    %30 = arith.addf %27, %29 : vector<180x128xf32>
    %cst_19 = arith.constant 0.000000e+00 : f32
    %31 = vector.broadcast %cst_19 : f32 to vector<180x128xf32>
    %32 = arith.maximumf %30, %31 : vector<180x128xf32>
    %33 = vector.shape_cast %32 : vector<180x128xf32> to vector<10x18x128xf32>
    %34 = tpu.iota {dimensions = array<i32: 0>} : vector<10x18x128xi32>
    %35 = tpu.iota {dimensions = array<i32: 1>} : vector<10x18x128xi32>
    %c8_i32 = arith.constant 8 : i32
    %36 = arith.muli %arg1, %c8_i32 : i32
    %37 = vector.broadcast %36 : i32 to vector<10x18x128xi32>
    %38 = arith.addi %37, %34 : vector<10x18x128xi32>
    %c1_i32 = arith.constant 1 : i32
    %39 = vector.broadcast %c1_i32 : i32 to vector<10x18x128xi32>
    %40 = arith.subi %38, %39 : vector<10x18x128xi32>
    %c0_i32 = arith.constant 0 : i32
    %41 = vector.broadcast %c0_i32 : i32 to vector<10x18x128xi32>
    %42 = arith.cmpi sge, %40, %41 : vector<10x18x128xi32>
    %c16_i32 = arith.constant 16 : i32
    %43 = vector.broadcast %c16_i32 : i32 to vector<10x18x128xi32>
    %44 = arith.cmpi slt, %40, %43 : vector<10x18x128xi32>
    %45 = arith.andi %42, %44 : vector<10x18x128xi1>
    %c1_i32_20 = arith.constant 1 : i32
    %46 = vector.broadcast %c1_i32_20 : i32 to vector<10x18x128xi32>
    %47 = arith.cmpi sge, %35, %46 : vector<10x18x128xi32>
    %48 = arith.andi %45, %47 : vector<10x18x128xi1>
    %c16_i32_21 = arith.constant 16 : i32
    %49 = vector.broadcast %c16_i32_21 : i32 to vector<10x18x128xi32>
    %50 = arith.cmpi sle, %35, %49 : vector<10x18x128xi32>
    %51 = arith.andi %48, %50 : vector<10x18x128xi1>
    %cst_22 = arith.constant 0.000000e+00 : f32
    %52 = vector.broadcast %cst_22 : f32 to vector<10x18x128xf32>
    %53 = arith.select %51, %33, %52 : vector<10x18x128xi1>, vector<10x18x128xf32>
    %54 = arith.truncf %53 : vector<10x18x128xf32> to vector<10x18x128xbf16>
    %55 = vector.extract_strided_slice %54 {offsets = [0, 0, 0], sizes = [10, 16, 128], strides = [1, 1, 1]} : vector<10x18x128xbf16> to vector<10x16x128xbf16>
    %56 = vector.extract_strided_slice %54 {offsets = [0, 1, 0], sizes = [10, 16, 128], strides = [1, 1, 1]} : vector<10x18x128xbf16> to vector<10x16x128xbf16>
    %57 = vector.extract_strided_slice %54 {offsets = [0, 2, 0], sizes = [10, 16, 128], strides = [1, 1, 1]} : vector<10x18x128xbf16> to vector<10x16x128xbf16>
    %58 = tpu.concatenate %55, %56, %57 in 2 : vector<10x16x128xbf16>, vector<10x16x128xbf16>, vector<10x16x128xbf16> -> vector<10x16x384xbf16>
    %cst_23 = arith.constant 0.000000e+00 : f32
    %59 = vector.broadcast %cst_23 : f32 to vector<128x128xf32>
    %60 = vector.extract_strided_slice %58 {offsets = [0, 0, 0], sizes = [8, 16, 384], strides = [1, 1, 1]} : vector<10x16x384xbf16> to vector<8x16x384xbf16>
    %61 = vector.shape_cast %60 : vector<8x16x384xbf16> to vector<128x384xbf16>
    %c0_24 = arith.constant 0 : index
    %c0_25 = arith.constant 0 : index
    %c0_26 = arith.constant 0 : index
    %62 = vector.load %arg6[%c0_24, %c0_25, %c0_26] : memref<3x384x128xbf16, #tpu.memory_space<vmem>>, vector<1x384x128xbf16>
    %63 = vector.shape_cast %62 : vector<1x384x128xbf16> to vector<384x128xbf16>
    %cst_27 = arith.constant dense<0.000000e+00> : vector<128x128xf32>
    %64 = tpu.matmul %61, %63, %cst_27 {dimension_numbers = #tpu.dot_dimension_numbers<[1], [0], [0], [1], [0, 0, 1, 1], [], []>} : vector<128x384xbf16>, vector<384x128xbf16>, vector<128x128xf32> -> vector<128x128xf32>
    %65 = arith.addf %59, %64 : vector<128x128xf32>
    %66 = vector.extract_strided_slice %58 {offsets = [1, 0, 0], sizes = [8, 16, 384], strides = [1, 1, 1]} : vector<10x16x384xbf16> to vector<8x16x384xbf16>
    %67 = vector.shape_cast %66 : vector<8x16x384xbf16> to vector<128x384xbf16>
    %c1_28 = arith.constant 1 : index
    %c0_29 = arith.constant 0 : index
    %c0_30 = arith.constant 0 : index
    %68 = vector.load %arg6[%c1_28, %c0_29, %c0_30] : memref<3x384x128xbf16, #tpu.memory_space<vmem>>, vector<1x384x128xbf16>
    %69 = vector.shape_cast %68 : vector<1x384x128xbf16> to vector<384x128xbf16>
    %cst_31 = arith.constant dense<0.000000e+00> : vector<128x128xf32>
    %70 = tpu.matmul %67, %69, %cst_31 {dimension_numbers = #tpu.dot_dimension_numbers<[1], [0], [0], [1], [0, 0, 1, 1], [], []>} : vector<128x384xbf16>, vector<384x128xbf16>, vector<128x128xf32> -> vector<128x128xf32>
    %71 = arith.addf %65, %70 : vector<128x128xf32>
    %72 = vector.extract_strided_slice %58 {offsets = [2, 0, 0], sizes = [8, 16, 384], strides = [1, 1, 1]} : vector<10x16x384xbf16> to vector<8x16x384xbf16>
    %73 = vector.shape_cast %72 : vector<8x16x384xbf16> to vector<128x384xbf16>
    %c2_32 = arith.constant 2 : index
    %c0_33 = arith.constant 0 : index
    %c0_34 = arith.constant 0 : index
    %74 = vector.load %arg6[%c2_32, %c0_33, %c0_34] : memref<3x384x128xbf16, #tpu.memory_space<vmem>>, vector<1x384x128xbf16>
    %75 = vector.shape_cast %74 : vector<1x384x128xbf16> to vector<384x128xbf16>
    %cst_35 = arith.constant dense<0.000000e+00> : vector<128x128xf32>
    %76 = tpu.matmul %73, %75, %cst_35 {dimension_numbers = #tpu.dot_dimension_numbers<[1], [0], [0], [1], [0, 0, 1, 1], [], []>} : vector<128x384xbf16>, vector<384x128xbf16>, vector<128x128xf32> -> vector<128x128xf32>
    %77 = arith.addf %71, %76 : vector<128x128xf32>
    %c0_36 = arith.constant 0 : index
    %c0_37 = arith.constant 0 : index
    %78 = vector.load %arg7[%c0_36, %c0_37] : memref<1x128xf32, #tpu.memory_space<vmem>>, vector<1x128xf32>
    %79 = vector.broadcast %78 : vector<1x128xf32> to vector<128x128xf32>
    %80 = arith.addf %77, %79 : vector<128x128xf32>
    %cst_38 = arith.constant 0.000000e+00 : f32
    %81 = vector.broadcast %cst_38 : f32 to vector<128x128xf32>
    %82 = arith.maximumf %80, %81 : vector<128x128xf32>
    %83 = vector.shape_cast %82 : vector<128x128xf32> to vector<8x16x128xf32>
    %c0_39 = arith.constant 0 : index
    %c0_40 = arith.constant 0 : index
    %c0_41 = arith.constant 0 : index
    %c0_42 = arith.constant 0 : index
    %84 = vector.load %arg8[%c0_39, %c0_40, %c0_41, %c0_42] : memref<1x8x16x128xf32, #tpu.memory_space<vmem>>, vector<1x8x16x128xf32>
    %85 = vector.shape_cast %84 : vector<1x8x16x128xf32> to vector<8x16x128xf32>
    %86 = vector.shape_cast %83 : vector<8x16x128xf32> to vector<1x8x16x128xf32>
    tpu.vector_store %arg8[%c0_39, %c0_40, %c0_41, %c0_42], %86 {strides = array<i32>} : memref<1x8x16x128xf32, #tpu.memory_space<vmem>>, vector<1x8x16x128xf32>,
    return
  }
  func.func @transform_0(%arg0: i32, %arg1: i32) -> (i32, i32, i32, i32) {
    %c0_i32 = arith.constant 0 : i32
    %c0_i32_0 = arith.constant 0 : i32
    %c0_i32_1 = arith.constant 0 : i32
    return %arg0, %arg1, %c0_i32, %c0_i32_0 : i32, i32, i32, i32
  }
  func.func @transform_1(%arg0: i32, %arg1: i32) -> (i32, i32, i32, i32) {
    %c1_i32 = arith.constant 1 : i32
    %0 = arith.addi %arg1, %c1_i32 : i32
    %c2_i32 = arith.constant 2 : i32
    %1 = arith.muli %0, %c2_i32 : i32
    %c0_i32 = arith.constant 0 : i32
    %c0_i32_0 = arith.constant 0 : i32
    %c0_i32_1 = arith.constant 0 : i32
    return %arg0, %1, %c0_i32, %c0_i32_0 : i32, i32, i32, i32
  }
  func.func @transform_2(%arg0: i32, %arg1: i32) -> (i32, i32, i32) {
    %c0_i32 = arith.constant 0 : i32
    %c0_i32_0 = arith.constant 0 : i32
    %c0_i32_1 = arith.constant 0 : i32
    %c0_i32_2 = arith.constant 0 : i32
    return %c0_i32, %c0_i32_0, %c0_i32_1 : i32, i32, i32
  }
  func.func @transform_3(%arg0: i32, %arg1: i32) -> (i32, i32) {
    %c0_i32 = arith.constant 0 : i32
    %c0_i32_0 = arith.constant 0 : i32
    %c0_i32_1 = arith.constant 0 : i32
    return %c0_i32, %c0_i32_0 : i32, i32
  }
  func.func @transform_4(%arg0: i32, %arg1: i32) -> (i32, i32, i32) {
    %c0_i32 = arith.constant 0 : i32
    %c0_i32_0 = arith.constant 0 : i32
    %c0_i32_1 = arith.constant 0 : i32
    %c0_i32_2 = arith.constant 0 : i32
    return %c0_i32, %c0_i32_0, %c0_i32_1 : i32, i32, i32
  }
  func.func @transform_5(%arg0: i32, %arg1: i32) -> (i32, i32) {
    %c0_i32 = arith.constant 0 : i32
    %c0_i32_0 = arith.constant 0 : i32
    %c0_i32_1 = arith.constant 0 : i32
    return %c0_i32, %c0_i32_0 : i32, i32
  }
  func.func @transform_6(%arg0: i32, %arg1: i32) -> (i32, i32, i32, i32) {
    %c0_i32 = arith.constant 0 : i32
    %c0_i32_0 = arith.constant 0 : i32
    %c0_i32_1 = arith.constant 0 : i32
    return %arg0, %arg1, %c0_i32, %c0_i32_0 : i32, i32, i32, i32
  }
}

</mosaic_0001>

<bundles_post_ra>
// kernel: double_conv_forward.1
= control target key start
LH: loop header
LB: loop body
LE: loop exit
PB: predicated region body
PF: predicated region fallthrough
CT: control target
= control target key end

     0   :  { %s9670_s21 = smov 0   ;;  %s9672_s22 = smov 0   ;;  %s13076_s0 = inlined_call_operand.vmem [shape: bf16[2,20,20,128], index: 0, kind: input, shape index: {}, may-alias: {0,1}]   ;;  %s13077_s1 = inlined_call_operand.vmem [shape: bf16[2,20,20,128], index: 1, kind: input, shape index: {}, may-alias: {0,1}]   ;;  %s13078_s2 = inlined_call_operand.vmem [shape: bf16[3,384,128], index: 2, kind: input, shape index: {}]   ;;  %s13079_s3 = inlined_call_operand.vmem [shape: f32[1,128], index: 3, kind: input, shape index: {}]   ;;  %s13080_s4 = inlined_call_operand.vmem [shape: bf16[3,384,128], index: 4, kind: input, shape index: {}]   ;;  %s13081_s5 = inlined_call_operand.vmem [shape: f32[1,128], index: 5, kind: input, shape index: {}]   ;;  %s13082_s6 = inlined_call_operand.vmem [shape: f32[2,16,16,128], index: 6, kind: output, shape index: {}]  }
   0x1   :  { %s9674_s23 = smov 0   ;;  %s9676_s24 = smov 0  }
   0x2   :  { %s9678_s25 = smov 0  }
   0x3 LB: > { %s25_s26 = sadd.s32 1, %s9623_s23  ;;  %s28_s27 = sadd.s32 1, %s9627_s24  ;;  %s9631_s25 = sphi %s9678_s25, %s16_s25   ;;  %s9627_s24 = sphi %s9676_s24, %s13430_s24   ;;  %s9623_s23 = sphi %s9674_s23, %s13429_s23   ;;  %s9619_s22 = sphi %s9672_s22, %s13428_s22   ;;  %s9615_s21 = sphi %s9670_s21, %s13427_s21  }
   0x4   : > { %p26_p0 = scmp.ge.s32.totalorder %s25_s26, 2  ;;  %p7891_p1 = scmp.ge.s32.totalorder %s9631_s25, 1 }
   0x5   : > { %p270_p2 = scmp.lt.s32.totalorder %s9631_s25, 5 }
   0x6   : > { %s13432_s26 = smov (%p26_p0, %s25_s26), 0  ;;  %s13434_s27 = smov (!%p26_p0, %s28_s27), %s9627_s24 }
   0x7   : > { %p271_p3 = pnand %p7891_p1, %p270_p2  ;;  %p30_p4 = scmp.ge.s32.totalorder %s13434_s27, 2 }
   0x9   : > { %s13436_s27 = smov (%p30_p4, %s13434_s27), 0  ;;  %274 = sbr.rel (%p271_p3) target bundleno = 984 (0x3d8), region = 44 }
  0x10   : > { %v9423_v0 = vld [vmem:[%s13078_s2 + $0x100] sm:$0xff]   ;;  %s9705_s30 = sshll.u32 %s9615_s21, 3  ;;  %p333_p5 = scmp.lt.s32.totalorder %s9619_s22, 1  ;;  %v9426_v3 = vld [vmem:[%s13078_s2 + $0x108] sm:$0xff]   ;;  %v9429_v6 = vld [vmem:[%s13078_s2 + $0x110] sm:$0xff]   ;;  %v731_v21 = vlaneseq  ;;  %vm13182_vm0 = vcmask 1046528  }
  0x11   : > { %v9424_v1 = vld [vmem:[%s13078_s2 + $0xc0] sm:$0xff]   ;;  %8402 = vmatprep.subr.bf16.mxu0 %v9423_v0  ;;  %p335_p6 = scmp.lt.s32.totalorder %s9705_s30, 19  ;;  %v9427_v4 = vld [vmem:[%s13078_s2 + $0xc8] sm:$0xff]   ;;  %v9430_v7 = vld [vmem:[%s13078_s2 + $0xd0] sm:$0xff]   ;;  %v9633_v30 = vmov 1966171168  }
  0x12   : > { %v9425_v2 = vld [vmem:[%s13078_s2 + $0x140] sm:$0xff]   ;;  %8403 = vmatpush3.bf16.msra.mxu0 %v9424_v1  ;;  %v9428_v5 = vld [vmem:[%s13078_s2 + $0x148] sm:$0xff]   ;;  %s13438_s22 = smov (!%p333_p5, %s9619_s22), 1  ;;  %v9431_v8 = vld [vmem:[%s13078_s2 + $0x150] sm:$0xff]   ;;  %v729_v31 = vunpack.c.l.s4 %v9633_v30  ;;  %v9796_v32 = vshrl.u32 %v731_v21, 7  ;;  %p366_p8 = scmp.lt.s32.totalorder %s9705_s30, 15 }
  0x13   : > { %8966 = vmatprep.subr.bf16.mxu1 %v9425_v2  ;;  %8404 = vmatprep.subr.bf16.mxu0 %v9426_v3  ;;  %s336_s21 = scalar_select %p335_p6, %s9705_s30, 19  ;;  %v9432_v9 = vld [vmem:[%s13078_s2 + $0x118] sm:$0xff]   ;;  %v9435_v12 = vld [vmem:[%s13078_s2 + $0x120] sm:$0xff]   ;;  %v9438_v15 = vld [vmem:[%s13078_s2 + $0x128] sm:$0xff]   ;;  %vm13185_vm1 = vsmask.f32 7424 }
  0x14   : > { %8967 = vmatpush3.bf16.msra.mxu1 %v9425_v2  ;;  %v9433_v10 = vld [vmem:[%s13078_s2 + $0xd8] sm:$0xff]   ;;  %s9379_s11 = smul.u32 60, %s13438_s22  ;;  %v9437_v13 = vld [vmem:[%s13078_s2 + $0x160] sm:$0xff]   ;;  %v9440_v16 = vld [vmem:[%s13078_s2 + $0x168] sm:$0xff]   ;;  %13190 = vst [vmem:[#allocation2_spill] sm:$0xff] %v9796_v32  ;;  %v730_v38 = vunpack.c.0.s8 %v729_v31 }
  0x15   : > { %8968 = vmatprep.subr.bf16.mxu1 %v9428_v5  ;;  %v9434_v11 = vld [vmem:[%s13078_s2 + $0x158] sm:$0xff]   ;;  %s9378_s14 = smul.u32 3, %s336_s21  ;;  %v9436_v14 = vld [vmem:[%s13078_s2 + $0xe0] sm:$0xff]   ;;  %v9439_v17 = vld [vmem:[%s13078_s2 + $0xe8] sm:$0xff]  }
  0x16   : > { %8405 = vmatpush3.bf16.msra.mxu0 %v9427_v4  ;;  %v9441_v18 = vld [vmem:[%s13078_s2 + $0x130] sm:$0xff]   ;;  %v9444_v22 = vld [vmem:[%s13078_s2 + $0x138] sm:$0xff]   ;;  %v9810_v47 = vsub.s32 %v730_v38, %v9796_v32  ;;  %v9449_v48 = vld [vmem:[%s13078_s2 + $0x40] sm:$0xff]  }
  0x17   : > { %8406 = vmatprep.subr.bf16.mxu0 %v9429_v6  ;;  %s339_s28 = sadd.s32 %s9379_s11, %s9378_s14  ;;  %v9442_v19 = vld [vmem:[%s13078_s2 + $0xf0] sm:$0xff]   ;;  %v9445_v26 = vld [vmem:[%s13078_s2 + $0xf8] sm:$0xff]   ;;  %s8401_s14 = sadd.s32 8, %s9705_s30 }
  0x18   : > { %8969 = vmatpush3.bf16.msra.mxu1 %v9428_v5  ;;  %s7893_s9 = sshll.u32 %s339_s28, 2  ;;  %v9443_v20 = vld [vmem:[%s13078_s2 + $0x170] sm:$0xff]   ;;  %v9446_v29 = vld [vmem:[%s13078_s2 + $0x178] sm:$0xff]   ;;  %p10003_p7 = scmp.lt.s32.totalorder %s8401_s14, 19 }
  0x19   : > { %8970 = vmatprep.subr.bf16.mxu1 %v9431_v8  ;;  %s9776_s19 = scalar_lea.vmem %s13076_s0, %s7893_s9 }
  0x1a   : > { %8407 = vmatpush3.bf16.msra.mxu0 %v9430_v7  ;;  %v9785_v23 = vld [vmem:[%s9776_s19 + $0xc] sm:$0xf]  ;;  %v379_v24 = vld [vmem:[%s9776_s19 + $0x10] sm:$0xf]  ;;  %v380_v25 = vld [vmem:[%s9776_s19 + $0x14] sm:$0x3] }
  0x1b   : > { %8408 = vmatprep.subr.bf16.mxu0 %v9432_v9  ;;  %v7903_v27 = vcombine.low %v9785_v23, %v379_v24  ;;  %v7904_v28 = vcombine.low %v380_v25, %v380_v25  ;;  %v9799_v39 = vld [vmem:[%s9776_s19 + $0x18] sm:$0xf]  ;;  %v382_v40 = vld [vmem:[%s9776_s19 + $0x1c] sm:$0xf]  ;;  %v9803_v43 = vld [vmem:[%s9776_s19 + $0x20] sm:$0x3] }
  0x1c   : > { %8971 = vmatpush3.bf16.msra.mxu1 %v9431_v8  ;;  %v9806_v44 = vcombine.low %v9799_v39, %v382_v40  ;;  %v9817_v49 = vcombine.low %v9803_v43, %v9803_v43  ;;  %v9821_v54 = vld [vmem:[%s9776_s19 + $0x24] sm:$0xf]  ;;  %v385_v55 = vld [vmem:[%s9776_s19 + $0x28] sm:$0xf]  ;;  %v9829_v60 = vld [vmem:[%s9776_s19 + $0x2c] sm:$0x3] }
  0x1d   : > { %8972 = vmatprep.subr.bf16.mxu1 %v9434_v11  ;;  %v524_v33 = vshrl.u32 %v7903_v27, 16  ;;  %v526_v34 = vshll.u32 %v7903_v27, 16  ;;  %v531_v35 = vshll.u32 %v7904_v28, 16  ;;  %v692_v36 = vrot.slane %v7903_v27, 1  ;;  %s13440_s14 = smov (!%p10003_p7, %s8401_s14), 19 }
  0x1e   : > { %8409 = vmatpush3.bf16.msra.mxu0 %v9433_v10  ;;  %v693_v37 = vrot.slane %v7904_v28, 1  ;;  %v535_v45 = vshrl.u32 %v7904_v28, 16  ;;  %v539_v53 = vshrl.u32 %v9806_v44, 16  ;;  %v541_v57 = vshll.u32 %v9806_v44, 16  ;;  %s9380_s12 = smul.u32 3, %s13440_s14 }
  0x1f   : > { %8410 = vmatprep.subr.bf16.mxu0 %v9435_v12  ;;  %v528_v41 = vrot.slane %v526_v34, 1  ;;  %v533_v42 = vrot.slane %v531_v35, 1  ;;  %v546_v58 = vshll.u32 %v9817_v49, 16  ;;  %v695_v59 = vrot.slane %v9806_v44, 1 }
  0x20   : > { %8973 = vmatpush3.bf16.msra.mxu1 %v9434_v11  ;;  %v694_v46 = vsel %vm13182_vm0, %v692_v36, %v693_v37  ;;  %v696_v63 = vrot.slane %v9817_v49, 1  ;;  %v543_v3 = vrot.slane %v541_v57, 1  ;;  %v896_v7 = vrot.slane %v693_v37, %v9810_v47  ;;  %s10190_s14 = sadd.s32 %s9380_s12, %s9379_s11 }
  0x21   : > { %8974 = vmatprep.subr.bf16.mxu1 %v9437_v13  ;;  %v529_v50 = vor.u32 %v528_v41, %v524_v33  ;;  %v817_v51 = vcombine.high %v694_v46, %v694_v46  ;;  %v537_v52 = vor.u32 %v535_v45, %v533_v42  ;;  %v838_v56 = vrot.slane %v694_v46, %v9810_v47  ;;  %s7896_s11 = sshll.u32 %s10190_s14, 2 }
  0x22   : > { %8411 = vmatpush3.bf16.msra.mxu0 %v9436_v14  ;;  %v548_v4 = vrot.slane %v546_v58, 1  ;;  %v697_v5 = vsel %vm13182_vm0, %v695_v59, %v696_v63  ;;  %v9841_v8 = vcombine.low %v9821_v54, %v385_v55  ;;  %v544_v11 = vor.u32 %v543_v3, %v539_v53  ;;  %s10310_s9 = scalar_lea.vmem %s13077_s1, %s7896_s11 }
  0x23   : > { %8412 = vmatprep.subr.bf16.mxu0 %v9438_v15  ;;  %v534_v61 = vsel %vm13185_vm1, %v529_v50, %v533_v42  ;;  %v845_v62 = vrot.slane %v817_v51, %v9810_v47  ;;  %v7928_v0 = vcombine.low %v380_v25, %v537_v52  ;;  %v907_v12 = vcombine.high %v697_v5, %v697_v5  ;;  %v10350_v32 = vld [vmem:[%s10310_s9 + $0x8] sm:$0x3] }
  0x24   : > { %8975 = vmatpush3.bf16.msra.mxu1 %v9437_v13  ;;  %v7927_v1 = vcombine.low %v9785_v23, %v534_v61  ;;  %v816_v2 = vcombine.high %v7903_v27, %v534_v61  ;;  %v928_v14 = vrot.slane %v697_v5, %v9810_v47  ;;  %v9848_v15 = vcombine.low %v9829_v60, %v9829_v60 }
  0x25   : > { %8976 = vmatprep.subr.bf16.mxu1 %v9440_v16  ;;  %v889_v6 = vrot.slane %v7928_v0, %v9810_v47  ;;  %v549_v21 = vsel %vm13185_vm1, %v544_v11, %v548_v4  ;;  %v935_v23 = vrot.slane %v907_v12, %v9810_v47  ;;  %v554_v31 = vshrl.u32 %v9841_v8, 16  ;;  %v9917_v12 = vld [vmem:[%s13078_s2] sm:$0xff]  }
  0x26   : > { %8413 = vmatpush3.bf16.msra.mxu0 %v9439_v17  ;;  %v824_v9 = vrot.slane %v7927_v1, %v9810_v47  ;;  %v831_v10 = vrot.slane %v816_v2, %v9810_v47  ;;  %v906_v30 = vcombine.high %v9806_v44, %v549_v21  ;;  %v556_v33 = vshll.u32 %v9841_v8, 16 }
  0x27   : > { %8414 = vmatprep.subr.bf16.mxu0 %v9441_v18  ;;  %v897_v13 = vcombine.low %v889_v6, %v896_v7  ;;  %v561_v41 = vshll.u32 %v9848_v15, 16 }
  0x28   : > { %8977 = vmatpush3.bf16.msra.mxu1 %v9440_v16  ;;  %v550_v16 = vshrl.u32 %v9817_v49, 16  ;;  %v846_v17 = vcombine.low %v824_v9, %v838_v56  ;;  %v847_v18 = vcombine.high %v824_v9, %v838_v56  ;;  %v558_v40 = vrot.slane %v556_v33, 1 }
  0x29   : > { %8978 = vmatprep.subr.bf16.mxu1 %v9443_v20 }
  0x2a   : > { %8415 = vmatpush3.bf16.msra.mxu0 %v9442_v19  ;;  %v848_v19 = vcombine.low %v831_v10, %v845_v62  ;;  %v9856_v24 = vor.u32 %v550_v16, %v548_v4  ;;  %v9859_v25 = vrot.slane %v846_v17, %v9810_v47  ;;  %v9865_v27 = vrot.slane %v847_v18, %v9810_v47 }
  0x2b   : > { %8416 = vmatprep.subr.bf16.mxu0 %v9444_v22  ;;  %v9853_v22 = vrot.slane %v897_v13, %v9810_v47  ;;  %v559_v13 = vor.u32 %v558_v40, %v554_v31  ;;  %v9457_v31 = vld [vmem:[%s13078_s2 + $0x48] sm:$0xff]  }
  0x2c   : > { %8979 = vmatpush3.bf16.msra.mxu1 %v9443_v20  ;;  %v849_v20 = vcombine.high %v831_v10, %v845_v62  ;;  %13192 = vst [vmem:[#allocation4_spill] sm:$0xff] %v9859_v25  ;;  %13194 = vst [vmem:[#allocation6_spill] sm:$0xff] %v9865_v27  ;;  %v1812_v34 = vcombine.low %v9859_v25, %v9865_v27  ;;  %v7995_v35 = vcombine.high %v9859_v25, %v9865_v27 }
  0x2d   : > { %8980 = vmatprep.subr.bf16.mxu1 %v9446_v29  ;;  %13191 = vst [vmem:[#allocation3_spill] sm:$0xff] %v9853_v22 }
  0x2e   : > { %8417 = vmatpush3.bf16.msra.mxu0 %v9445_v26  ;;  %v9862_v26 = vrot.slane %v848_v19, %v9810_v47  ;;  %v9868_v28 = vrot.slane %v849_v20, %v9810_v47  ;;  %v1822_v42 = vrot.slane %v1812_v34, %v9810_v47  ;;  %v1829_v44 = vrot.slane %v7995_v35, %v9810_v47  ;;  %v388_v20 = vld [vmem:[%s9776_s19 + $0x34] sm:$0xf] }
  0x2f   : > { %8510 = vmatprep.subr.bf16.mxu0 %v9449_v48 }
  0x30   : > { %8981 = vmatpush3.bf16.msra.mxu1 %v9446_v29  ;;  %13193 = vst [vmem:[#allocation5_spill] sm:$0xff] %v9862_v26  ;;  %13195 = vst [vmem:[#allocation7_spill] sm:$0xff] %v9868_v28  ;;  %v7929_v29 = vcombine.low %v9799_v39, %v549_v21  ;;  %v1814_v36 = vcombine.low %v9862_v26, %v9868_v28  ;;  %v7996_v37 = vcombine.high %v9862_v26, %v9868_v28 }
  0x31   : > { %9182 = vmatprep.subr.bf16.mxu1 %v9449_v48  ;;  %v921_v39 = vrot.slane %v906_v30, %v9810_v47  ;;  %v1845_v53 = vcombine.high %v1822_v42, %v1829_v44  ;;  %v1844_v56 = vcombine.low %v1822_v42, %v1829_v44  ;;  %v563_v21 = vrot.slane %v561_v41, 1  ;;  %v9458_v41 = vld [vmem:[%s13078_s2 + $0x8] sm:$0xff]  }
  0x32   : > { %v914_v38 = vrot.slane %v7929_v29, %v9810_v47  ;;  %v1836_v45 = vrot.slane %v1814_v36, %v9810_v47  ;;  %v1843_v46 = vrot.slane %v7996_v37, %v9810_v47  ;;  %v699_v29 = vrot.slane %v9848_v15, 1 }
  0x33   : > { %v938_v51 = vcombine.low %v921_v39, %v935_v23  ;;  %v939_v52 = vcombine.high %v921_v39, %v935_v23  ;;  %v1861_v0 = vrot.slane %v1845_v53, %v9810_v47  ;;  %v1854_v2 = vrot.slane %v1844_v56, %v9810_v47 }
  0x34   : > { %v936_v48 = vcombine.low %v914_v38, %v928_v14  ;;  %v937_v50 = vcombine.high %v914_v38, %v928_v14  ;;  %v1847_v55 = vcombine.high %v1836_v45, %v1843_v46  ;;  %v1846_v57 = vcombine.low %v1836_v45, %v1843_v46  ;;  %v9920_v14 = vld [vmem:[%s9776_s19 + $0x30] sm:$0xf]  ;;  %v9954_v45 = vld [vmem:[%s9776_s19 + $0x38] sm:$0x3] }
  0x35   : > { %v9893_v59 = vrot.slane %v938_v51, %v9810_v47  ;;  %v9899_v62 = vrot.slane %v939_v52, %v9810_v47  ;;  %v698_v23 = vrot.slane %v9841_v8, 1  ;;  %v7930_v36 = vcombine.low %v9803_v43, %v9856_v24  ;;  %v9463_v46 = vld [vmem:[%s13078_s2 + $0x50] sm:$0xff]  }
  0x36   : > { %v9890_v58 = vrot.slane %v936_v48, %v9810_v47  ;;  %v9896_v61 = vrot.slane %v937_v50, %v9810_v47  ;;  %v1875_v1 = vrot.slane %v1847_v55, %v9810_v47  ;;  %v1868_v3 = vrot.slane %v1846_v57, %v9810_v47 }
  0x37   : > { %13197 = vst [vmem:[#allocation9_spill] sm:$0xff] %v9893_v59  ;;  %13199 = vst [vmem:[#allocation11_spill] sm:$0xff] %v9899_v62  ;;  %v969_v5 = vcombine.high %v9893_v59, %v9893_v59  ;;  %v971_v30 = vcombine.high %v9899_v62, %v9899_v62  ;;  %v564_v37 = vsel %vm13185_vm1, %v559_v13, %v563_v21  ;;  %v565_v13 = vshrl.u32 %v9848_v15, 16 }
  0x38   : > { %13196 = vst [vmem:[#allocation8_spill] sm:$0xff] %v9890_v58  ;;  %13198 = vst [vmem:[#allocation10_spill] sm:$0xff] %v9896_v61  ;;  %v968_v4 = vcombine.high %v9890_v58, %v9890_v58  ;;  %v970_v6 = vcombine.high %v9896_v61, %v9896_v61  ;;  %v1879_v7 = vcombine.low %v9853_v22, %v9890_v58  ;;  %v10473_v22 = vld [vmem:[%s10310_s9 + $0x14] sm:$0x3] }
  0x39   : > { %v1878_v9 = vcombine.low %v1861_v0, %v1875_v1  ;;  %v1876_v10 = vcombine.low %v1854_v2, %v1868_v3  ;;  %v1877_v11 = vcombine.high %v1854_v2, %v1868_v3  ;;  %v1882_v18 = vcombine.low %v9899_v62, %v969_v5 }
  0x3a   : > { %v1880_v16 = vcombine.low %v9896_v61, %v968_v4  ;;  %v1881_v17 = vcombine.low %v970_v6, %v9893_v59  ;;  %v1889_v19 = vrot.slane %v1879_v7, %v9810_v47  ;;  %v700_v38 = vsel %vm13182_vm0, %v698_v23, %v699_v29  ;;  %v9466_v4 = vld [vmem:[%s13078_s2 + $0x10] sm:$0xff]   ;;  %v9469_v23 = vld [vmem:[%s13078_s2 + $0x58] sm:$0xff]  }
  0x3b   : > { %2785 = vmatprep.mubr.bf16.mxu0 %v1878_v9  ;;  %8982 = vmatprep.mubr.bf16.mxu1 %v1877_v11  ;;  %v1910_v35 = vrot.slane %v1882_v18, %v9810_v47  ;;  %v986_v39 = vrot.slane %v696_v63, %v9810_v47  ;;  %v9948_v40 = vcombine.low %v9920_v14, %v388_v20 }
  0x3c   : > { %2786 = vmatmul.mubr.bf16.vlgmr.msra.gmra.mrb[0].mxu0 %v1876_v10  ;;  %v1896_v33 = vrot.slane %v1880_v16, %v9810_v47  ;;  %v1903_v34 = vrot.slane %v1881_v17, %v9810_v47  ;;  %v979_v49 = vrot.slane %v7930_v36, %v9810_v47  ;;  %v7931_v63 = vcombine.low %v9821_v54, %v564_v37 }
  0x3d   : > { %8511 = vmatpush3.bf16.msra.mxu0 %v9917_v12  ;;  %v996_v48 = vcombine.high %v9841_v8, %v564_v37  ;;  %v997_v50 = vcombine.high %v700_v38, %v700_v38  ;;  %v1018_v1 = vrot.slane %v700_v38, %v9810_v47  ;;  %v9978_v9 = vcombine.low %v9954_v45, %v9954_v45 }
  0x3e   : > { %v1911_v43 = vcombine.low %v1889_v19, %v1896_v33  ;;  %v1913_v24 = vcombine.low %v1903_v34, %v1910_v35  ;;  %v1912_v42 = vcombine.high %v1889_v19, %v1896_v33  ;;  %v1914_v44 = vcombine.high %v1903_v34, %v1910_v35  ;;  %8512 = vmatprep.subr.bf16.mxu0 %v9457_v31 }
  0x3f   : > { %v987_v56 = vcombine.low %v979_v49, %v986_v39  ;;  %v1004_v57 = vrot.slane %v7931_v63, %v9810_v47  ;;  %v1011_v0 = vrot.slane %v996_v48, %v9810_v47  ;;  %v1025_v3 = vrot.slane %v997_v50, %v9810_v47  ;;  %v9473_v49 = vld [vmem:[%s13078_s2 + $0x60] sm:$0xff]  }
  0x40   : > { %v1921_v51 = vrot.slane %v1911_v43, %v9810_v47  ;;  %v1935_v52 = vrot.slane %v1913_v24, %v9810_v47  ;;  %v1928_v53 = vrot.slane %v1912_v42, %v9810_v47  ;;  %v1942_v55 = vrot.slane %v1914_v44, %v9810_v47  ;;  %v9470_v43 = vld [vmem:[%s13078_s2 + $0x18] sm:$0xff]  }
  0x41   : > { %8513 = vmatpush3.bf16.msra.mxu0 %v9458_v41  ;;  %v9974_v5 = vrot.slane %v987_v56, %v9810_v47  ;;  %v1026_v6 = vcombine.low %v1004_v57, %v1018_v1  ;;  %v1027_v7 = vcombine.high %v1004_v57, %v1018_v1  ;;  %v1028_v10 = vcombine.low %v1011_v0, %v1025_v3  ;;  %v10037_v56 = vld [vmem:[%s9776_s19 + $0x3c] sm:$0xf]  ;;  %v391_v57 = vld [vmem:[%s9776_s19 + $0x40] sm:$0xf]  ;;  %v9475_v1 = vld [vmem:[%s13078_s2 + $0x68] sm:$0xff]  }
  0x42   : > { %v1944_v54 = vcombine.high %v1921_v51, %v1935_v52  ;;  %v1945_v2 = vcombine.low %v1928_v53, %v1942_v55  ;;  %v1943_v8 = vcombine.low %v1921_v51, %v1935_v52  ;;  %8514 = vmatprep.subr.bf16.mxu0 %v9463_v46  ;;  %v1029_v11 = vcombine.high %v1011_v0, %v1025_v3 }
  0x43   : > { %13200 = vst [vmem:[#allocation12_spill] sm:$0xff] %v9974_v5  ;;  %v569_v16 = vshrl.u32 %v9948_v40, 16  ;;  %v9983_v17 = vrot.slane %v1026_v6, %v9810_v47  ;;  %v9986_v18 = vrot.slane %v1027_v7, %v9810_v47  ;;  %v1946_v19 = vcombine.low %v971_v30, %v9974_v5  ;;  %v10054_v6 = vld [vmem:[%s9776_s19 + $0x44] sm:$0x3] }
  0x44   : > { %8983 = vmatmul.mubr.bf16.vlgmr.msra.gmra.mrb[0].mxu1 %v1944_v54  ;;  %2793 = vmatprep.mubr.bf16.mxu0 %v1945_v2  ;;  %v571_v20 = vshll.u32 %v9948_v40, 16  ;;  %v9995_v33 = vrot.slane %v1028_v10, %v9810_v47  ;;  %v9998_v34 = vrot.slane %v1029_v11, %v9810_v47  ;;  %v567_v35 = vor.u32 %v565_v13, %v563_v21 }
  0x45   : > { %2794 = vmatmul.mubr.bf16.gmra.mrb[4].mxu0 %v1943_v8  ;;  %13201 = vst [vmem:[#allocation13_spill] sm:$0xff] %v9983_v17  ;;  %13202 = vst [vmem:[#allocation14_spill] sm:$0xff] %v9986_v18  ;;  %9190 = vmatpush3.bf16.msra.mxu1 %v9917_v12  ;;  %v576_v36 = vshll.u32 %v9978_v9, 16  ;;  %v1947_v12 = vcombine.low %v9983_v17, %v9986_v18  ;;  %v7997_v30 = vcombine.high %v9983_v17, %v9986_v18 }
  0x46   : > { %13203 = vst [vmem:[#allocation15_spill] sm:$0xff] %v9995_v33  ;;  %13204 = vst [vmem:[#allocation16_spill] sm:$0xff] %v9998_v34  ;;  %9183 = vmatprep.subr.bf16.mxu1 %v9457_v31  ;;  %8515 = vmatpush3.bf16.msra.mxu0 %v9466_v4  ;;  %v1956_v37 = vrot.slane %v1946_v19, %v9810_v47  ;;  %v1949_v21 = vcombine.low %v9995_v33, %v9998_v34  ;;  %v573_v38 = vrot.slane %v571_v20, 1 }
  0x47   : > { %8516 = vmatprep.subr.bf16.mxu0 %v9469_v23  ;;  %v10014_v31 = vrot.slane %v576_v36, 1  ;;  %v701_v39 = vrot.slane %v9948_v40, 1  ;;  %v1963_v24 = vrot.slane %v1947_v12, %v9810_v47  ;;  %v1970_v42 = vrot.slane %v7997_v30, %v9810_v47  ;;  %v9479_v36 = vld [vmem:[%s13078_s2 + $0x70] sm:$0xff]  }
  0x48   : > { %v702_v44 = vrot.slane %v9978_v9, 1  ;;  %v1977_v63 = vrot.slane %v1949_v21, %v9810_v47  ;;  %v574_v48 = vor.u32 %v573_v38, %v569_v16  ;;  %v7932_v50 = vcombine.low %v9829_v60, %v567_v35  ;;  %v9474_v60 = vld [vmem:[%s13078_s2 + $0x20] sm:$0xff]  }
  0x49   : > { %9191 = vmatpush3.bf16.msra.mxu1 %v9458_v41  ;;  %v1076_v51 = vrot.slane %v699_v29, %v9810_v47  ;;  %v1978_v52 = vcombine.low %v1956_v37, %v1963_v24  ;;  %v7998_v41 = vcombine.high %v9995_v33, %v9998_v34  ;;  %v1979_v55 = vcombine.high %v1956_v37, %v1963_v24 }
  0x4a   : > { %9184 = vmatprep.subr.bf16.mxu1 %v9463_v46  ;;  %v703_v53 = vsel %vm13182_vm0, %v701_v39, %v702_v44  ;;  %8517 = vmatpush3.bf16.msra.mxu0 %v9470_v43  ;;  %v1980_v15 = vcombine.low %v1970_v42, %v1977_v63  ;;  %v579_v29 = vsel %vm13185_vm1, %v574_v48, %v10014_v31  ;;  %v580_v24 = vshrl.u32 %v9978_v9, 16 }
  0x4b   : > { %v1069_v46 = vrot.slane %v7932_v50, %v9810_v47  ;;  %v1087_v0 = vcombine.high %v703_v53, %v703_v53  ;;  %8518 = vmatprep.subr.bf16.mxu0 %v9473_v49  ;;  %v1988_v54 = vrot.slane %v1978_v52, %v9810_v47  ;;  %v7933_v2 = vcombine.low %v9920_v14, %v579_v29 }
  0x4c   : > { %v1086_v8 = vcombine.high %v9948_v40, %v579_v29  ;;  %v1108_v3 = vrot.slane %v703_v53, %v9810_v47  ;;  %v2002_v7 = vrot.slane %v1980_v15, %v9810_v47  ;;  %v1981_v19 = vcombine.high %v1970_v42, %v1977_v63  ;;  %v9476_v40 = vld [vmem:[%s13078_s2 + $0x28] sm:$0xff]   ;;  %v9480_v15 = vld [vmem:[%s13078_s2 + $0x30] sm:$0xff]   ;;  %v9481_v29 = vld [vmem:[%s13078_s2 + $0x78] sm:$0xff]  }
  0x4d   : > { %9192 = vmatpush3.bf16.msra.mxu1 %v9466_v4  ;;  %v1077_v10 = vcombine.low %v1069_v46, %v1076_v51  ;;  %v1115_v11 = vrot.slane %v1087_v0, %v9810_v47  ;;  %v1094_v13 = vrot.slane %v7933_v2, %v9810_v47  ;;  %v1995_v14 = vrot.slane %v1979_v55, %v9810_v47 }
  0x4e   : > { %9185 = vmatprep.subr.bf16.mxu1 %v9469_v23  ;;  %v1101_v16 = vrot.slane %v1086_v8, %v9810_v47  ;;  %8519 = vmatpush3.bf16.msra.mxu0 %v9474_v60  ;;  %v2011_v20 = vcombine.high %v1988_v54, %v2002_v7  ;;  %v10068_v35 = vrot.slane %v7998_v41, %v9810_v47  ;;  %v10118_v8 = vld [vmem:[%s9776_s19 + $0x48] sm:$0xf] }
  0x4f   : > { %v10065_v4 = vrot.slane %v1077_v10, %v9810_v47  ;;  %v10071_v23 = vcombine.low %v10037_v56, %v391_v57  ;;  %8520 = vmatprep.subr.bf16.mxu0 %v9475_v1  ;;  %v1116_v12 = vcombine.low %v1094_v13, %v1108_v3  ;;  %v1117_v30 = vcombine.high %v1094_v13, %v1108_v3  ;;  %v394_v3 = vld [vmem:[%s9776_s19 + $0x4c] sm:$0xf] }
  0x50   : > { %v1118_v37 = vcombine.low %v1101_v16, %v1115_v11  ;;  %v2009_v21 = vrot.slane %v1981_v19, %v9810_v47  ;;  %8986 = vmatprep.mubr.bf16.mxu1 %v2011_v20  ;;  %v2010_v38 = vcombine.low %v1988_v54, %v2002_v7  ;;  %v10079_v39 = vcombine.low %v10054_v6, %v10054_v6 }
  0x51   : > { %13206 = vst [vmem:[#allocation17_spill] sm:$0xff] %v10065_v4  ;;  %9193 = vmatpush3.bf16.msra.mxu1 %v9470_v43  ;;  %v584_v42 = vshrl.u32 %v10071_v23, 16  ;;  %v10084_v63 = vrot.slane %v1116_v12, %v9810_v47  ;;  %v10090_v43 = vrot.slane %v1117_v30, %v9810_v47  ;;  %v582_v51 = vor.u32 %v580_v24, %v10014_v31 }
  0x52   : > { %9186 = vmatprep.subr.bf16.mxu1 %v9473_v49  ;;  %v10087_v48 = vrot.slane %v1118_v37, %v9810_v47  ;;  %v2012_v50 = vcombine.low %v1995_v14, %v2009_v21  ;;  %8521 = vmatpush3.bf16.msra.mxu0 %v9476_v40  ;;  %v586_v52 = vshll.u32 %v10071_v23, 16  ;;  %v591_v53 = vshll.u32 %v10079_v39, 16 }
  0x53   : > { %13207 = vst [vmem:[#allocation18_spill] sm:$0xff] %v10084_v63  ;;  %13208 = vst [vmem:[#allocation19_spill] sm:$0xff] %v10090_v43  ;;  %v704_v49 = vrot.slane %v10071_v23, 1  ;;  %8522 = vmatprep.subr.bf16.mxu0 %v9479_v36  ;;  %v1148_v41 = vcombine.high %v10084_v63, %v10084_v63  ;;  %v1150_v55 = vcombine.high %v10090_v43, %v10090_v43  ;;  %v705_v31 = vrot.slane %v10079_v39, 1 }
  0x54   : > { %v2014_v57 = vcombine.low %v10065_v4, %v10084_v63  ;;  %2801 = vmatprep.mubr.bf16.mxu0 %v2012_v50  ;;  %v588_v46 = vrot.slane %v586_v52, 1  ;;  %v593_v0 = vrot.slane %v591_v53, 1  ;;  %v1119_v54 = vcombine.high %v1101_v16, %v1115_v11  ;;  %v10132_v11 = vld [vmem:[%s9776_s19 + $0x50] sm:$0x3] }
  0x55   : > { %9194 = vmatpush3.bf16.msra.mxu1 %v9474_v60  ;;  %2802 = vmatmul.mubr.bf16.gmra.mrb[8].mxu0 %v2010_v38  ;;  %v1149_v2 = vcombine.high %v10087_v48, %v10087_v48  ;;  %v2015_v60 = vcombine.low %v10090_v43, %v1148_v41  ;;  %v2016_v7 = vcombine.low %v1150_v55, %v10087_v48  ;;  %v595_v53 = vshrl.u32 %v10079_v39, 16 }
  0x56   : > { %9187 = vmatprep.subr.bf16.mxu1 %v9475_v1  ;;  %v10124_v10 = vrot.slane %v2014_v57, %v9810_v47  ;;  %v10129_v13 = vsel %vm13182_vm0, %v704_v49, %v705_v31  ;;  %8523 = vmatpush3.bf16.msra.mxu0 %v9480_v15  ;;  %v589_v16 = vor.u32 %v588_v46, %v584_v42 }
  0x57   : > { %v10135_v19 = vrot.slane %v1119_v54, %v9810_v47  ;;  %v7934_v1 = vcombine.low %v9954_v45, %v582_v51  ;;  %v1166_v14 = vrot.slane %v702_v44, %v9810_v47  ;;  %8524 = vmatprep.subr.bf16.mxu0 %v9481_v29  ;;  %v10142_v20 = vrot.slane %v2015_v60, %v9810_v47  ;;  %v9482_v45 = vld [vmem:[%s13078_s2 + $0x38] sm:$0xff]  }
  0x58   : > { %v10145_v12 = vrot.slane %v2016_v7, %v9810_v47  ;;  %v2045_v30 = vcombine.low %v10068_v35, %v10124_v10  ;;  %v1198_v37 = vrot.slane %v10129_v13, %v9810_v47  ;;  %v594_v9 = vsel %vm13185_vm1, %v589_v16, %v593_v0 }
  0x59   : > { %9195 = vmatpush3.bf16.msra.mxu1 %v9476_v40  ;;  %v1151_v44 = vcombine.high %v10135_v19, %v10135_v19  ;;  %v1159_v21 = vrot.slane %v7934_v1, %v9810_v47  ;;  %v2080_v38 = vcombine.low %v10135_v19, %v1149_v2  ;;  %v7935_v40 = vcombine.low %v10037_v56, %v594_v9 }
  0x5a   : > { %9188 = vmatprep.subr.bf16.mxu1 %v9479_v36  ;;  %v2047_v24 = vcombine.low %v10142_v20, %v10145_v12  ;;  %v10163_v42 = vrot.slane %v2045_v30, %v9810_v47  ;;  %v10167_v50 = vcombine.low %v10118_v8, %v394_v3  ;;  %8525 = vmatpush3.bf16.msra.mxu0 %v9482_v45 }
  0x5b   : > { %v1167_v51 = vcombine.low %v1159_v21, %v1166_v14  ;;  %v10170_v52 = vrot.slane %v2080_v38, %v9810_v47  ;;  %v10174_v36 = vcombine.low %v10132_v11, %v10132_v11  ;;  %v1184_v56 = vrot.slane %v7935_v40, %v9810_v47 }
  0x5c   : > { %v10178_v49 = vrot.slane %v2047_v24, %v9810_v47  ;;  %v599_v41 = vshrl.u32 %v10167_v50, 16  ;;  %v601_v55 = vshll.u32 %v10167_v50, 16  ;;  %v597_v46 = vor.u32 %v595_v53, %v593_v0 }
  0x5d   : > { %9196 = vmatpush3.bf16.msra.mxu1 %v9480_v15  ;;  %v10184_v57 = vrot.slane %v1167_v51, %v9810_v47  ;;  %v606_v54 = vshll.u32 %v10174_v36, 16  ;;  %v707_v2 = vrot.slane %v10167_v50, 1  ;;  %v1206_v60 = vcombine.low %v1184_v56, %v1198_v37  ;;  %v9483_v15 = vld [vmem:[%s13078_s2 + $0x80] sm:$0xff]  }
  0x5e   : > { %9189 = vmatprep.subr.bf16.mxu1 %v9481_v29  ;;  %v2078_v3 = vcombine.high %v10163_v42, %v10178_v49  ;;  %v1207_v7 = vcombine.high %v1184_v56, %v1198_v37  ;;  %v603_v16 = vrot.slane %v601_v55, 1  ;;  %v13083_v14 = vrot.slane %v10174_v36, 1 }
  0x5f   : > { %v2081_v0 = vcombine.low %v1151_v44, %v10184_v57  ;;  %v10198_v1 = vrot.slane %v606_v54, 1  ;;  %v1176_v30 = vcombine.high %v10071_v23, %v594_v9  ;;  %v10203_v29 = vrot.slane %v1206_v60, %v9810_v47 }
  0x60   : > { %8987 = vmatmul.mubr.bf16.gmra.mrb[4].mxu1 %v2078_v3  ;;  %v10206_v21 = vrot.slane %v1207_v7, %v9810_v47  ;;  %v604_v37 = vor.u32 %v603_v16, %v599_v41  ;;  %v1177_v38 = vcombine.high %v10129_v13, %v10129_v13  ;;  %v10217_v24 = vsel %vm13182_vm0, %v707_v2, %v13083_v14 }
  0x61   : > { %v10212_v44 = vrot.slane %v2081_v0, %v9810_v47  ;;  %v1191_v23 = vrot.slane %v1176_v30, %v9810_v47  ;;  %v7936_v9 = vcombine.low %v10054_v6, %v597_v46  ;;  %9197 = vmatpush3.bf16.msra.mxu1 %v9482_v45  ;;  %v1256_v45 = vrot.slane %v705_v31, %v9810_v47  ;;  %v10250_v31 = vld [vmem:[%s9776_s19 + $0x54] sm:$0xf]  ;;  %v397_v0 = vld [vmem:[%s9776_s19 + $0x58] sm:$0xf] }
  0x62   : > { %v2082_v40 = vcombine.low %v10203_v29, %v10206_v21  ;;  %v7999_v13 = vcombine.high %v10203_v29, %v10206_v21  ;;  %v10227_v51 = vsel %vm13185_vm1, %v604_v37, %v10198_v1  ;;  %9006 = vmatprep.subr.bf16.mxu1 %v9483_v15  ;;  %v1205_v56 = vrot.slane %v1177_v38, %v9810_v47 }
  0x63   : > { %v2112_v53 = vcombine.low %v10170_v52, %v10212_v44  ;;  %v1249_v6 = vrot.slane %v7936_v9, %v9810_v47  ;;  %v7937_v46 = vcombine.low %v10118_v8, %v10227_v51  ;;  %v1288_v54 = vrot.slane %v10217_v24, %v9810_v47 }
  0x64   : > { %v10237_v41 = vrot.slane %v2082_v40, %v9810_v47  ;;  %v10240_v55 = vrot.slane %v7999_v13, %v9810_v47  ;;  %v1208_v3 = vcombine.low %v1191_v23, %v1205_v56  ;;  %v1209_v60 = vcombine.high %v1191_v23, %v1205_v56  ;;  %v9491_v56 = vld [vmem:[%s13078_s2 + $0x1c0] sm:$0xff]  }
  0x65   : > { %v10247_v2 = vrot.slane %v2112_v53, %v9810_v47  ;;  %v1257_v39 = vcombine.low %v1249_v6, %v1256_v45  ;;  %v1274_v16 = vrot.slane %v7937_v46, %v9810_v47  ;;  %v2046_v8 = vcombine.high %v10068_v35, %v10124_v10  ;;  %v10274_v10 = vld [vmem:[%s9776_s19 + $0x5c] sm:$0x3]  ;;  %8618 = vmatprep.subr.bf16.mxu0 %v9491_v56  ;;  %v10333_v56 = vld [vmem:[%s10310_s9] sm:$0xf] }
  0x66   : > { %v2114_v7 = vcombine.low %v10237_v41, %v10240_v55  ;;  %v2048_v15 = vcombine.high %v10142_v20, %v10145_v12  ;;  %v10261_v30 = vrot.slane %v1208_v3, %v9810_v47  ;;  %v10264_v37 = vrot.slane %v1209_v60, %v9810_v47 }
  0x67   : > { %v10267_v38 = vrot.slane %v1257_v39, %v9810_v47  ;;  %v1296_v9 = vcombine.low %v1274_v16, %v1288_v54  ;;  %v1297_v40 = vcombine.high %v1274_v16, %v1288_v54  ;;  %v2062_v35 = vrot.slane %v2046_v8, %v9810_v47 }
  0x68   : > { %v10270_v23 = vrot.slane %v2114_v7, %v9810_v47  ;;  %v2147_v20 = vcombine.low %v10261_v30, %v10264_v37  ;;  %v8000_v12 = vcombine.high %v10261_v30, %v10264_v37  ;;  %v2076_v13 = vrot.slane %v2048_v15, %v9810_v47 }
  0x69   : > { %v2077_v53 = vcombine.low %v10163_v42, %v10178_v49  ;;  %v10289_v45 = vrot.slane %v1296_v9, %v9810_v47  ;;  %v10292_v46 = vrot.slane %v1297_v40, %v9810_v47  ;;  %v10295_v54 = vcombine.low %v10250_v31, %v397_v0 }
  0x6a   : > { %v2145_v6 = vcombine.high %v10247_v2, %v10270_v23  ;;  %v10300_v42 = vrot.slane %v2147_v20, %v9810_v47  ;;  %v10303_v49 = vrot.slane %v8000_v12, %v9810_v47  ;;  %v2079_v60 = vcombine.low %v2062_v35, %v2076_v13 }
  0x6b   : > { %v1328_v39 = vcombine.high %v10289_v45, %v10289_v45  ;;  %v2149_v7 = vcombine.low %v10267_v38, %v10289_v45  ;;  %v10318_v16 = vcombine.low %v10274_v10, %v10274_v10  ;;  %v610_v8 = vshrl.u32 %v10174_v36, 16 }
  0x6c   : > { %8990 = vmatprep.mubr.bf16.mxu1 %v2145_v6  ;;  %v2179_v15 = vcombine.low %v10300_v42, %v10303_v49  ;;  %2809 = vmatprep.mubr.bf16.mxu0 %v2079_v60  ;;  %v614_v0 = vshrl.u32 %v10295_v54, 16  ;;  %v616_v9 = vshll.u32 %v10295_v54, 16  ;;  %v710_v40 = vrot.slane %v10295_v54, 1 }
  0x6d   : > { %v2150_v35 = vcombine.low %v10292_v46, %v1328_v39  ;;  %v10328_v20 = vrot.slane %v2149_v7, %v9810_v47  ;;  %2810 = vmatmul.mubr.bf16.gmra.mrb[12].mxu0 %v2077_v53  ;;  %v612_v12 = vor.u32 %v610_v8, %v10198_v1  ;;  %v621_v13 = vshll.u32 %v10318_v16, 16  ;;  %v400_v8 = vld [vmem:[%s10310_s9 + $0x4] sm:$0xf] }
  0x6e   : > { %v10336_v6 = vrot.slane %v2179_v15, %v9810_v47  ;;  %v618_v60 = vrot.slane %v616_v9, 1  ;;  %v13090_v3 = vrot.slane %v10318_v16, 1  ;;  %v1266_v14 = vcombine.high %v10167_v50, %v10227_v51 }
  0x6f   : > { %v10342_v39 = vrot.slane %v2150_v35, %v9810_v47  ;;  %v623_v7 = vrot.slane %v621_v13, 1  ;;  %v1267_v1 = vcombine.high %v10217_v24, %v10217_v24  ;;  %v1330_v53 = vcombine.high %v10292_v46, %v10292_v46 }
  0x70   : > { %v619_v15 = vor.u32 %v618_v60, %v614_v0  ;;  %v712_v9 = vsel %vm13182_vm0, %v710_v40, %v13090_v3  ;;  %v1281_v50 = vrot.slane %v1266_v14, %v9810_v47  ;;  %v7938_v51 = vcombine.low %v10132_v11, %v612_v12 }
  0x71   : > { %v2181_v35 = vcombine.low %v10328_v20, %v10342_v39  ;;  %v1295_v24 = vrot.slane %v1267_v1, %v9810_v47  ;;  %v13209_v13 = vrot.slane %v10174_v36, 1  ;;  %v1378_v43 = vrot.slane %v712_v9, %v9810_v47 }
  0x72   : > { %v624_v0 = vsel %vm13185_vm1, %v619_v15, %v623_v7  ;;  %v1339_v60 = vrot.slane %v7938_v51, %v9810_v47  ;;  %v10367_v40 = vcombine.low %v10333_v56, %v400_v8  ;;  %v10371_v11 = vcombine.low %v10350_v32, %v10350_v32 }
  0x73   : > { %v1346_v63 = vrot.slane %v13209_v13, %v9810_v47  ;;  %v10374_v14 = vrot.slane %v2181_v35, %v9810_v47  ;;  %v1298_v12 = vcombine.low %v1281_v50, %v1295_v24  ;;  %v1299_v1 = vcombine.high %v1281_v50, %v1295_v24 }
  0x74   : > { %v7939_v36 = vcombine.low %v10250_v31, %v624_v0  ;;  %v625_v3 = vshrl.u32 %v10318_v16, 16  ;;  %v629_v15 = vshrl.u32 %v10367_v40, 16  ;;  %v631_v51 = vshll.u32 %v10367_v40, 16 }
  0x75   : > { %v1347_v13 = vcombine.low %v1339_v60, %v1346_v63  ;;  %v2212_v8 = vcombine.high %v10336_v6, %v10374_v14  ;;  %v10383_v33 = vrot.slane %v1298_v12, %v9810_v47  ;;  %v10386_v35 = vrot.slane %v1299_v1, %v9810_v47 }
  0x76   : > { %v1364_v50 = vrot.slane %v7939_v36, %v9810_v47  ;;  %v627_v63 = vor.u32 %v625_v3, %v623_v7  ;;  %v633_v24 = vrot.slane %v631_v51, 1  ;;  %v636_v60 = vshll.u32 %v10371_v11, 16 }
  0x77   : > { %v10390_v31 = vrot.slane %v1347_v13, %v9810_v47  ;;  %8991 = vmatmul.mubr.bf16.gmra.mrb[8].mxu1 %v2212_v8  ;;  %v1329_v18 = vcombine.high %v10383_v33, %v10383_v33  ;;  %v1331_v12 = vcombine.high %v10386_v35, %v10386_v35  ;;  %v2214_v1 = vcombine.low %v1330_v53, %v10383_v33 }
  0x78   : > { %v1386_v4 = vcombine.low %v1364_v50, %v1378_v43  ;;  %v1387_v5 = vcombine.high %v1364_v50, %v1378_v43  ;;  %v634_v17 = vor.u32 %v633_v24, %v629_v15  ;;  %v10398_v36 = vrot.slane %v636_v60, 1 }
  0x79   : > { %v713_v13 = vrot.slane %v10367_v40, 1  ;;  %v2215_v51 = vcombine.low %v10386_v35, %v1329_v18  ;;  %v2216_v8 = vcombine.low %v1331_v12, %v10390_v31  ;;  %v10410_v59 = vrot.slane %v2214_v1, %v9810_v47 }
  0x7a   : > { %v10402_v3 = vrot.slane %v1386_v4, %v9810_v47  ;;  %v10405_v7 = vrot.slane %v1387_v5, %v9810_v47  ;;  %v10414_v43 = vsel %vm13185_vm1, %v634_v17, %v10398_v36  ;;  %v13101_v53 = vrot.slane %v10371_v11, 1 }
  0x7b   : > { %v1356_v15 = vcombine.high %v10295_v54, %v624_v0  ;;  %v10421_v5 = vrot.slane %v2215_v51, %v9810_v47  ;;  %v10424_v18 = vrot.slane %v2216_v8, %v9810_v47  ;;  %v1357_v24 = vcombine.high %v712_v9, %v712_v9 }
  0x7c   : > { %13210 = vst [vmem:[#allocation20_spill] sm:$0xff] %v10405_v7  ;;  %v2217_v4 = vcombine.low %v10402_v3, %v10405_v7  ;;  %v10431_v17 = vsel %vm13182_vm0, %v713_v13, %v13101_v53  ;;  %v7940_v0 = vcombine.low %v10274_v10, %v627_v63  ;;  %v13211_v1 = vrot.slane %v10318_v16, 1 }
  0x7d   : > { %v1371_v54 = vrot.slane %v1356_v15, %v9810_v47  ;;  %v2246_v12 = vcombine.low %v10410_v59, %v10421_v5  ;;  %v7941_v13 = vcombine.low %v10333_v56, %v10414_v43  ;;  %v1385_v9 = vrot.slane %v1357_v24, %v9810_v47  ;;  %v10460_v24 = vld [vmem:[%s10310_s9 + $0xc] sm:$0xf] }
  0x7e   : > { %v10436_v60 = vrot.slane %v2217_v4, %v9810_v47  ;;  %v1436_v51 = vrot.slane %v13211_v1, %v9810_v47  ;;  %v1429_v8 = vrot.slane %v7940_v0, %v9810_v47  ;;  %v1468_v10 = vrot.slane %v10431_v17, %v9810_v47  ;;  %v403_v0 = vld [vmem:[%s10310_s9 + $0x10] sm:$0xf] }
  0x7f   : > { %v8001_v63 = vcombine.high %v10402_v3, %v10405_v7  ;;  %v10454_v16 = vrot.slane %v2246_v12, %v9810_v47  ;;  %v1454_v4 = vrot.slane %v7941_v13, %v9810_v47  ;;  %v2113_v56 = vcombine.high %v10170_v52, %v10212_v44 }
  0x80   : > { %v2248_v15 = vcombine.low %v10424_v18, %v10436_v60  ;;  %v1388_v1 = vcombine.low %v1371_v54, %v1385_v9  ;;  %v1389_v50 = vcombine.high %v1371_v54, %v1385_v9  ;;  %v1437_v53 = vcombine.low %v1429_v8, %v1436_v51 }
  0x81   : > { %v10464_v62 = vrot.slane %v8001_v63, %v9810_v47  ;;  %v1476_v61 = vcombine.low %v1454_v4, %v1468_v10  ;;  %v2115_v12 = vcombine.high %v10237_v41, %v10240_v55  ;;  %v2129_v13 = vrot.slane %v2113_v56, %v9810_v47 }
  0x82   : > { %v10467_v58 = vrot.slane %v2248_v15, %v9810_v47  ;;  %v10476_v52 = vrot.slane %v1388_v1, %v9810_v47  ;;  %v10479_v44 = vrot.slane %v1389_v50, %v9810_v47  ;;  %v1444_v54 = vrot.slane %v1437_v53, %v9810_v47 }
  0x83   : > { %v2144_v51 = vcombine.low %v10247_v2, %v10270_v23  ;;  %v10487_v41 = vrot.slane %v1476_v61, %v9810_v47  ;;  %v2143_v55 = vrot.slane %v2115_v12, %v9810_v47  ;;  %v7919_v8 = vcombine.low %v10460_v24, %v403_v0 }
  0x84   : > { %13212 = vst [vmem:[#allocation21_spill] sm:$0xff] %v10479_v44  ;;  %v2279_v9 = vcombine.high %v10454_v16, %v10467_v58  ;;  %v1421_v63 = vcombine.high %v10479_v44, %v10479_v44  ;;  %v2282_v50 = vcombine.low %v10476_v52, %v10479_v44  ;;  %v8002_v53 = vcombine.high %v10476_v52, %v10479_v44 }
  0x85   : > { %13213 = vst [vmem:[#allocation22_spill] sm:$0xff] %v10487_v41  ;;  %v10499_v2 = vcombine.low %v10473_v22, %v10473_v22  ;;  %v2284_v61 = vcombine.low %v1444_v54, %v10487_v41  ;;  %v2146_v23 = vcombine.low %v2129_v13, %v2143_v55  ;;  %v640_v15 = vshrl.u32 %v10371_v11, 16 }
  0x86   : > { %8994 = vmatprep.mubr.bf16.mxu1 %v2279_v9  ;;  %v644_v56 = vshrl.u32 %v7919_v8, 16  ;;  %v10504_v0 = vrot.slane %v2282_v50, %v9810_v47  ;;  %v10507_v1 = vrot.slane %v8002_v53, %v9810_v47  ;;  %v10509_v12 = vcombine.low %v1421_v63, %v1444_v54 }
  0x87   : > { %v646_v28 = vshll.u32 %v7919_v8, 16  ;;  %v10512_v27 = vrot.slane %v2284_v61, %v9810_v47  ;;  %2817 = vmatprep.mubr.bf16.mxu0 %v2146_v23  ;;  %v642_v9 = vor.u32 %v640_v15, %v10398_v36  ;;  %v651_v13 = vshll.u32 %v10499_v2, 16 }
  0x88   : > { %13214 = vst [vmem:[#allocation23_spill] sm:$0xff] %v10509_v12  ;;  %v716_v55 = vrot.slane %v7919_v8, 1  ;;  %v2313_v26 = vcombine.low %v10464_v62, %v10504_v0  ;;  %2818 = vmatmul.mubr.bf16.gmra.mrb[16].mxu0 %v2144_v51  ;;  %v13117_v53 = vrot.slane %v10499_v2, 1  ;;  %v1446_v54 = vcombine.high %v10367_v40, %v10414_v43 }
  0x89   : > { %v648_v50 = vrot.slane %v646_v28, 1  ;;  %v2315_v63 = vcombine.low %v10507_v1, %v10512_v27  ;;  %v10523_v61 = vrot.slane %v651_v13, 1  ;;  %v1447_v36 = vcombine.high %v10431_v17, %v10431_v17 }
  0x8a   : > { %v1477_v23 = vcombine.high %v1454_v4, %v1468_v10  ;;  %v10528_v15 = vrot.slane %v2313_v26, %v9810_v47  ;;  %v718_v28 = vsel %vm13182_vm0, %v716_v55, %v13117_v53  ;;  %v1461_v51 = vrot.slane %v1446_v54, %v9810_v47 }
  0x8b   : > { %v649_v25 = vor.u32 %v648_v50, %v644_v56  ;;  %v10535_v40 = vrot.slane %v2315_v63, %v9810_v47  ;;  %v1475_v43 = vrot.slane %v1447_v36, %v9810_v47  ;;  %v1508_v17 = vcombine.high %v10487_v41, %v10487_v41 }
  0x8c   : > { %v10539_v13 = vrot.slane %v1477_v23, %v9810_v47  ;;  %v7942_v10 = vcombine.low %v10350_v32, %v642_v9  ;;  %v13216_v4 = vrot.slane %v10371_v11, 1  ;;  %v1558_v55 = vrot.slane %v718_v28, %v9810_v47 }
  0x8d   : > { %v654_v26 = vsel %vm13185_vm1, %v649_v25, %v10523_v61  ;;  %v2346_v50 = vcombine.high %v10528_v15, %v10535_v40  ;;  %v1478_v54 = vcombine.low %v1461_v51, %v1475_v43  ;;  %v1479_v63 = vcombine.high %v1461_v51, %v1475_v43 }
  0x8e   : > { %13215 = vst [vmem:[#allocation24_spill] sm:$0xff] %v10539_v13  ;;  %v1526_v56 = vrot.slane %v13216_v4, %v9810_v47  ;;  %v1510_v36 = vcombine.high %v10539_v13, %v10539_v13  ;;  %v1519_v23 = vrot.slane %v7942_v10, %v9810_v47  ;;  %v7943_v25 = vcombine.low %v10460_v24, %v654_v26 }
  0x8f   : > { %v2348_v32 = vcombine.low %v10539_v13, %v1508_v17  ;;  %v1536_v9 = vcombine.high %v7919_v8, %v654_v26  ;;  %8995 = vmatmul.mubr.bf16.gmra.mrb[12].mxu1 %v2346_v50  ;;  %v10558_v11 = vrot.slane %v1478_v54, %v9810_v47  ;;  %v10561_v4 = vrot.slane %v1479_v63, %v9810_v47 }
  0x90   : > { %v1537_v53 = vcombine.high %v718_v28, %v718_v28  ;;  %v2180_v51 = vcombine.high %v10300_v42, %v10303_v49  ;;  %v1527_v43 = vcombine.low %v1519_v23, %v1526_v56  ;;  %v1544_v34 = vrot.slane %v7943_v25, %v9810_v47 }
  0x91   : > { %13217 = vst [vmem:[#allocation25_spill] sm:$0xff] %v10558_v11  ;;  %13218 = vst [vmem:[#allocation26_spill] sm:$0xff] %v10561_v4  ;;  %v10567_v10 = vrot.slane %v2348_v32, %v9810_v47  ;;  %v1551_v24 = vrot.slane %v1536_v9, %v9810_v47  ;;  %v1509_v8 = vcombine.high %v10558_v11, %v10558_v11 }
  0x92   : > { %v1511_v17 = vcombine.high %v10561_v4, %v10561_v4  ;;  %v2349_v26 = vcombine.low %v1510_v36, %v10558_v11  ;;  %v1565_v28 = vrot.slane %v1537_v53, %v9810_v47  ;;  %v10577_v42 = vrot.slane %v1527_v43, %v9810_v47 }
  0x93   : > { %v1566_v49 = vcombine.low %v1544_v34, %v1558_v55  ;;  %v1567_v56 = vcombine.high %v1544_v34, %v1558_v55  ;;  %v2182_v50 = vcombine.high %v10328_v20, %v10342_v39  ;;  %v2350_v54 = vcombine.low %v10561_v4, %v1509_v8 }
  0x94   : > { %13219 = vst [vmem:[#allocation27_spill] sm:$0xff] %v10577_v42  ;;  %v10583_v63 = vrot.slane %v2349_v26, %v9810_v47  ;;  %v1568_v23 = vcombine.low %v1551_v24, %v1565_v28  ;;  %v1569_v25 = vcombine.high %v1551_v24, %v1565_v28  ;;  %v2351_v53 = vcombine.low %v1511_v17, %v10577_v42  ;;  %v405_v17 = vld [vmem:[%s10310_s9 + $0x18] sm:$0xf]  ;;  %v406_v26 = vld [vmem:[%s10310_s9 + $0x1c] sm:$0xf] }
  0x95   : > { %v10586_v36 = vrot.slane %v1566_v49, %v9810_v47  ;;  %v10590_v32 = vrot.slane %v1567_v56, %v9810_v47  ;;  %v2196_v34 = vrot.slane %v2180_v51, %v9810_v47  ;;  %v10594_v20 = vrot.slane %v2350_v54, %v9810_v47 }
  0x96   : > { %v2380_v39 = vcombine.low %v10567_v10, %v10583_v63  ;;  %v10599_v55 = vrot.slane %v1568_v23, %v9810_v47  ;;  %v10602_v9 = vrot.slane %v1569_v25, %v9810_v47  ;;  %v10605_v43 = vrot.slane %v2351_v53, %v9810_v47  ;;  %v407_v23 = vld [vmem:[%s10310_s9 + $0x20] sm:$0x3] }
  0x97   : > { %13220 = vst [vmem:[#allocation28_spill] sm:$0xff] %v10586_v36  ;;  %13221 = vst [vmem:[#allocation29_spill] sm:$0xff] %v10590_v32  ;;  %v2415_v51 = vcombine.low %v10586_v36, %v10590_v32  ;;  %v8003_v8 = vcombine.high %v10586_v36, %v10590_v32  ;;  %v2210_v54 = vrot.slane %v2182_v50, %v9810_v47 }
  0x98   : > { %13222 = vst [vmem:[#allocation30_spill] sm:$0xff] %v10599_v55  ;;  %13223 = vst [vmem:[#allocation31_spill] sm:$0xff] %v10602_v9  ;;  %v10616_v28 = vrot.slane %v2380_v39, %v9810_v47  ;;  %v2417_v49 = vcombine.low %v10599_v55, %v10602_v9  ;;  %v8004_v56 = vcombine.high %v10599_v55, %v10602_v9 }
  0x99   : > { %v2382_v25 = vcombine.low %v10594_v20, %v10605_v43  ;;  %v10627_v53 = vrot.slane %v2415_v51, %v9810_v47  ;;  %v10630_v24 = vrot.slane %v8003_v8, %v9810_v47  ;;  %v2211_v39 = vcombine.low %v10336_v6, %v10374_v14 }
  0x9a   : > { %v10635_v42 = vrot.slane %v2417_v49, %v9810_v47  ;;  %v10638_v9 = vrot.slane %v8004_v56, %v9810_v47  ;;  %v2213_v50 = vcombine.low %v2196_v34, %v2210_v54  ;;  %v7921_v32 = vcombine.low %v405_v17, %v406_v26 }
  0x9b   : > { %v10641_v55 = vrot.slane %v2382_v25, %v9810_v47  ;;  %v2447_v51 = vcombine.low %v10627_v53, %v10630_v24  ;;  %v7922_v36 = vcombine.low %v407_v23, %v407_v23  ;;  %v655_v8 = vshrl.u32 %v10499_v2, 16 }
  0x9c   : > { %v2449_v6 = vcombine.low %v10635_v42, %v10638_v9  ;;  %2825 = vmatprep.mubr.bf16.mxu0 %v2213_v50  ;;  %v659_v14 = vshrl.u32 %v7921_v32, 16  ;;  %v661_v49 = vshll.u32 %v7921_v32, 16  ;;  %v719_v11 = vrot.slane %v7921_v32, 1 }
  0x9d   : > { %v2413_v34 = vcombine.high %v10616_v28, %v10641_v55  ;;  %v10651_v26 = vrot.slane %v2447_v51, %v9810_v47  ;;  %2826 = vmatmul.mubr.bf16.gmra.mrb[20].mxu0 %v2211_v39  ;;  %v657_v56 = vor.u32 %v655_v8, %v10523_v61  ;;  %v666_v54 = vshll.u32 %v7922_v36, 16 }
  0x9e   : > { %v10655_v25 = vrot.slane %v2449_v6, %v9810_v47  ;;  %v663_v4 = vrot.slane %v661_v49, 1  ;;  %v720_v41 = vrot.slane %v7922_v36, 1  ;;  %v13224_v50 = vrot.slane %v10499_v2, 1 }
  0x9f   : > { %8998 = vmatprep.mubr.bf16.mxu1 %v2413_v34  ;;  %v668_v12 = vrot.slane %v666_v54, 1  ;;  %v7944_v44 = vcombine.low %v10473_v22, %v657_v56  ;;  %v670_v7 = vshrl.u32 %v7922_v36, 16  ;;  %v2247_v39 = vcombine.high %v10410_v59, %v10421_v5 }
  0xa0   : > { %v1616_v13 = vrot.slane %v13224_v50, %v9810_v47  ;;  %v2480_v61 = vcombine.high %v10651_v26, %v10655_v25  ;;  %v664_v51 = vor.u32 %v663_v4, %v659_v14  ;;  %v721_v8 = vsel %vm13182_vm0, %v719_v11, %v720_v41 }
  0xa1   : > { %v1754_v6 = vrot.slane %v720_v41, %v9810_v47  ;;  %v1609_v49 = vrot.slane %v7944_v44, %v9810_v47  ;;  %v1675_v2 = vcombine.high %v721_v8, %v721_v8  ;;  %v1696_v34 = vrot.slane %v721_v8, %v9810_v47 }
  0xa2   : > { %v672_v54 = vor.u32 %v670_v7, %v668_v12  ;;  %8999 = vmatmul.mubr.bf16.gmra.mrb[16].mxu1 %v2480_v61  ;;  %v669_v22 = vsel %vm13185_vm1, %v664_v51, %v668_v12  ;;  %v2249_v59 = vcombine.high %v10424_v18, %v10436_v60  ;;  %v2263_v5 = vrot.slane %v2247_v39, %v9810_v47 }
  0xa3   : > { %v2278_v4 = vcombine.low %v10454_v16, %v10467_v58  ;;  %v1617_v11 = vcombine.low %v1609_v49, %v1616_v13  ;;  %v7945_v36 = vcombine.low %v405_v17, %v669_v22  ;;  %v1674_v41 = vcombine.high %v7921_v32, %v669_v22 }
  0xa4   : > { %v1703_v44 = vrot.slane %v1675_v2, %v9810_v47  ;;  %v7946_v14 = vcombine.low %v407_v23, %v672_v54  ;;  %v2277_v56 = vrot.slane %v2249_v59, %v9810_v47  ;;  %v1238_v7 = vcombine.high %v10203_v29, %v10203_v29 }
  0xa5   : > { %v3344_v12 = vcombine.low %v10087_v48, %v10135_v19  ;;  %v10682_v18 = vrot.slane %v1617_v11, %v9810_v47  ;;  %v1682_v60 = vrot.slane %v7945_v36, %v9810_v47  ;;  %v1689_v58 = vrot.slane %v1674_v41, %v9810_v47 }
  0xa6   : > { %v8034_v16 = vcombine.high %v10087_v48, %v10135_v19  ;;  %v1747_v13 = vrot.slane %v7946_v14, %v9810_v47  ;;  %v2280_v32 = vcombine.low %v2263_v5, %v2277_v56  ;;  %v3347_v17 = vcombine.low %v10206_v21, %v1238_v7 }
  0xa7   : > { %v10691_v23 = vrot.slane %v3344_v12, %v9810_v47  ;;  %v1704_v50 = vcombine.low %v1682_v60, %v1696_v34  ;;  %v1705_v39 = vcombine.high %v1682_v60, %v1696_v34  ;;  %v1706_v61 = vcombine.low %v1689_v58, %v1703_v44 }
  0xa8   : > { %v1707_v51 = vcombine.high %v1689_v58, %v1703_v44  ;;  %v1755_v8 = vcombine.low %v1747_v13, %v1754_v6  ;;  %2833 = vmatprep.mubr.bf16.mxu0 %v2280_v32  ;;  %v10694_v49 = vrot.slane %v8034_v16, %v9810_v47  ;;  %v13225_v48 = vcombine.low %v10184_v57, %v10203_v29 }
  0xa9   : > { %v10703_v2 = vrot.slane %v3347_v17, %v9810_v47  ;;  %v10706_v54 = vrot.slane %v1704_v50, %v9810_v47  ;;  %v10709_v34 = vrot.slane %v1706_v61, %v9810_v47  ;;  %v10712_v6 = vrot.slane %v1705_v39, %v9810_v47  ;;  %2834 = vmatmul.mubr.bf16.gmra.mrb[24].mxu0 %v2278_v4 }
  0xaa   : > { %v10700_v19 = vrot.slane %v13225_v48, %v9810_v47  ;;  %v10715_v22 = vrot.slane %v1707_v51, %v9810_v47  ;;  %v1241_v57 = vcombine.high %v10264_v37, %v10264_v37  ;;  %v10720_v29 = vrot.slane %v1755_v8, %v9810_v47 }
  0xab   : > { %13226 = vst [vmem:[#allocation32_spill] sm:$0xff] %v10706_v54  ;;  %13227 = vst [vmem:[#allocation33_spill] sm:$0xff] %v10709_v34  ;;  %v3377_v59 = vcombine.high %v10691_v23, %v10694_v49  ;;  %v1736_v11 = vcombine.high %v10706_v54, %v10706_v54  ;;  %v1737_v36 = vcombine.high %v10709_v34, %v10709_v34 }
  0xac   : > { %13228 = vst [vmem:[#allocation34_spill] sm:$0xff] %v10712_v6  ;;  %13229 = vst [vmem:[#allocation35_spill] sm:$0xff] %v10715_v22  ;;  %v3379_v5 = vcombine.high %v10700_v19, %v10703_v2  ;;  %v1738_v4 = vcombine.high %v10712_v6, %v10712_v6  ;;  %v2482_v41 = vcombine.low %v10682_v18, %v10706_v54 }
  0xad   : > { %13230 = vst [vmem:[#allocation36_spill] sm:$0xff] %v10720_v29  ;;  %v1739_v44 = vcombine.high %v10715_v22, %v10715_v22  ;;  %v3393_v14 = vrot.slane %v3377_v59, %v9810_v47  ;;  %v3376_v7 = vcombine.low %v10691_v23, %v10694_v49  ;;  %v2483_v12 = vcombine.low %v10712_v6, %v1736_v11 }
  0xae   : > { %v3407_v56 = vrot.slane %v3379_v5, %v9810_v47  ;;  %v2484_v60 = vcombine.low %v1738_v4, %v10709_v34  ;;  %v2485_v58 = vcombine.low %v10715_v22, %v1737_v36  ;;  %v10744_v16 = vrot.slane %v2482_v41, %v9810_v47 }
  0xaf   : > { %v3413_v13 = vcombine.low %v1241_v57, %v10267_v38  ;;  %v2549_v32 = vcombine.low %v1739_v44, %v10720_v29  ;;  %v3378_v50 = vcombine.low %v10700_v19, %v10703_v2  ;;  %v10751_v39 = vrot.slane %v2483_v12, %v9810_v47 }
  0xb0   : > { %v3410_v17 = vcombine.low %v3393_v14, %v3407_v56  ;;  %v10754_v61 = vrot.slane %v2484_v60, %v9810_v47  ;;  %v10757_v51 = vrot.slane %v2485_v58, %v9810_v47  ;;  %v2314_v8 = vcombine.high %v10464_v62, %v10504_v0 }
  0xb1   : > { %v10762_v38 = vrot.slane %v2549_v32, %v9810_v47  ;;  %v10765_v48 = vrot.slane %v3376_v7, %v9810_v47  ;;  %v2316_v57 = vcombine.high %v10507_v1, %v10512_v27  ;;  %v2345_v59 = vcombine.low %v10528_v15, %v10535_v40 }
  0xb2   : > { %v2514_v5 = vcombine.low %v10744_v16, %v10751_v39  ;;  %v2516_v11 = vcombine.low %v10754_v61, %v10757_v51  ;;  %v2330_v62 = vrot.slane %v2314_v8, %v9810_v47  ;;  %v1239_v0 = vcombine.high %v10261_v30, %v10261_v30 }
  0xb3   : > { %v10780_v36 = vrot.slane %v10762_v38, %v9810_v47  ;;  %v2344_v27 = vrot.slane %v2316_v57, %v9810_v47  ;;  %v1240_v1 = vcombine.high %v10206_v21, %v10206_v21  ;;  %v3414_v15 = vcombine.low %v10289_v45, %v10292_v46 }
  0xb4   : > { %v10788_v40 = vrot.slane %v2514_v5, %v9810_v47  ;;  %v10791_v4 = vrot.slane %v2516_v11, %v9810_v47  ;;  %v3412_v41 = vcombine.low %v10264_v37, %v1239_v0  ;;  %v10795_v44 = vrot.slane %v3413_v13, %v9810_v47 }
  0xb5   : > { %v2572_v14 = vcombine.high %v10780_v36, %v10780_v36  ;;  %v2347_v56 = vcombine.low %v2330_v62, %v2344_v27  ;;  %v3411_v21 = vcombine.low %v1240_v1, %v10261_v30  ;;  %v10801_v7 = vrot.slane %v3414_v15, %v9810_v47 }
  0xb6   : > { %v2547_v12 = vcombine.high %v10788_v40, %v10791_v4  ;;  %v10806_v60 = vrot.slane %v3412_v41, %v9810_v47  ;;  %v2381_v37 = vcombine.high %v10567_v10, %v10583_v63  ;;  %v2383_v58 = vcombine.high %v10594_v20, %v10605_v43 }
  0xb7   : > { %v10813_v13 = vrot.slane %v3378_v50, %v9810_v47  ;;  %2841 = vmatprep.mubr.bf16.mxu0 %v2347_v56  ;;  %v10816_v30 = vrot.slane %v3411_v21, %v9810_v47  ;;  %v3446_v32 = vcombine.high %v10795_v44, %v10801_v7  ;;  %v3445_v8 = vcombine.low %v10795_v44, %v10801_v7 }
  0xb8   : > { %9002 = vmatprep.mubr.bf16.mxu1 %v2547_v12  ;;  %2842 = vmatmul.mubr.bf16.gmra.mrb[28].mxu0 %v2345_v59  ;;  %v2397_v10 = vrot.slane %v2381_v37, %v9810_v47  ;;  %v2411_v63 = vrot.slane %v2383_v58, %v9810_v47  ;;  %v8035_v20 = vcombine.high %v10289_v45, %v10292_v46  ;;  %v13232_v12 = vld [vmem:[#allocation20_spill] sm:$0xff]  ;;  %v9484_v58 = vld [vmem:[%s13078_s2 + $0x88] sm:$0xff]  }
  0xb9   : > { %9003 = vmatmul.mubr.bf16.gmra.mrb[20].mxu1 %v2572_v14  ;;  %v3444_v43 = vcombine.high %v10816_v30, %v10806_v60  ;;  %v3474_v50 = vrot.slane %v3446_v32, %v9810_v47  ;;  %v3443_v57 = vcombine.low %v10816_v30, %v10806_v60  ;;  %v2412_v5 = vcombine.low %v10616_v28, %v10641_v55 }
  0xba   : > { %4022 = vmatprep.mubr.bf16.mxu1 %v3410_v17  ;;  %v2414_v59 = vcombine.low %v2397_v10, %v2411_v63  ;;  %v3479_v11 = vcombine.low %v10383_v33, %v10386_v35  ;;  %v8036_v45 = vcombine.high %v10383_v33, %v10386_v35  ;;  %v10838_v46 = vrot.slane %v8035_v20, %v9810_v47 }
  0xbb   : > { %v3460_v62 = vrot.slane %v3444_v43, %v9810_v47  ;;  %v10842_v0 = vrot.slane %v3445_v8, %v9810_v47  ;;  %v13231_v55 = vcombine.low %v10390_v31, %v10402_v3  ;;  %v2448_v17 = vcombine.high %v10627_v53, %v10630_v24 }
  0xbc   : > { %v10853_v27 = vrot.slane %v3443_v57, %v9810_v47  ;;  %2849 = vmatprep.mubr.bf16.mxu0 %v2414_v59  ;;  %v10856_v33 = vrot.slane %v3479_v11, %v9810_v47  ;;  %v10859_v35 = vrot.slane %v8036_v45, %v9810_v47  ;;  %v2450_v1 = vcombine.high %v10635_v42, %v10638_v9  ;;  %v13234_v45 = vld [vmem:[#allocation23_spill] sm:$0xff] }
  0xbd   : > { %v10848_v28 = vrot.slane %v13231_v55, %v9810_v47  ;;  %v3408_v31 = vcombine.low %v10765_v48, %v10813_v13  ;;  %v3477_v15 = vcombine.low %v3460_v62, %v3474_v50  ;;  %v2464_v41 = vrot.slane %v2448_v17, %v9810_v47  ;;  %v13233_v50 = vld [vmem:[#allocation21_spill] sm:$0xff]  ;;  %v9485_v17 = vld [vmem:[%s13078_s2 + $0x90] sm:$0xff]  }
  0xbe   : > { %v1418_v24 = vcombine.high %v10402_v3, %v10402_v3  ;;  %v3511_v53 = vcombine.high %v10838_v46, %v10856_v33  ;;  %v3510_v56 = vcombine.low %v10838_v46, %v10856_v33  ;;  %v2478_v9 = vrot.slane %v2450_v1, %v9810_v47 }
  0xbf   : > { %v3513_v14 = vcombine.high %v10859_v35, %v10848_v28  ;;  %v3512_v42 = vcombine.low %v10859_v35, %v10848_v28  ;;  %v1419_v21 = vcombine.high %v10476_v52, %v10476_v52  ;;  %v1420_v3 = vcombine.high %v13232_v12, %v13232_v12 }
  0xc0   : > { %v3545_v37 = vcombine.low %v13232_v12, %v1418_v24  ;;  %v3475_v32 = vcombine.low %v10853_v27, %v10842_v0  ;;  %2850 = vmatmul.mubr.bf16.gmra.mrb[32].mxu0 %v2412_v5  ;;  %v3527_v8 = vrot.slane %v3511_v53, %v9810_v47  ;;  %v2479_v63 = vcombine.low %v10651_v26, %v10655_v25 }
  0xc1   : > { %v3541_v10 = vrot.slane %v3513_v14, %v9810_v47  ;;  %4023 = vmatmul.mubr.bf16.vlgmr.msra.gmra.mrb[24].mxu1 %v3408_v31  ;;  %v2481_v20 = vcombine.low %v2464_v41, %v2478_v9  ;;  %v3546_v43 = vcombine.low %v1420_v3, %v10476_v52  ;;  %v3547_v57 = vcombine.low %v13233_v50, %v1419_v21  ;;  %v9591_v52 = vld [vmem:[%s13078_s2 + $0x80] sm:$0xff]   ;;  %v13238_v9 = vld [vmem:[#allocation25_spill] sm:$0xff]  ;;  %v13239_v3 = vld [vmem:[#allocation16_spill] sm:$0xff] }
  0xc2   : > { %v10894_v59 = vrot.slane %v3545_v37, %v9810_v47  ;;  %4030 = vmatprep.mubr.bf16.mxu1 %v3477_v15  ;;  %v10897_v11 = vrot.slane %v3510_v56, %v9810_v47  ;;  %v10900_v5 = vrot.slane %v3512_v42, %v9810_v47  ;;  %v10904_v62 = vrot.slane %v13234_v45, %v9810_v47  ;;  %v13235_v15 = vld [vmem:[#allocation24_spill] sm:$0xff]  ;;  %v13236_v41 = vld [vmem:[#allocation22_spill] sm:$0xff]  ;;  %v9486_v45 = vld [vmem:[%s13078_s2 + $0x98] sm:$0xff]  }
  0xc3   : > { %9007 = vmatpush3.bf16.msra.mxu1 %v9591_v52  ;;  %2857 = vmatprep.mubr.bf16.mxu0 %v2481_v20  ;;  %v10910_v26 = vrot.slane %v3546_v43, %v9810_v47  ;;  %v10913_v25 = vrot.slane %v3547_v57, %v9810_v47  ;;  %v2515_v55 = vcombine.high %v10744_v16, %v10751_v39  ;;  %v13237_v42 = vld [vmem:[#allocation26_spill] sm:$0xff] }
  0xc4   : > { %9008 = vmatprep.subr.bf16.mxu1 %v9484_v58  ;;  %v3544_v1 = vcombine.low %v3527_v8, %v3541_v10  ;;  %v2517_v31 = vcombine.high %v10754_v61, %v10757_v51  ;;  %v3612_v24 = vcombine.low %v13236_v41, %v13235_v15  ;;  %v8037_v53 = vcombine.high %v13236_v41, %v13235_v15  ;;  %v13242_v41 = vld [vmem:[#allocation28_spill] sm:$0xff] }
  0xc5   : > { %v3578_v14 = vcombine.high %v10894_v59, %v10910_v26  ;;  %v3580_v16 = vcombine.high %v10913_v25, %v10904_v62  ;;  %v3577_v39 = vcombine.low %v10894_v59, %v10910_v26  ;;  %v3579_v56 = vcombine.low %v10913_v25, %v10904_v62 }
  0xc6   : > { %v2531_v61 = vrot.slane %v2515_v55, %v9810_v47  ;;  %v2545_v51 = vrot.slane %v2517_v31, %v9810_v47  ;;  %v3614_v21 = vcombine.low %v13238_v9, %v13237_v42  ;;  %v8038_v12 = vcombine.high %v13238_v9, %v13237_v42 }
  0xc7   : > { %9009 = vmatpush3.bf16.msra.mxu1 %v9484_v58  ;;  %v3542_v8 = vcombine.low %v10897_v11, %v10900_v5  ;;  %v3594_v10 = vrot.slane %v3578_v14, %v9810_v47  ;;  %v3608_v58 = vrot.slane %v3580_v16, %v9810_v47  ;;  %v10947_v43 = vrot.slane %v3612_v24, %v9810_v47  ;;  %v10984_v14 = vld [vmem:[%s9776_s19] sm:$0xf]  ;;  %v376_v16 = vld [vmem:[%s9776_s19 + $0x4] sm:$0xf] }
  0xc8   : > { %9010 = vmatprep.subr.bf16.mxu1 %v9485_v17  ;;  %2858 = vmatmul.mubr.bf16.gmra.mrb[36].mxu0 %v2479_v63  ;;  %v2548_v20 = vcombine.low %v2531_v61, %v2545_v51  ;;  %v10950_v50 = vrot.slane %v8037_v53, %v9810_v47  ;;  %v10953_v57 = vrot.slane %v3614_v21, %v9810_v47  ;;  %v13244_v51 = vld [vmem:[#allocation29_spill] sm:$0xff] }
  0xc9   : > { %4031 = vmatmul.mubr.bf16.gmra.mrb[28].mxu1 %v3475_v32  ;;  %v10959_v52 = vrot.slane %v3577_v39, %v9810_v47  ;;  %v2546_v63 = vcombine.low %v10788_v40, %v10791_v4  ;;  %v10964_v55 = vrot.slane %v8038_v12, %v9810_v47  ;;  %v2557_v31 = vcombine.high %v10762_v38, %v10762_v38  ;;  %v10988_v39 = vld [vmem:[%s9776_s19 + $0x8] sm:$0x3]  ;;  %s7899_s19 = sshll.u32 %s13438_s22, 5 }
  0xca   : > { %13240 = vst [vmem:[#allocation20_spill] sm:$0xff] %v10950_v50  ;;  %4038 = vmatprep.mubr.bf16.mxu1 %v3544_v1  ;;  %v10969_v15 = vrot.slane %v3579_v56, %v9810_v47  ;;  %2865 = vmatprep.mubr.bf16.mxu0 %v2548_v20  ;;  %v3645_v32 = vcombine.high %v10947_v43, %v10950_v50  ;;  %v13243_v1 = vld [vmem:[#allocation30_spill] sm:$0xff]  ;;  %v13245_v20 = vld [vmem:[#allocation31_spill] sm:$0xff] }
  0xcb   : > { %13241 = vst [vmem:[#allocation21_spill] sm:$0xff] %v10964_v55  ;;  %v1598_v24 = vcombine.high %v13242_v41, %v13242_v41  ;;  %v3647_v40 = vcombine.high %v10953_v57, %v10964_v55  ;;  %v3644_v4 = vcombine.low %v10947_v43, %v10950_v50  ;;  %v3646_v38 = vcombine.low %v10953_v57, %v10964_v55 }
  0xcc   : > { %9011 = vmatpush3.bf16.msra.mxu1 %v9485_v17  ;;  %v1599_v53 = vcombine.high %v13243_v1, %v13243_v1  ;;  %v3611_v56 = vcombine.low %v3594_v10, %v3608_v58  ;;  %v2571_v61 = vrot.slane %v2557_v31, %v9810_v47  ;;  %v1600_v42 = vcombine.high %v13244_v51, %v13244_v51  ;;  %v9487_v17 = vld [vmem:[%s13078_s2 + $0xa0] sm:$0xff]   ;;  %v13246_v58 = vld [vmem:[#allocation27_spill] sm:$0xff] }
  0xcd   : > { %9012 = vmatprep.subr.bf16.mxu1 %v9486_v45  ;;  %v3680_v9 = vcombine.low %v13244_v51, %v1598_v24  ;;  %v10998_v21 = vrot.slane %v3645_v32, %v9810_v47  ;;  %v11001_v12 = vrot.slane %v3647_v40, %v9810_v47  ;;  %v13247_v31 = vcombine.low %v13246_v58, %v13242_v41 }
  0xce   : > { %v3682_v10 = vcombine.low %v13245_v20, %v1599_v53  ;;  %v3681_v24 = vcombine.low %v1600_v42, %v13243_v1  ;;  %v11015_v29 = vcombine.low %v10984_v14, %v376_v16  ;;  %v7902_v32 = vcombine.low %v10988_v39, %v10988_v39 }
  0xcf   : > { %v11008_v37 = vrot.slane %v13247_v31, %v9810_v47  ;;  %v11012_v51 = vrot.slane %v3680_v9, %v9810_v47  ;;  %v11020_v40 = vrot.slane %v3644_v4, %v9810_v47  ;;  %v11023_v53 = vrot.slane %v3646_v38, %v9810_v47 }
  0xd0   : > { %9013 = vmatpush3.bf16.msra.mxu1 %v9486_v45  ;;  %v11026_v41 = vrot.slane %v3682_v10, %v9810_v47  ;;  %v1601_v1 = vcombine.high %v13245_v20, %v13245_v20  ;;  %2866 = vmatmul.mubr.bf16.gmra.mrb[40].mxu0 %v2546_v63  ;;  %v11031_v16 = vrot.slane %v3681_v24, %v9810_v47  ;;  %v9488_v45 = vld [vmem:[%s13078_s2 + $0xa8] sm:$0xff]   ;;  %v509_v38 = vshrl.u32 %v11015_v29, 16 }
  0xd1   : > { %13248 = vst [vmem:[#allocation23_spill] sm:$0xff] %v11008_v37  ;;  %13249 = vst [vmem:[#allocation24_spill] sm:$0xff] %v11012_v51  ;;  %v3712_v42 = vcombine.high %v11008_v37, %v11012_v51  ;;  %v3711_v4 = vcombine.low %v11008_v37, %v11012_v51  ;;  %9014 = vmatprep.subr.bf16.mxu1 %v9487_v17  ;;  %4039 = vmatmul.mubr.bf16.gmra.mrb[32].mxu1 %v3542_v8  ;;  %v511_v63 = vshll.u32 %v11015_v29, 16  ;;  %v13268_v37 = vld [vmem:[#allocation14_spill] sm:$0xff] }
  0xd2   : > { %13250 = vst [vmem:[#allocation22_spill] sm:$0xff] %v11026_v41  ;;  %13251 = vst [vmem:[#allocation26_spill] sm:$0xff] %v11031_v16  ;;  %2873 = vmatprep.mubr.bf16.mxu0 %v2571_v61  ;;  %v516_v9 = vshll.u32 %v7902_v32, 16  ;;  %v689_v20 = vrot.slane %v11015_v29, 1  ;;  %v690_v10 = vrot.slane %v7902_v32, 1  ;;  %4046 = vmatprep.mubr.bf16.mxu1 %v3611_v56  ;;  %v3609_v58 = vcombine.low %v10959_v52, %v10969_v15  ;;  %v13253_v56 = vld [vmem:[#allocation4_spill] sm:$0xff] }
  0xd3   : > { %v3678_v31 = vcombine.low %v10998_v21, %v11001_v12  ;;  %v3714_v24 = vcombine.high %v11031_v16, %v11026_v41  ;;  %v3713_v8 = vcombine.low %v11031_v16, %v11026_v41  ;;  %v513_v61 = vrot.slane %v511_v63, 1 }
  0xd4   : > { %9015 = vmatpush3.bf16.msra.mxu1 %v9487_v17  ;;  %v518_v34 = vrot.slane %v516_v9, 1  ;;  %v691_v22 = vsel %vm13182_vm0, %v689_v20, %v690_v10  ;;  %v3746_v54 = vcombine.low %v1601_v1, %v10682_v18  ;;  %v11056_v6 = vrot.slane %v3712_v42, %v9810_v47  ;;  %v9493_v17 = vld [vmem:[%s13078_s2 + $0xb0] sm:$0xff]  }
  0xd5   : > { %v11059_v21 = vrot.slane %v3711_v4, %v9810_v47  ;;  %9016 = vmatprep.subr.bf16.mxu1 %v9488_v45  ;;  %v727_v12 = vcombine.high %v691_v22, %v691_v22  ;;  %v11065_v63 = vrot.slane %v3714_v24, %v9810_v47  ;;  %v514_v9 = vor.u32 %v513_v61, %v509_v38 }
  0xd6   : > { %v11068_v18 = vrot.slane %v3746_v54, %v9810_v47  ;;  %v520_v1 = vshrl.u32 %v7902_v32, 16  ;;  %v11071_v42 = vrot.slane %v3713_v8, %v9810_v47  ;;  %v748_v4 = vrot.slane %v691_v22, %v9810_v47 }
  0xd7   : > { %v806_v20 = vrot.slane %v690_v10, %v9810_v47  ;;  %v878_v41 = vcombine.high %v13253_v56, %v13253_v56  ;;  %v519_v51 = vsel %vm13185_vm1, %v514_v9, %v518_v34  ;;  %v755_v24 = vrot.slane %v727_v12, %v9810_v47  ;;  %v9495_v10 = vld [vmem:[%s13078_s2 + $0xb8] sm:$0xff]   ;;  %v13255_v12 = vld [vmem:[#allocation6_spill] sm:$0xff] }
  0xd8   : > { %13252 = vst [vmem:[#allocation25_spill] sm:$0xff] %v11068_v18  ;;  %9017 = vmatpush3.bf16.msra.mxu1 %v9488_v45  ;;  %v3754_v54 = vcombine.high %v11068_v18, %v11068_v18  ;;  %v522_v38 = vor.u32 %v520_v1, %v518_v34  ;;  %2874 = vmatmul.mubr.bf16.gmra.mrb[44].mxu0 %v10780_v36  ;;  %v13254_v45 = vld [vmem:[#allocation5_spill] sm:$0xff]  ;;  %v13256_v1 = vld [vmem:[#allocation7_spill] sm:$0xff] }
  0xd9   : > { %v7925_v32 = vcombine.low %v10984_v14, %v519_v51  ;;  %v726_v22 = vcombine.high %v11015_v29, %v519_v51  ;;  %9018 = vmatprep.subr.bf16.mxu1 %v9493_v17  ;;  %v879_v8 = vcombine.high %v13254_v45, %v13254_v45  ;;  %4047 = vmatmul.mubr.bf16.gmra.mrb[36].mxu1 %v3609_v58 }
  0xda   : > { %v3745_v61 = vcombine.low %v11056_v6, %v11065_v63  ;;  %v7926_v34 = vcombine.low %v10988_v39, %v522_v38  ;;  %v880_v36 = vcombine.high %v13255_v12, %v13255_v12  ;;  %v3077_v14 = vcombine.low %v13255_v12, %v878_v41  ;;  %4054 = vmatprep.mubr.bf16.mxu1 %v3678_v31 }
  0xdb   : > { %v734_v51 = vrot.slane %v7925_v32, %v9810_v47  ;;  %v741_v9 = vrot.slane %v726_v22, %v9810_v47  ;;  %v3079_v58 = vcombine.low %v13256_v1, %v879_v8  ;;  %v11101_v16 = vrot.slane %v3754_v54, %v9810_v47  ;;  %v11110_v32 = vld [vmem:[%s13078_s2 + $0x200] sm:$0xff]  }
  0xdc   : > { %9019 = vmatpush3.bf16.msra.mxu1 %v9493_v17  ;;  %v799_v6 = vrot.slane %v7926_v34, %v9810_v47  ;;  %v3078_v39 = vcombine.low %v880_v36, %v13254_v45  ;;  %v881_v41 = vcombine.high %v13256_v1, %v13256_v1  ;;  %v3093_v17 = vrot.slane %v3077_v14, %v9810_v47  ;;  %v13259_v1 = vld [vmem:[#allocation8_spill] sm:$0xff] }
  0xdd   : > { %v756_v31 = vcombine.low %v734_v51, %v748_v4  ;;  %v757_v63 = vcombine.high %v734_v51, %v748_v4  ;;  %v758_v38 = vcombine.low %v741_v9, %v755_v24  ;;  %v759_v12 = vcombine.high %v741_v9, %v755_v24  ;;  %9020 = vmatprep.subr.bf16.mxu1 %v9495_v10  ;;  %v13257_v51 = vld [vmem:[#allocation3_spill] sm:$0xff] }
  0xde   : > { %v807_v54 = vcombine.low %v799_v6, %v806_v20  ;;  %v3100_v22 = vrot.slane %v3078_v39, %v9810_v47  ;;  %v3107_v45 = vrot.slane %v3079_v58, %v9810_v47  ;;  %v3143_v9 = vcombine.low %v881_v41, %v13257_v51  ;;  %v13258_v20 = vld [vmem:[#allocation10_spill] sm:$0xff] }
  0xdf   : > { %v766_v8 = vrot.slane %v756_v31, %v9810_v47  ;;  %v773_v34 = vrot.slane %v758_v38, %v9810_v47  ;;  %v780_v4 = vrot.slane %v757_v63, %v9810_v47  ;;  %v787_v24 = vrot.slane %v759_v12, %v9810_v47  ;;  %v13261_v12 = vld [vmem:[#allocation11_spill] sm:$0xff] }
  0xe0   : > { %9021 = vmatpush3.bf16.msra.mxu1 %v9495_v10  ;;  %v814_v36 = vrot.slane %v807_v54, %v9810_v47  ;;  %v3144_v14 = vcombine.low %v13259_v1, %v13258_v20  ;;  %v8031_v6 = vcombine.high %v13259_v1, %v13258_v20  ;;  %v13260_v63 = vcombine.low %v11020_v40, %v11023_v53  ;;  %v13262_v54 = vld [vmem:[#allocation9_spill] sm:$0xff] }
  0xe1   : > { %v3009_v58 = vcombine.low %v766_v8, %v780_v4  ;;  %v8029_v39 = vcombine.high %v766_v8, %v780_v4  ;;  %v3011_v31 = vcombine.low %v773_v34, %v787_v24  ;;  %v8030_v29 = vcombine.high %v773_v34, %v787_v24  ;;  %9046 = vmatprep.subr.bf16.mxu1 %v11110_v32 }
  0xe2   : > { %4055 = vmatmul.mubr.bf16.gmra.mrb[40].mxu1 %v13260_v63  ;;  %v3076_v10 = vcombine.low %v814_v36, %v13253_v56  ;;  %v3111_v38 = vcombine.high %v3100_v22, %v3107_v45  ;;  %v3110_v41 = vcombine.low %v3100_v22, %v3107_v45  ;;  %v3146_v51 = vcombine.low %v13262_v54, %v13261_v12 }
  0xe3   : > { %4062 = vmatprep.mubr.bf16.mxu1 %v3745_v61  ;;  %v3019_v20 = vrot.slane %v3009_v58, %v9810_v47  ;;  %v3026_v8 = vrot.slane %v8029_v39, %v9810_v47  ;;  %v3033_v34 = vrot.slane %v3011_v31, %v9810_v47  ;;  %v3040_v4 = vrot.slane %v8030_v29, %v9810_v47 }
  0xe4   : > { %v3086_v24 = vrot.slane %v3076_v10, %v9810_v47  ;;  %v11138_v1 = vrot.slane %v3143_v9, %v9810_v47  ;;  %v11141_v56 = vrot.slane %v3144_v14, %v9810_v47  ;;  %v11144_v22 = vrot.slane %v8031_v6, %v9810_v47 }
  0xe5   : > { %v3041_v61 = vcombine.low %v3019_v20, %v3026_v8  ;;  %v3042_v45 = vcombine.high %v3019_v20, %v3026_v8  ;;  %v3043_v36 = vcombine.low %v3033_v34, %v3040_v4  ;;  %v3044_v58 = vcombine.high %v3033_v34, %v3040_v4  ;;  %v13264_v4 = vld [vmem:[#allocation12_spill] sm:$0xff] }
  0xe6   : > { %v3109_v39 = vcombine.high %v3086_v24, %v3093_v17  ;;  %v3139_v31 = vrot.slane %v3111_v38, %v9810_v47  ;;  %v3108_v63 = vcombine.low %v3086_v24, %v3093_v17  ;;  %v11148_v29 = vrot.slane %v3146_v51, %v9810_v47  ;;  %v9492_v17 = vld [vmem:[%s13078_s2 + $0x180] sm:$0xff]   ;;  %v13263_v51 = vld [vmem:[#allocation13_spill] sm:$0xff] }
  0xe7   : > { %v3058_v9 = vrot.slane %v3042_v45, %v9810_v47  ;;  %v3072_v10 = vrot.slane %v3044_v58, %v9810_v47  ;;  %v3051_v14 = vrot.slane %v3041_v61, %v9810_v47  ;;  %v3065_v6 = vrot.slane %v3043_v36, %v9810_v47  ;;  %v13265_v61 = vld [vmem:[#allocation17_spill] sm:$0xff] }
  0xe8   : > { %v3125_v55 = vrot.slane %v3109_v39, %v9810_v47  ;;  %v3176_v20 = vcombine.high %v11138_v1, %v11141_v56  ;;  %v3178_v38 = vcombine.high %v11144_v22, %v11148_v29  ;;  %v3211_v24 = vcombine.low %v13264_v4, %v13263_v51 }
  0xe9   : > { %v3075_v8 = vcombine.low %v3058_v9, %v3072_v10  ;;  %v3073_v34 = vcombine.low %v3051_v14, %v3065_v6  ;;  %v13266_v45 = vcombine.high %v13239_v3, %v13239_v3  ;;  %v13267_v58 = vcombine.low %v11059_v21, %v11071_v42  ;;  %v9494_v9 = vld [vmem:[%s13078_s2 + $0x1c8] sm:$0xff]  }
  0xea   : > { %v11173_v39 = vrot.slane %v11068_v18, %v9810_v47  ;;  %v3142_v10 = vcombine.low %v3125_v55, %v3139_v31  ;;  %v11180_v4 = vrot.slane %v3108_v63, %v9810_v47  ;;  %v3192_v18 = vrot.slane %v3176_v20, %v9810_v47  ;;  %v13269_v63 = vld [vmem:[#allocation15_spill] sm:$0xff] }
  0xeb   : > { %v3278_v36 = vcombine.low %v13266_v45, %v13265_v61  ;;  %4063 = vmatmul.mubr.bf16.gmra.mrb[44].mxu1 %v13267_v58  ;;  %3982 = vmatprep.mubr.bf16.mxu0 %v3075_v8  ;;  %v11183_v61 = vrot.slane %v3110_v41, %v9810_v47  ;;  %v1058_v45 = vcombine.high %v13263_v51, %v13263_v51 }
  0xec   : > { %4070 = vmatprep.mubr.bf16.mxu1 %v11101_v16  ;;  %3983 = vmatmul.mubr.bf16.vlgmr.msra.gmra.mrb[48].mxu0 %v3073_v34  ;;  %v3074_v58 = vcombine.high %v3051_v14, %v3065_v6  ;;  %v1060_v50 = vcombine.high %v13268_v37, %v13268_v37  ;;  %v8032_v55 = vcombine.high %v13262_v54, %v13261_v12  ;;  %v9496_v16 = vld [vmem:[%s13078_s2 + $0x188] sm:$0xff]   ;;  %v9497_v6 = vld [vmem:[%s13078_s2 + $0x1d0] sm:$0xff]  }
  0xed   : > { %8619 = vmatpush3.bf16.msra.mxu0 %v9492_v17  ;;  %3990 = vmatprep.mubr.bf16.mxu0 %v3142_v10  ;;  %v3206_v41 = vrot.slane %v3178_v38, %v9810_v47  ;;  %v3212_v31 = vcombine.low %v13268_v37, %v1058_v45  ;;  %v1059_v14 = vcombine.high %v13269_v63, %v13269_v63  ;;  %v13270_v17 = vld [vmem:[#allocation19_spill] sm:$0xff]  ;;  %v13271_v38 = vld [vmem:[#allocation18_spill] sm:$0xff] }
  0xee   : > { %8620 = vmatprep.subr.bf16.mxu0 %v9494_v9  ;;  %v3175_v12 = vcombine.low %v11138_v1, %v11141_v56  ;;  %v3177_v54 = vcombine.low %v11144_v22, %v11148_v29  ;;  %v3213_v20 = vcombine.low %v1060_v50, %v13269_v63  ;;  %v11208_v8 = vrot.slane %v3211_v24, %v9810_v47 }
  0xef   : > { %v11211_v37 = vrot.slane %v8032_v55, %v9810_v47  ;;  %v3277_v34 = vcombine.low %v13239_v3, %v1059_v14  ;;  %v3279_v51 = vcombine.low %v13271_v38, %v13270_v17  ;;  %v8033_v9 = vcombine.high %v13271_v38, %v13270_v17  ;;  %v9498_v3 = vld [vmem:[%s13078_s2 + $0x190] sm:$0xff]  }
  0xf0   : > { %v3140_v1 = vcombine.low %v11180_v4, %v11183_v61  ;;  %v11221_v10 = vrot.slane %v3212_v31, %v9810_v47  ;;  %v11224_v50 = vrot.slane %v3213_v20, %v9810_v47  ;;  %v3209_v24 = vcombine.low %v3192_v18, %v3206_v41  ;;  %v9499_v31 = vld [vmem:[%s13078_s2 + $0x1d8] sm:$0xff]  }
  0xf1   : > { %8621 = vmatpush3.bf16.msra.mxu0 %v9496_v16  ;;  %v3243_v45 = vcombine.high %v11211_v37, %v11208_v8  ;;  %v3409_v55 = vcombine.high %v10765_v48, %v10813_v13  ;;  %v3185_v16 = vrot.slane %v3175_v12, %v9810_v47  ;;  %v3199_v63 = vrot.slane %v3177_v54, %v9810_v47 }
  0xf2   : > { %8622 = vmatprep.subr.bf16.mxu0 %v9497_v6  ;;  %v3245_v18 = vcombine.high %v11221_v10, %v11224_v50  ;;  %v11242_v41 = vrot.slane %v3277_v34, %v9810_v47  ;;  %v11245_v14 = vrot.slane %v3278_v36, %v9810_v47  ;;  %v11248_v6 = vrot.slane %v3279_v51, %v9810_v47  ;;  %v9501_v51 = vld [vmem:[%s13078_s2 + $0x1e0] sm:$0xff]  }
  0xf3   : > { %4071 = vmatmul.mubr.bf16.gmra.mrb[48].mxu1 %v11173_v39  ;;  %v11251_v20 = vrot.slane %v8033_v9, %v9810_v47  ;;  %v3259_v54 = vrot.slane %v3243_v45, %v9810_v47  ;;  %v3141_v34 = vcombine.high %v11180_v4, %v11183_v61  ;;  %v3242_v17 = vcombine.low %v11211_v37, %v11208_v8  ;;  %v9502_v45 = vld [vmem:[%s13078_s2 + $0x1a0] sm:$0xff]  }
  0xf4   : > { %9022 = vmatprep.mubr.bf16.mxu1 %v3074_v58  ;;  %3991 = vmatmul.mubr.bf16.gmra.mrb[52].mxu0 %v3140_v1  ;;  %v9500_v58 = vld [vmem:[%s13078_s2 + $0x198] sm:$0xff]   ;;  %v3273_v36 = vrot.slane %v3245_v18, %v9810_v47  ;;  %v3244_v38 = vcombine.low %v11221_v10, %v11224_v50  ;;  %v3208_v9 = vcombine.high %v3185_v16, %v3199_v63 }
  0xf5   : > { %8623 = vmatpush3.bf16.msra.mxu0 %v9498_v3  ;;  %3998 = vmatprep.mubr.bf16.mxu0 %v3209_v24  ;;  %v3309_v1 = vcombine.low %v11242_v41, %v11245_v14  ;;  %v3311_v3 = vcombine.low %v11248_v6, %v11251_v20  ;;  %v3207_v61 = vcombine.low %v3185_v16, %v3199_v63  ;;  %v9507_v24 = vld [vmem:[%s13078_s2 + $0x208] sm:$0xff]  }
  0xf6   : > { %8624 = vmatprep.subr.bf16.mxu0 %v9499_v31  ;;  %v3276_v31 = vcombine.low %v3259_v54, %v3273_v36  ;;  %v3310_v18 = vcombine.high %v11242_v41, %v11245_v14  ;;  %v3312_v12 = vcombine.high %v11248_v6, %v11251_v20  ;;  %v3252_v4 = vrot.slane %v3242_v17, %v9810_v47  ;;  %v9503_v63 = vld [vmem:[%s13078_s2 + $0x1e8] sm:$0xff]   ;;  %v9509_v36 = vld [vmem:[%s13078_s2 + $0x210] sm:$0xff]  }
  0xf7   : > { %v3266_v16 = vrot.slane %v3244_v38, %v9810_v47  ;;  %v3333_v54 = vrot.slane %v3311_v3, %v9810_v47  ;;  %v9512_v3 = vld [vmem:[%s13078_s2 + $0x218] sm:$0xff]  }
  0xf8   : > { %v3326_v17 = vrot.slane %v3310_v18, %v9810_v47  ;;  %v3340_v38 = vrot.slane %v3312_v12, %v9810_v47  ;;  %v9511_v18 = vld [vmem:[%s13078_s2 + $0x1b8] sm:$0xff]  }
  0xf9   : > { %8625 = vmatpush3.bf16.msra.mxu0 %v9500_v58  ;;  %v3319_v58 = vrot.slane %v3309_v1, %v9810_v47  ;;  %v3274_v1 = vcombine.low %v3252_v4, %v3266_v16 }
  0xfa   : > { %8626 = vmatprep.subr.bf16.mxu0 %v9501_v51  ;;  %v3275_v51 = vcombine.high %v3252_v4, %v3266_v16  ;;  %v3343_v12 = vcombine.low %v3326_v17, %v3340_v38  ;;  %v9510_v4 = vld [vmem:[%s13078_s2 + $0x1f8] sm:$0xff]   ;;  %v4347_v17 = vcombine.low %v11148_v29, %v11211_v37  ;;  %v9514_v38 = vld [vmem:[%s13078_s2 + $0x228] sm:$0xff]  }
  0xfb   : > { %9023 = vmatmul.mubr.bf16.vlgmr.msra.gmra.mrb[0].mxu1 %v3141_v34  ;;  %v9504_v34 = vld [vmem:[%s13078_s2 + $0x1a8] sm:$0xff]  }
  0xfc   : > { %9026 = vmatprep.mubr.bf16.mxu1 %v3208_v9  ;;  %9047 = vmatpush3.bf16.msra.mxu1 %v11110_v32  ;;  %v9506_v32 = vld [vmem:[%s13078_s2 + $0x1f0] sm:$0xff]   ;;  %v3342_v9 = vcombine.high %v3319_v58, %v3333_v54 }
  0xfd   : > { %3999 = vmatmul.mubr.bf16.gmra.mrb[56].mxu0 %v3207_v61  ;;  %9048 = vmatprep.subr.bf16.mxu1 %v9507_v24  ;;  %v9508_v61 = vld [vmem:[%s13078_s2 + $0x1b0] sm:$0xff]  }
  0xfe   : > { %8627 = vmatpush3.bf16.msra.mxu0 %v9502_v45  ;;  %4006 = vmatprep.mubr.bf16.mxu0 %v3276_v31  ;;  %v4346_v45 = vcombine.high %v11141_v56, %v11144_v22  ;;  %v4348_v31 = vcombine.high %v11148_v29, %v11211_v37  ;;  %v11346_v29 = vrot.slane %v4347_v17, %v9810_v47  ;;  %v9515_v37 = vld [vmem:[%s13078_s2 + $0x230] sm:$0xff]  }
  0xff   : > { %8628 = vmatprep.subr.bf16.mxu0 %v9503_v63 }
 0x100   : > { %9049 = vmatpush3.bf16.msra.mxu1 %v9507_v24  ;;  %v9513_v24 = vld [vmem:[%s13078_s2 + $0x220] sm:$0xff]   ;;  %v4362_v16 = vrot.slane %v4346_v45, %v9810_v47  ;;  %v4376_v63 = vrot.slane %v4348_v31, %v9810_v47 }
 0x101   : > { %9050 = vmatprep.subr.bf16.mxu1 %v9509_v36 }
 0x102   : > { %8629 = vmatpush3.bf16.msra.mxu0 %v9504_v34  ;;  %v3341_v34 = vcombine.low %v3319_v58, %v3333_v54  ;;  %v4382_v58 = vcombine.low %v11224_v50, %v11242_v41  ;;  %v9516_v54 = vld [vmem:[%s13078_s2 + $0x238] sm:$0xff]  }
 0x103   : > { %9027 = vmatmul.mubr.bf16.gmra.mrb[4].mxu1 %v3275_v51  ;;  %8630 = vmatprep.subr.bf16.mxu0 %v9506_v32  ;;  %v4379_v51 = vcombine.low %v4362_v16, %v4376_v63  ;;  %v4381_v32 = vcombine.high %v11208_v8, %v11221_v10  ;;  %v11390_v16 = vld [vmem:[%s10310_s9 + $0x2c] sm:$0x3] }
 0x104   : > { %9030 = vmatprep.mubr.bf16.mxu1 %v3342_v9  ;;  %9051 = vmatpush3.bf16.msra.mxu1 %v9509_v36  ;;  %v4345_v36 = vcombine.low %v11141_v56, %v11144_v22  ;;  %v4383_v9 = vcombine.high %v11224_v50, %v11242_v41  ;;  %v13272_v56 = vcombine.high %v10853_v27, %v10842_v0 }
 0x105   : > { %4007 = vmatmul.mubr.bf16.gmra.mrb[60].mxu0 %v3274_v1  ;;  %9052 = vmatprep.subr.bf16.mxu1 %v9512_v3  ;;  %v4397_v48 = vrot.slane %v4381_v32, %v9810_v47  ;;  %v3610_v0 = vcombine.high %v10959_v52, %v10969_v15  ;;  %v4416_v52 = vcombine.high %v11245_v14, %v11248_v6 }
 0x106   : > { %8631 = vmatpush3.bf16.msra.mxu0 %v9508_v61  ;;  %4014 = vmatprep.mubr.bf16.mxu0 %v3343_v12  ;;  %v11343_v22 = vrot.slane %v4345_v36, %v9810_v47  ;;  %v4411_v13 = vrot.slane %v4383_v9, %v9810_v47  ;;  %v4418_v15 = vcombine.high %v11251_v20, %v10691_v23 }
 0x107   : > { %8632 = vmatprep.subr.bf16.mxu0 %v9510_v4  ;;  %v11375_v12 = vrot.slane %v4382_v58, %v9810_v47  ;;  %v4432_v45 = vrot.slane %v4416_v52, %v9810_v47  ;;  %v409_v4 = vld [vmem:[%s10310_s9 + $0x28] sm:$0xf]  ;;  %v11407_v17 = vcombine.low %v11390_v16, %v11390_v16 }
 0x108   : > { %9053 = vmatpush3.bf16.msra.mxu1 %v9512_v3  ;;  %v4377_v27 = vcombine.low %v11343_v22, %v11346_v29  ;;  %v4414_v3 = vcombine.low %v4397_v48, %v4411_v13  ;;  %v4446_v31 = vrot.slane %v4418_v15, %v9810_v47  ;;  %v4378_v52 = vcombine.high %v11343_v22, %v11346_v29 }
 0x109   : > { %9054 = vmatprep.subr.bf16.mxu1 %v9513_v24  ;;  %v723_v13 = vrot.slane %v11407_v17, 1 }
 0x10a   : > { %8633 = vmatpush3.bf16.msra.mxu0 %v9511_v18  ;;  %v4415_v18 = vcombine.low %v11245_v14, %v11248_v6 }
 0x10b   : > { %9031 = vmatmul.mubr.bf16.gmra.mrb[8].mxu1 %v3409_v55  ;;  %v4380_v55 = vcombine.low %v11208_v8, %v11221_v10  ;;  %v13273_v8 = vcombine.high %v10897_v11, %v10900_v5  ;;  %v3677_v11 = vcombine.high %v11020_v40, %v11023_v53  ;;  %v11382_v5 = vld [vmem:[%s10310_s9 + $0x24] sm:$0xf]  ;;  %v4449_v53 = vcombine.low %v4432_v45, %v4446_v31 }
 0x10c   : > { %9034 = vmatprep.mubr.bf16.mxu1 %v13272_v56  ;;  %9055 = vmatpush3.bf16.msra.mxu1 %v9513_v24  ;;  %v3744_v24 = vcombine.high %v11059_v21, %v11071_v42  ;;  %v4451_v21 = vcombine.high %v10694_v49, %v10700_v19  ;;  %v4453_v42 = vcombine.high %v10703_v2, %v10816_v30 }
 0x10d   : > { %4015 = vmatmul.mubr.bf16.gmra.mrb[64].mxu0 %v3341_v34  ;;  %9056 = vmatprep.subr.bf16.mxu1 %v9514_v38  ;;  %v11372_v41 = vrot.slane %v4380_v55, %v9810_v47  ;;  %v4417_v34 = vcombine.low %v11251_v20, %v10691_v23  ;;  %v7923_v14 = vcombine.low %v11382_v5, %v409_v4 }
 0x10e   : > { %5030 = vmatprep.mubr.bf16.mxu0 %v4379_v51  ;;  %v4425_v20 = vrot.slane %v4415_v18, %v9810_v47  ;;  %v4481_v55 = vrot.slane %v4453_v42, %v9810_v47  ;;  %v4488_v31 = vcombine.high %v10801_v7, %v10838_v46 }
 0x10f   : > { %v8418_v1 = vpop.f32.mrb[0].mxu0  ;;  %v4412_v63 = vcombine.low %v11372_v41, %v11375_v12  ;;  %v676_v51 = vshll.u32 %v7923_v14, 16  ;;  %v4439_v56 = vrot.slane %v4417_v34, %v9810_v47  ;;  %v722_v48 = vrot.slane %v7923_v14, 1 }
 0x110   : > { %9057 = vmatpush3.bf16.msra.mxu1 %v9514_v38  ;;  %v8419_v61 = vpop.f32.mrb[1].mxu0  ;;  %v674_v38 = vshrl.u32 %v7923_v14, 16  ;;  %v4516_v4 = vrot.slane %v4488_v31, %v9810_v47  ;;  %v4558_v31 = vcombine.high %v10904_v62, %v10947_v43 }
 0x111   : > { %9058 = vmatprep.subr.bf16.mxu1 %v9515_v37  ;;  %v8421_v10 = vpop.f32.mrb[2].mxu0  ;;  %v11396_v36 = vadd.f32 %v8419_v61, %v8418_v1  ;;  %v678_v58 = vrot.slane %v676_v51, 1  ;;  %v3769_v1 = vcombine.high %v11173_v39, %v11173_v39  ;;  %v4447_v61 = vcombine.low %v4425_v20, %v4439_v56 }
 0x112   : > { %v8422_v50 = vpop.f32.mrb[3].mxu0  ;;  %v4486_v39 = vcombine.high %v10806_v60, %v10795_v44  ;;  %v4448_v18 = vcombine.high %v4425_v20, %v4439_v56 }
 0x113   : > { %9035 = vmatmul.mubr.bf16.gmra.mrb[12].mxu1 %v13273_v8  ;;  %v11398_v40 = vadd.f32 %v8422_v50, %v8421_v10  ;;  %v679_v15 = vor.u32 %v678_v58, %v674_v38  ;;  %v4450_v8 = vcombine.low %v10694_v49, %v10700_v19  ;;  %v4452_v10 = vcombine.low %v10703_v2, %v10816_v30 }
 0x114   : > { %9038 = vmatprep.mubr.bf16.mxu1 %v3610_v0  ;;  %9059 = vmatpush3.bf16.msra.mxu1 %v9515_v37  ;;  %v681_v37 = vshll.u32 %v11407_v17, 16  ;;  %v724_v50 = vsel %vm13182_vm0, %v722_v48, %v723_v13 }
 0x115   : > { %5031 = vmatmul.mubr.bf16.vlgmr.msra.gmra.mrb[68].mxu0 %v4377_v27  ;;  %9060 = vmatprep.subr.bf16.mxu1 %v9516_v54  ;;  %v4467_v27 = vrot.slane %v4451_v21, %v9810_v47  ;;  %v4208_v29 = vcombine.high %v724_v50, %v724_v50  ;;  %v4460_v2 = vrot.slane %v4450_v8, %v9810_v47 }
 0x116   : > { %5038 = vmatprep.mubr.bf16.mxu0 %v4414_v3  ;;  %v683_v3 = vrot.slane %v681_v37, 1  ;;  %v4474_v30 = vrot.slane %v4452_v10, %v9810_v47  ;;  %v4229_v21 = vrot.slane %v724_v50, %v9810_v47  ;;  %v4555_v37 = vcombine.low %v10910_v26, %v10913_v25 }
 0x117   : > { %v4484_v45 = vcombine.low %v4467_v27, %v4481_v55  ;;  %v4236_v42 = vrot.slane %v4208_v29, %v9810_v47 }
 0x118   : > { %9061 = vmatpush3.bf16.msra.mxu1 %v9516_v54  ;;  %v8424_v6 = vpop.f32.mrb[4].mxu0  ;;  %v684_v22 = vsel %vm13185_vm1, %v679_v15, %v683_v3 }
 0x119   : > { %v8425_v23 = vpop.f32.mrb[5].mxu0  ;;  %v8063_v49 = vcombine.low %v11382_v5, %v684_v22  ;;  %v4207_v19 = vcombine.high %v7923_v14, %v684_v22  ;;  %v4487_v5 = vcombine.low %v10801_v7, %v10838_v46  ;;  %v4482_v14 = vcombine.low %v4460_v2, %v4474_v30 }
 0x11a   : > { %v11410_v32 = vadd.f32 %v8425_v23, %v8424_v6  ;;  %v8427_v9 = vpop.f32.mrb[6].mxu0  ;;  %v4520_v6 = vcombine.low %v10856_v33, %v10859_v35  ;;  %v4522_v46 = vcombine.low %v10848_v28, %v10894_v59  ;;  %v685_v23 = vshrl.u32 %v11407_v17, 16 }
 0x11b   : > { %9039 = vmatmul.mubr.bf16.gmra.mrb[16].mxu1 %v3677_v11  ;;  %v8428_v0 = vpop.f32.mrb[7].mxu0  ;;  %v4502_v11 = vrot.slane %v4486_v39, %v9810_v47  ;;  %v4215_v34 = vrot.slane %v8063_v49, %v9810_v47  ;;  %v4556_v39 = vcombine.high %v10910_v26, %v10913_v25  ;;  %v11483_v49 = vrot.slane %v4555_v37, %v9810_v47 }
 0x11c   : > { %9042 = vmatprep.mubr.bf16.mxu1 %v3744_v24  ;;  %v11417_v54 = vadd.f32 %v8428_v0, %v8427_v9  ;;  %v4413_v24 = vcombine.high %v11372_v41, %v11375_v12  ;;  %v4521_v12 = vcombine.high %v10856_v33, %v10859_v35  ;;  %v4483_v33 = vcombine.high %v4460_v2, %v4474_v30  ;;  %v13274_v2 = vld [vmem:[#allocation20_spill] sm:$0xff] }
 0x11d   : > { %5039 = vmatmul.mubr.bf16.gmra.mrb[72].mxu0 %v4412_v63  ;;  %v4485_v63 = vcombine.low %v10806_v60, %v10795_v44  ;;  %v4519_v41 = vcombine.low %v4502_v11, %v4516_v4  ;;  %v4523_v44 = vcombine.high %v10848_v28, %v10894_v59  ;;  %v4509_v60 = vrot.slane %v4487_v5, %v9810_v47  ;;  %v13275_v4 = vld [vmem:[#allocation23_spill] sm:$0xff] }
 0x11e   : > { %5046 = vmatprep.mubr.bf16.mxu0 %v4449_v53  ;;  %v4222_v53 = vrot.slane %v4207_v19, %v9810_v47  ;;  %v4237_v38 = vcombine.low %v4215_v34, %v4229_v21  ;;  %v4238_v51 = vcombine.high %v4215_v34, %v4229_v21  ;;  %v11462_v35 = vrot.slane %v4520_v6, %v9810_v47  ;;  %v13277_v34 = vld [vmem:[#allocation26_spill] sm:$0xff] }
 0x11f   : > { %v4495_v7 = vrot.slane %v4485_v63, %v9810_v47  ;;  %v4537_v28 = vrot.slane %v4521_v12, %v9810_v47  ;;  %v4551_v59 = vrot.slane %v4523_v44, %v9810_v47  ;;  %v4557_v0 = vcombine.low %v10904_v62, %v10947_v43  ;;  %v13282_v12 = vld [vmem:[#allocation32_spill] sm:$0xff] }
 0x120   : > { %v4239_v9 = vcombine.low %v4222_v53, %v4236_v42  ;;  %v4247_v8 = vrot.slane %v4237_v38, %v9810_v47  ;;  %v4261_v50 = vrot.slane %v4238_v51, %v9810_v47  ;;  %v4590_v30 = vcombine.low %v13274_v2, %v10953_v57 }
 0x121   : > { %v4518_v58 = vcombine.high %v4495_v7, %v4509_v60  ;;  %v4554_v22 = vcombine.low %v4537_v28, %v4551_v59  ;;  %v4572_v63 = vrot.slane %v4556_v39, %v9810_v47  ;;  %v4586_v5 = vrot.slane %v4558_v31, %v9810_v47 }
 0x122   : > { %v4254_v10 = vrot.slane %v4239_v9, %v9810_v47  ;;  %v4269_v25 = vcombine.high %v4247_v8, %v4247_v8  ;;  %v4271_v11 = vcombine.high %v4261_v50, %v4261_v50  ;;  %v4287_v51 = vrot.slane %v723_v13, %v9810_v47  ;;  %v13285_v9 = vld [vmem:[#allocation36_spill] sm:$0xff] }
 0x123   : > { %9043 = vmatmul.mubr.bf16.gmra.mrb[52].mxu1 %v3769_v1  ;;  %v4544_v1 = vrot.slane %v4522_v46, %v9810_v47  ;;  %v13284_v46 = vld [vmem:[#allocation33_spill] sm:$0xff]  ;;  %v4589_v59 = vcombine.low %v4572_v63, %v4586_v5  ;;  %v4591_v17 = vcombine.high %v13274_v2, %v10953_v57 }
 0x124   : > { %9062 = vmatprep.mubr.bf16.mxu1 %v4378_v52  ;;  %v687_v52 = vor.u32 %v685_v23, %v683_v3  ;;  %v11486_v3 = vrot.slane %v4557_v0, %v9810_v47  ;;  %v4270_v43 = vcombine.high %v4254_v10, %v4254_v10 }
 0x125   : > { %5047 = vmatmul.mubr.bf16.gmra.mrb[76].mxu0 %v4447_v61  ;;  %v4240_v61 = vcombine.high %v4222_v53, %v4236_v42  ;;  %v4553_v19 = vcombine.high %v11462_v35, %v4544_v1  ;;  %v4552_v29 = vcombine.low %v11462_v35, %v4544_v1  ;;  %v13278_v53 = vld [vmem:[#allocation24_spill] sm:$0xff]  ;;  %v13279_v42 = vld [vmem:[#allocation25_spill] sm:$0xff]  ;;  %v4729_v35 = vcombine.low %v4271_v11, %v4254_v10 }
 0x126   : > { %5054 = vmatprep.mubr.bf16.mxu0 %v4484_v45  ;;  %v4517_v45 = vcombine.low %v4495_v7, %v4509_v60  ;;  %v8064_v26 = vcombine.low %v11390_v16, %v687_v52  ;;  %v4625_v21 = vcombine.low %v13278_v53, %v13277_v34  ;;  %v4588_v16 = vcombine.high %v11483_v49, %v11486_v3  ;;  %v13283_v60 = vld [vmem:[#allocation35_spill] sm:$0xff] }
 0x127   : > { %v4268_v62 = vrot.slane %v4240_v61, %v9810_v47  ;;  %v4662_v23 = vcombine.low %v13284_v46, %v13283_v60  ;;  %v4607_v31 = vrot.slane %v4591_v17, %v9810_v47 }
 0x128   : > { %v8430_v20 = vpop.f32.mrb[8].mxu0  ;;  %v4280_v38 = vrot.slane %v8064_v26, %v9810_v47  ;;  %v11520_v0 = vrot.slane %v4625_v21, %v9810_v47 }
 0x129   : > { %v8431_v56 = vpop.f32.mrb[9].mxu0  ;;  %v4730_v37 = vcombine.low %v4268_v62, %v4270_v43  ;;  %v4684_v52 = vrot.slane %v4662_v23, %v9810_v47 }
 0x12a   : > { %v8433_v48 = vpop.f32.mrb[10].mxu0  ;;  %v11470_v27 = vadd.f32 %v8431_v56, %v8430_v20  ;;  %v8114_v20 = vcombine.high %v13284_v46, %v13283_v60  ;;  %v4727_v56 = vcombine.low %v13285_v9, %v4247_v8  ;;  %v4288_v8 = vcombine.low %v4280_v38, %v4287_v51 }
 0x12b   : > { %9063 = vmatmul.mubr.bf16.vlgmr.msra.gmra.mrb[0].mxu1 %v4413_v24  ;;  %v8434_v55 = vpop.f32.mrb[11].mxu0  ;;  %v13276_v24 = vld [vmem:[#allocation21_spill] sm:$0xff]  ;;  %v4758_v57 = vrot.slane %v4730_v37, %v9810_v47 }
 0x12c   : > { %9066 = vmatprep.mubr.bf16.mxu1 %v4448_v18  ;;  %v11473_v15 = vadd.f32 %v8434_v55, %v8433_v48  ;;  %v4592_v18 = vcombine.low %v13276_v24, %v13275_v4  ;;  %v4600_v48 = vrot.slane %v4590_v30, %v9810_v47  ;;  %v4593_v13 = vcombine.high %v13276_v24, %v13275_v4 }
 0x12d   : > { %5055 = vmatmul.mubr.bf16.gmra.mrb[80].mxu0 %v4482_v14  ;;  %v13280_v14 = vld [vmem:[#allocation22_spill] sm:$0xff]  ;;  %v4691_v61 = vrot.slane %v8114_v20, %v9810_v47  ;;  %v4737_v10 = vrot.slane %v4727_v56, %v9810_v47  ;;  %v4272_v30 = vcombine.high %v4268_v62, %v4268_v62  ;;  %v4295_v26 = vrot.slane %v4288_v8, %v9810_v47 }
 0x12e   : > { %5062 = vmatprep.mubr.bf16.mxu0 %v4519_v41  ;;  %v4627_v6 = vcombine.low %v13280_v14, %v13279_v42  ;;  %v13281_v41 = vld [vmem:[#allocation34_spill] sm:$0xff]  ;;  %v4614_v28 = vrot.slane %v4592_v18, %v9810_v47  ;;  %v4587_v4 = vcombine.low %v11483_v49, %v11486_v3  ;;  %v4626_v24 = vcombine.high %v13278_v53, %v13277_v34 }
 0x12f   : > { %v4660_v44 = vcombine.low %v13282_v12, %v13281_v41  ;;  %v8113_v7 = vcombine.high %v13282_v12, %v13281_v41  ;;  %v4694_v2 = vcombine.low %v4684_v52, %v4691_v61  ;;  %v4628_v18 = vcombine.high %v13280_v14, %v13279_v42 }
 0x130   : > { %v11523_v55 = vrot.slane %v4627_v6, %v9810_v47  ;;  %v4623_v39 = vcombine.high %v4600_v48, %v4614_v28  ;;  %v4794_v5 = vcombine.low %v4272_v30, %v4295_v26  ;;  %v4642_v3 = vrot.slane %v4626_v24, %v9810_v47  ;;  %v9521_v24 = vld [vmem:[%s13080_s4 + $0x108] sm:$0xff]  }
 0x131   : > { %v4677_v1 = vrot.slane %v8113_v7, %v9810_v47  ;;  %v4716_v63 = vrot.slane %v4694_v2, %v9810_v47  ;;  %v4656_v34 = vrot.slane %v4628_v18, %v9810_v47  ;;  %v4622_v60 = vcombine.low %v4600_v48, %v4614_v28  ;;  %v9519_v2 = vld [vmem:[%s13080_s4 + $0x100] sm:$0xff]   ;;  %v9523_v18 = vld [vmem:[%s13080_s4 + $0xc8] sm:$0xff]  }
 0x132   : > { %v4801_v41 = vrot.slane %v4794_v5, %v9810_v47  ;;  %v4695_v20 = vcombine.high %v4684_v52, %v4691_v61  ;;  %8726 = vmatprep.subr.bf16.mxu0 %v9519_v2 }
 0x133   : > { %9067 = vmatmul.mubr.bf16.gmra.mrb[4].mxu1 %v4483_v33  ;;  %v4728_v33 = vcombine.low %v4261_v50, %v4269_v25  ;;  %v4658_v25 = vcombine.high %v11520_v0, %v11523_v55  ;;  %v4659_v46 = vcombine.low %v4642_v3, %v4656_v34 }
 0x134   : > { %9070 = vmatprep.mubr.bf16.mxu1 %v4518_v58  ;;  %v4670_v58 = vrot.slane %v4660_v44, %v9810_v47  ;;  %v4809_v38 = vrot.slane %v4801_v41, %v9810_v47  ;;  %v4723_v9 = vrot.slane %v4695_v20, %v9810_v47  ;;  %v9530_v20 = vld [vmem:[%s13080_s4 + $0x158] sm:$0xff]  }
 0x135   : > { %5063 = vmatmul.mubr.bf16.gmra.mrb[84].mxu0 %v4517_v45  ;;  %v4744_v50 = vrot.slane %v4728_v33, %v9810_v47  ;;  %v4751_v45 = vrot.slane %v4729_v35, %v9810_v47  ;;  %v4657_v33 = vcombine.low %v11520_v0, %v11523_v55 }
 0x136   : > { %5070 = vmatprep.mubr.bf16.mxu0 %v4554_v22  ;;  %v4621_v22 = vrot.slane %v4593_v13, %v9810_v47  ;;  %v4693_v23 = vcombine.high %v4670_v58, %v4677_v1  ;;  %v4817_v56 = vcombine.high %v4809_v38, %v4809_v38  ;;  %v4802_v13 = vcombine.high %v4801_v41, %v4801_v41 }
 0x137   : > { %v4759_v43 = vcombine.low %v4737_v10, %v4744_v50  ;;  %v4761_v11 = vcombine.low %v4751_v45, %v4758_v57  ;;  %v4760_v37 = vcombine.high %v4737_v10, %v4744_v50  ;;  %v4762_v48 = vcombine.high %v4751_v45, %v4758_v57 }
 0x138   : > { %v4709_v51 = vrot.slane %v4693_v23, %v9810_v47  ;;  %v4816_v55 = vrot.slane %v4802_v13, %v9810_v47  ;;  %v9529_v23 = vld [vmem:[%s13080_s4 + $0xd8] sm:$0xff]  }
 0x139   : > { %v4769_v21 = vrot.slane %v4759_v43, %v9810_v47  ;;  %v4776_v28 = vrot.slane %v4760_v37, %v9810_v47 }
 0x13a   : > { %v4726_v35 = vcombine.low %v4709_v51, %v4723_v9 }
 0x13b   : > { %9071 = vmatmul.mubr.bf16.gmra.mrb[8].mxu1 %v4553_v19  ;;  %v4692_v19 = vcombine.low %v4670_v58, %v4677_v1 }
 0x13c   : > { %9074 = vmatprep.mubr.bf16.mxu1 %v4588_v16  ;;  %v4783_v16 = vrot.slane %v4761_v11, %v9810_v47  ;;  %v9522_v11 = vld [vmem:[%s13080_s4 + $0x140] sm:$0xff]  }
 0x13d   : > { %5071 = vmatmul.mubr.bf16.gmra.mrb[88].mxu0 %v4552_v29  ;;  %v4624_v29 = vcombine.low %v4607_v31, %v4621_v22  ;;  %v4702_v62 = vrot.slane %v4692_v19, %v9810_v47  ;;  %9086 = vmatprep.subr.bf16.mxu1 %v9522_v11 }
 0x13e   : > { %5078 = vmatprep.mubr.bf16.mxu0 %v4589_v59  ;;  %v4792_v44 = vcombine.high %v4769_v21, %v4783_v16  ;;  %v4790_v59 = vrot.slane %v4762_v48, %v9810_v47  ;;  %v4791_v61 = vcombine.low %v4769_v21, %v4783_v16  ;;  %v9520_v47 = vld [vmem:[%s13080_s4 + $0xc0] sm:$0xff]   ;;  %9087 = vmatpush3.bf16.msra.mxu1 %v9522_v11  ;;  %v9537_v11 = vld [vmem:[%s13080_s4 + $0x130] sm:$0xff]  }
 0x13f   : > { %v4725_v14 = vcombine.high %v4702_v62, %v4716_v63  ;;  %v4724_v58 = vcombine.low %v4702_v62, %v4716_v63  ;;  %8727 = vmatpush3.bf16.msra.mxu0 %v9520_v47  ;;  %v9524_v62 = vld [vmem:[%s13080_s4 + $0x148] sm:$0xff]  }
 0x140   : > { %v8436_v6 = vpop.f32.mrb[12].mxu0  ;;  %v4793_v17 = vcombine.low %v4776_v28, %v4790_v59  ;;  %8728 = vmatprep.subr.bf16.mxu0 %v9521_v24  ;;  %9088 = vmatprep.subr.bf16.mxu1 %v9524_v62 }
 0x141   : > { %v8437_v49 = vpop.f32.mrb[13].mxu0 }
 0x142   : > { %v11554_v53 = vadd.f32 %v8437_v49, %v8436_v6  ;;  %v8439_v42 = vpop.f32.mrb[14].mxu0  ;;  %9089 = vmatpush3.bf16.msra.mxu1 %v9524_v62  ;;  %v9539_v62 = vld [vmem:[%s13080_s4 + $0x170] sm:$0xff]  }
 0x143   : > { %9075 = vmatmul.mubr.bf16.gmra.mrb[12].mxu1 %v4623_v39  ;;  %v8440_v12 = vpop.f32.mrb[15].mxu0  ;;  %8729 = vmatpush3.bf16.msra.mxu0 %v9523_v18  ;;  %v9538_v18 = vld [vmem:[%s13080_s4 + $0xf0] sm:$0xff]  }
 0x144   : > { %9078 = vmatprep.mubr.bf16.mxu1 %v4658_v25  ;;  %v11557_v7 = vadd.f32 %v8440_v12, %v8439_v42  ;;  %v9525_v42 = vld [vmem:[%s13080_s4 + $0x110] sm:$0xff]  }
 0x145   : > { %5079 = vmatmul.mubr.bf16.gmra.mrb[92].mxu0 %v4587_v4  ;;  %v9526_v12 = vld [vmem:[%s13080_s4 + $0xd0] sm:$0xff]   ;;  %8730 = vmatprep.subr.bf16.mxu0 %v9525_v42 }
 0x146   : > { %5086 = vmatprep.mubr.bf16.mxu0 %v4624_v29 }
 0x147   : > { %8731 = vmatpush3.bf16.msra.mxu0 %v9526_v12 }
 0x14b   : > { %9079 = vmatmul.mubr.bf16.gmra.mrb[16].mxu1 %v4725_v14 }
 0x14c   : > { %9082 = vmatprep.mubr.bf16.mxu1 %v4792_v44  ;;  %v9527_v44 = vld [vmem:[%s13080_s4 + $0x150] sm:$0xff]  }
 0x14d   : > { %5087 = vmatmul.mubr.bf16.gmra.mrb[96].mxu0 %v4622_v60  ;;  %9090 = vmatprep.subr.bf16.mxu1 %v9527_v44  ;;  %v9528_v60 = vld [vmem:[%s13080_s4 + $0x118] sm:$0xff]  }
 0x14e   : > { %5094 = vmatprep.mubr.bf16.mxu0 %v4659_v46  ;;  %9091 = vmatpush3.bf16.msra.mxu1 %v9527_v44 }
 0x14f   : > { %8732 = vmatprep.subr.bf16.mxu0 %v9528_v60  ;;  %9092 = vmatprep.subr.bf16.mxu1 %v9530_v20 }
 0x150   : > { %8733 = vmatpush3.bf16.msra.mxu0 %v9529_v23 }
 0x152   : > { %9093 = vmatpush3.bf16.msra.mxu1 %v9530_v20 }
 0x153   : > { %9083 = vmatmul.mubr.bf16.gmra.mrb[56].mxu1 %v4817_v56 }
 0x155   : > { %5095 = vmatmul.mubr.bf16.gmra.mrb[100].mxu0 %v4657_v33 }
 0x156   : > { %5102 = vmatprep.mubr.bf16.mxu0 %v4726_v35 }
 0x15b   : > { %v8442_v1 = vpop.f32.mrb[16].mxu0 }
 0x15c   : > { %v8443_v52 = vpop.f32.mrb[17].mxu0 }
 0x15d   : > { %5103 = vmatmul.mubr.bf16.gmra.mrb[104].mxu0 %v4724_v58  ;;  %v11566_v8 = vadd.f32 %v8443_v52, %v8442_v1  ;;  %v8445_v0 = vpop.f32.mrb[18].mxu0  ;;  %v9531_v58 = vld [vmem:[%s13080_s4 + $0x120] sm:$0xff]  }
 0x15e   : > { %5110 = vmatprep.mubr.bf16.mxu0 %v4793_v17  ;;  %v8446_v10 = vpop.f32.mrb[19].mxu0  ;;  %v9532_v1 = vld [vmem:[%s13080_s4 + $0xe0] sm:$0xff]   ;;  %8734 = vmatprep.subr.bf16.mxu0 %v9531_v58 }
 0x15f   : > { %v11569_v50 = vadd.f32 %v8446_v10, %v8445_v0  ;;  %v9533_v52 = vld [vmem:[%s13080_s4 + $0x160] sm:$0xff]   ;;  %8735 = vmatpush3.bf16.msra.mxu0 %v9532_v1 }
 0x160   : > { %9094 = vmatprep.subr.bf16.mxu1 %v9533_v52 }
 0x161   : > { %9095 = vmatpush3.bf16.msra.mxu1 %v9533_v52 }
 0x165   : > { %5111 = vmatmul.mubr.bf16.gmra.mrb[108].mxu0 %v4791_v61 }
 0x166   : > { %5118 = vmatprep.mubr.bf16.mxu0 %v4816_v55  ;;  %v9534_v55 = vld [vmem:[%s13080_s4 + $0x128] sm:$0xff]  }
 0x167   : > { %8736 = vmatprep.subr.bf16.mxu0 %v9534_v55 }
 0x16d   : > { %5119 = vmatmul.mubr.bf16.gmra.mrb[112].mxu0 %v4809_v38 }
 0x170   : > { %v8448_v45 = vpop.f32.mrb[20].mxu0 }
 0x171   : > { %v8449_v57 = vpop.f32.mrb[21].mxu0 }
 0x172   : > { %v8450_v39 = vadd.f32 %v8449_v57, %v8448_v45  ;;  %v8451_v31 = vpop.f32.mrb[22].mxu0  ;;  %v9535_v57 = vld [vmem:[%s13080_s4 + $0xe8] sm:$0xff]  }
 0x173   : > { %v8452_v22 = vpop.f32.mrb[23].mxu0  ;;  %8737 = vmatpush3.bf16.msra.mxu0 %v9535_v57 }
 0x174   : > { %v8453_v19 = vadd.f32 %v8452_v22, %v8451_v31  ;;  %8738 = vmatprep.subr.bf16.mxu0 %v9537_v11 }
 0x177   : > { %8739 = vmatpush3.bf16.msra.mxu0 %v9538_v18 }
 0x17c   : > { %v8454_v30 = vpop.f32.mrb[24].mxu0 }
 0x17d   : > { %v8455_v26 = vpop.f32.mrb[25].mxu0 }
 0x17e   : > { %v11577_v25 = vadd.f32 %v8455_v26, %v8454_v30  ;;  %v8457_v43 = vpop.f32.mrb[26].mxu0 }
 0x17f   : > { %v8458_v4 = vpop.f32.mrb[27].mxu0 }
 0x180   : > { %v11582_v29 = vadd.f32 %v8458_v4, %v8457_v43 }
 0x18b   : > { %v8460_v63 = vpop.f32.mrb[28].mxu0 }
 0x18c   : > { %v11593_v5 = vpop.f32.mrb[20].mxu1  ;;  %v8461_v21 = vpop.f32.mrb[29].mxu0 }
 0x18d   : > { %v11595_v16 = vpop.f32.mrb[21].mxu1  ;;  %v11597_v6 = vadd.f32 %v8461_v21, %v8460_v63  ;;  %v8463_v49 = vpop.f32.mrb[30].mxu0 }
 0x18e   : > { %v9005_v3 = vpop.f32.mrb[22].mxu1  ;;  %v8464_v34 = vpop.f32.mrb[31].mxu0 }
 0x18f   : > { %v11602_v14 = vpop.f32.mrb[23].mxu1  ;;  %v11604_v41 = vadd.f32 %v8464_v34, %v8463_v49 }
 0x193   : > { %v8466_v46 = vpop.f32.mrb[32].mxu0 }
 0x194   : > { %v8556_v38 = vpop.f32.mrb[24].mxu1  ;;  %v8467_v51 = vpop.f32.mrb[33].mxu0 }
 0x195   : > { %v8557_v9 = vpop.f32.mrb[25].mxu1  ;;  %v11621_v56 = vadd.f32 %v8467_v51, %v8466_v46  ;;  %v8469_v33 = vpop.f32.mrb[34].mxu0 }
 0x196   : > { %v8558_v35 = vadd.f32 %v8557_v9, %v8556_v38  ;;  %v8559_v37 = vpop.f32.mrb[26].mxu1  ;;  %v8470_v48 = vpop.f32.mrb[35].mxu0 }
 0x197   : > { %v8560_v28 = vpop.f32.mrb[27].mxu1  ;;  %v11623_v59 = vadd.f32 %v8470_v48, %v8469_v33 }
 0x198   : > { %v11628_v17 = vadd.f32 %v8558_v35, %v8450_v39  ;;  %v8561_v13 = vadd.f32 %v8560_v28, %v8559_v37  ;;  %v9536_v39 = vld [vmem:[%s13080_s4 + $0x168] sm:$0xff]  }
 0x199   : > { %9096 = vmatprep.subr.bf16.mxu1 %v9536_v39 }
 0x19a   : > { %v11636_v61 = vadd.f32 %v8561_v13, %v8453_v19  ;;  %9097 = vmatpush3.bf16.msra.mxu1 %v9536_v39 }
 0x19b   : > { %v8472_v0 = vpop.f32.mrb[36].mxu0  ;;  %9098 = vmatprep.subr.bf16.mxu1 %v9539_v62 }
 0x19c   : > { %v8562_v10 = vpop.f32.mrb[28].mxu1  ;;  %v8473_v45 = vpop.f32.mrb[37].mxu0 }
 0x19d   : > { %v8563_v31 = vpop.f32.mrb[29].mxu1  ;;  %v11647_v22 = vadd.f32 %v8473_v45, %v8472_v0  ;;  %v8475_v19 = vpop.f32.mrb[38].mxu0 }
 0x19e   : > { %v8564_v2 = vadd.f32 %v8563_v31, %v8562_v10  ;;  %v8565_v47 = vpop.f32.mrb[30].mxu1  ;;  %v8476_v30 = vpop.f32.mrb[39].mxu0  ;;  %9099 = vmatpush3.bf16.msra.mxu1 %v9539_v62 }
 0x19f   : > { %v8566_v26 = vpop.f32.mrb[31].mxu1  ;;  %v8477_v43 = vadd.f32 %v8476_v30, %v8475_v19 }
 0x1a0   : > { %v11653_v4 = vadd.f32 %v8564_v2, %v11577_v25  ;;  %v8567_v24 = vadd.f32 %v8566_v26, %v8565_v47 }
 0x1a2   : > { %v11662_v63 = vadd.f32 %v8567_v24, %v11582_v29 }
 0x1a3   : > { %v8478_v21 = vpop.f32.mrb[40].mxu0 }
 0x1a4   : > { %v8568_v49 = vpop.f32.mrb[32].mxu1  ;;  %v8479_v25 = vpop.f32.mrb[41].mxu0 }
 0x1a5   : > { %v8569_v3 = vpop.f32.mrb[33].mxu1  ;;  %v8480_v34 = vadd.f32 %v8479_v25, %v8478_v21  ;;  %v8481_v42 = vpop.f32.mrb[42].mxu0 }
 0x1a6   : > { %v8570_v12 = vadd.f32 %v8569_v3, %v8568_v49  ;;  %v8571_v44 = vpop.f32.mrb[34].mxu1  ;;  %v8482_v60 = vpop.f32.mrb[43].mxu0 }
 0x1a7   : > { %v8572_v46 = vpop.f32.mrb[35].mxu1  ;;  %v2996_v23 = vadd.f32 %v8480_v34, %v11595_v16  ;;  %v8483_v20 = vadd.f32 %v8482_v60, %v8481_v42  ;;  %v9540_v16 = vld [vmem:[%s13080_s4 + $0x138] sm:$0xff]  }
 0x1a8   : > { %v11666_v38 = vadd.f32 %v8570_v12, %v11597_v6  ;;  %v8573_v29 = vadd.f32 %v8572_v46, %v8571_v44  ;;  %8740 = vmatprep.subr.bf16.mxu0 %v9540_v16 }
 0x1a9   : > { %v2999_v51 = vadd.f32 %v8483_v20, %v11602_v14  ;;  %v9541_v14 = vld [vmem:[%s13080_s4 + $0xf8] sm:$0xff]  }
 0x1aa   : > { %v11670_v9 = vadd.f32 %v8573_v29, %v11604_v41  ;;  %v9542_v41 = vld [vmem:[%s13080_s4 + $0x178] sm:$0xff]   ;;  %8741 = vmatpush3.bf16.msra.mxu0 %v9541_v14 }
 0x1ab   : > { %v8484_v33 = vpop.f32.mrb[44].mxu0  ;;  %9100 = vmatprep.subr.bf16.mxu1 %v9542_v41 }
 0x1ac   : > { %v8574_v35 = vpop.f32.mrb[36].mxu1  ;;  %v8485_v37 = vpop.f32.mrb[45].mxu0  ;;  %9101 = vmatpush3.bf16.msra.mxu1 %v9542_v41 }
 0x1ad   : > { %v8575_v48 = vpop.f32.mrb[37].mxu1  ;;  %v8486_v28 = vadd.f32 %v8485_v37, %v8484_v33  ;;  %v8487_v58 = vpop.f32.mrb[46].mxu0 }
 0x1ae   : > { %v8576_v13 = vadd.f32 %v8575_v48, %v8574_v35  ;;  %v8577_v1 = vpop.f32.mrb[38].mxu1  ;;  %v8488_v6 = vpop.f32.mrb[47].mxu0 }
 0x1af   : > { %v8578_v52 = vpop.f32.mrb[39].mxu1  ;;  %v3004_v0 = vadd.f32 %v11593_v5, %v8486_v28 }
 0x1b0   : > { %v11683_v55 = vadd.f32 %v8576_v13, %v11621_v56  ;;  %v8579_v10 = vadd.f32 %v8578_v52, %v8577_v1 }
 0x1b2   : > { %v11686_v45 = vadd.f32 %v8579_v10, %v11623_v59 }
 0x1b5   : > { %v8580_v5 = vpop.f32.mrb[40].mxu1 }
 0x1b6   : > { %v8581_v57 = vpop.f32.mrb[41].mxu1 }
 0x1b7   : > { %v8582_v39 = vadd.f32 %v8581_v57, %v8580_v5  ;;  %v8583_v31 = vpop.f32.mrb[42].mxu1 }
 0x1b8   : > { %v8584_v19 = vpop.f32.mrb[43].mxu1 }
 0x1b9   : > { %v11689_v2 = vadd.f32 %v8582_v39, %v11647_v22  ;;  %v8585_v47 = vadd.f32 %v8584_v19, %v8583_v31  ;;  %v11712_v19 = vld [vmem:[%s13080_s4 + $0x80] sm:$0xff]  }
 0x1ba   : > { %9118 = vmatprep.subr.bf16.mxu1 %v11712_v19 }
 0x1bb   : > { %v11691_v30 = vadd.f32 %v8585_v47, %v8477_v43 }
 0x1bd   : > { %13286 = vst [vmem:[#allocation16_spill] sm:$0xff] %v11691_v30 }
 0x1be   : > { %v8586_v56 = vpop.f32.mrb[44].mxu1 }
 0x1bf   : > { %v8587_v26 = vpop.f32.mrb[45].mxu1  ;;  %v8526_v18 = vpop.f32.mrb[48].mxu0 }
 0x1c0   : > { %v8588_v11 = vadd.f32 %v8587_v26, %v8586_v56  ;;  %v8589_v24 = vpop.f32.mrb[46].mxu1  ;;  %v8527_v59 = vpop.f32.mrb[49].mxu0 }
 0x1c1   : > { %v8590_v62 = vpop.f32.mrb[47].mxu1  ;;  %v8528_v49 = vadd.f32 %v8527_v59, %v8526_v18  ;;  %v8529_v25 = vpop.f32.mrb[50].mxu0 }
 0x1c2   : > { %v8591_v21 = vadd.f32 %v8590_v62, %v8589_v24  ;;  %v11693_v3 = vadd.f32 %v8588_v11, %v2996_v23  ;;  %v8530_v34 = vpop.f32.mrb[51].mxu0 }
 0x1c3   : > { %v9201_v42 = vadd.f32 %v8528_v49, %v11396_v36  ;;  %v8531_v22 = vadd.f32 %v8530_v34, %v8529_v25 }
 0x1c4   : > { %v11696_v12 = vadd.f32 %v8591_v21, %v2999_v51 }
 0x1c5   : > { %v9207_v44 = vadd.f32 %v8531_v22, %v11398_v40 }
 0x1c6   : > { %v8592_v43 = vpop.f32.mrb[48].mxu1 }
 0x1c7   : > { %v8593_v60 = vpop.f32.mrb[49].mxu1  ;;  %v8532_v20 = vpop.f32.mrb[52].mxu0 }
 0x1c8   : > { %v8594_v46 = vadd.f32 %v8593_v60, %v8592_v43  ;;  %v8595_v29 = vpop.f32.mrb[50].mxu1  ;;  %v8533_v33 = vpop.f32.mrb[53].mxu0 }
 0x1c9   : > { %v8596_v35 = vpop.f32.mrb[51].mxu1  ;;  %v8534_v37 = vadd.f32 %v8533_v33, %v8532_v20  ;;  %v8535_v48 = vpop.f32.mrb[54].mxu0 }
 0x1ca   : > { %v4073_v28 = vadd.f32 %v8594_v46, %v3004_v0  ;;  %v8536_v23 = vpop.f32.mrb[55].mxu0 }
 0x1cb   : > { %v9198_v58 = vadd.f32 %v8534_v37, %v11410_v32  ;;  %v8537_v16 = vadd.f32 %v8536_v23, %v8535_v48  ;;  %v9634_v23 = vmov 1983009808  }
 0x1cd   : > { %v9204_v36 = vadd.f32 %v8537_v16, %v11417_v54  ;;  %v5355_v16 = vunpack.c.l.s4 %v9634_v23 }
 0x1d0   : > { %v8538_v51 = vpop.f32.mrb[56].mxu0 }
 0x1d1   : > { %v8539_v13 = vpop.f32.mrb[57].mxu0 }
 0x1d2   : > { %v8540_v1 = vadd.f32 %v8539_v13, %v8538_v51  ;;  %v8541_v6 = vpop.f32.mrb[58].mxu0 }
 0x1d3   : > { %v8542_v40 = vpop.f32.mrb[59].mxu0 }
 0x1d4   : > { %v9213_v52 = vadd.f32 %v8540_v1, %v11470_v27  ;;  %v8543_v14 = vadd.f32 %v8542_v40, %v8541_v6 }
 0x1d6   : > { %v9219_v41 = vadd.f32 %v8543_v14, %v11473_v15  ;;  %v5356_v14 = vunpack.c.0.s8 %v5355_v16 }
 0x1d8   : > { %v8544_v10 = vpop.f32.mrb[60].mxu0 }
 0x1d9   : > { %v8545_v5 = vpop.f32.mrb[61].mxu0 }
 0x1da   : > { %v8546_v57 = vadd.f32 %v8545_v5, %v8544_v10  ;;  %v8547_v0 = vpop.f32.mrb[62].mxu0 }
 0x1db   : > { %v8548_v39 = vpop.f32.mrb[63].mxu0 }
 0x1dc   : > { %v11704_v32 = vadd.f32 %v8546_v57, %v11554_v53  ;;  %v8549_v31 = vadd.f32 %v8548_v39, %v8547_v0  ;;  %v11742_v39 = vld [vmem:[%s13079_s3] ss:$0 sm:$0xff] }
 0x1de   : > { %v11707_v54 = vadd.f32 %v8549_v31, %v11557_v7  ;;  %v9545_v7 = vld [vmem:[%s13080_s4 + $0x40] sm:$0xff]  }
 0x1df   : > { %8806 = vmatprep.subr.bf16.mxu0 %v9545_v7 }
 0x1e0   : > { %v8550_v27 = vpop.f32.mrb[64].mxu0 }
 0x1e1   : > { %v8551_v15 = vpop.f32.mrb[65].mxu0 }
 0x1e2   : > { %v8552_v47 = vadd.f32 %v8551_v15, %v8550_v27  ;;  %v8553_v56 = vpop.f32.mrb[66].mxu0  ;;  %v13291_v15 = vld [vmem:[#allocation2_spill] sm:$0xff] }
 0x1e3   : > { %v8554_v26 = vpop.f32.mrb[67].mxu0  ;;  %vm13183_vm8 = vcmp.ge.s32.totalorder %v13291_v15, 1 }
 0x1e4   : > { %v11716_v11 = vadd.f32 %v8552_v47, %v11566_v8  ;;  %v8555_v53 = vadd.f32 %v8554_v26, %v8553_v56  ;;  %v11748_v47 = vsub.s32 %v5356_v14, %v13291_v15 }
 0x1e6   : > { %v11719_v24 = vadd.f32 %v8555_v53, %v11569_v50 }
 0x1e8   : > { %v8634_v18 = vpop.f32.mrb[68].mxu0 }
 0x1e9   : > { %v8635_v62 = vpop.f32.mrb[69].mxu0 }
 0x1ea   : > { %v8636_v59 = vadd.f32 %v8635_v62, %v8634_v18  ;;  %v8637_v21 = vpop.f32.mrb[70].mxu0  ;;  %v11753_v62 = vadd.s32 16, %v13291_v15 }
 0x1eb   : > { %v8638_v49 = vpop.f32.mrb[71].mxu0 }
 0x1ec   : > { %v8639_v25 = vadd.f32 %v8638_v49, %v8637_v21  ;;  %v9202_v34 = vadd.f32 %v9201_v42, %v8636_v59  ;;  %vm13184_vm4 = vcmp.le.s32.totalorder %v11753_v62, 16 }
 0x1ee   : > { %v9208_v22 = vadd.f32 %v9207_v44, %v8639_v25 }
 0x1f0   : > { %v8640_v43 = vpop.f32.mrb[72].mxu0 }
 0x1f1   : > { %v8641_v8 = vpop.f32.mrb[73].mxu0 }
 0x1f2   : > { %v8642_v60 = vadd.f32 %v8641_v8, %v8640_v43  ;;  %v8643_v46 = vpop.f32.mrb[74].mxu0 }
 0x1f3   : > { %v8644_v20 = vpop.f32.mrb[75].mxu0 }
 0x1f4   : > { %v8645_v50 = vadd.f32 %v8644_v20, %v8643_v46  ;;  %v9199_v29 = vadd.f32 %v9198_v58, %v8642_v60 }
 0x1f6   : > { %v9044_v33 = vpop.f32.mrb[52].mxu1  ;;  %v9205_v35 = vadd.f32 %v9204_v36, %v8645_v50  ;;  %v11733_v36 = vstv %s9705_s30  ;;  %s13442_s30 = smov (!%p366_p8, %s9705_s30), 15 }
 0x1f7   : > { %v11724_v37 = vadd.f32 %v9044_v33, %v4073_v28  ;;  %v4192_v48 = vpop.f32.mrb[53].mxu1  ;;  %13290 = vst [vmem:[#allocation31_spill] sm:$0xff] %v11733_v36  ;;  %v5741_v5 = vadd.s32 2, %v11733_v36  ;;  %v5743_v31 = vadd.s32 4, %v11733_v36  ;;  %v5745_v26 = vadd.s32 6, %v11733_v36  ;;  %s7898_s28 = sshll.u32 %s13442_s30, 1 }
 0x1f8   : > { %v11727_v51 = vadd.f32 %v4192_v48, %v11693_v3  ;;  %v9045_v42 = vpop.f32.mrb[54].mxu1  ;;  %v8646_v44 = vpop.f32.mrb[76].mxu0  ;;  %v5742_v3 = vadd.s32 3, %v11733_v36  ;;  %v5746_v60 = vadd.s32 7, %v11733_v36  ;;  %vm5759_vm5 = vcmp.ge.s32.totalorder %v11733_v36, 0  ;;  %s370_s11 = sadd.s32 %s7899_s19, %s7898_s28 }
 0x1f9   : > { %13287 = vst [vmem:[#allocation28_spill] sm:$0xff] %v11724_v37  ;;  %v4195_v13 = vpop.f32.mrb[55].mxu1  ;;  %v8647_v1 = vpop.f32.mrb[77].mxu0  ;;  %v11755_v59 = vadd.s32 4294967295, %v5741_v5  ;;  %vm5769_vm6 = vcmp.lt.s32.totalorder %v11733_v36, 16  ;;  %s7900_s9 = sshll.u32 %s370_s11, 3 }
 0x1fa   : > { %13288 = vst [vmem:[#allocation30_spill] sm:$0xff] %v11727_v51  ;;  %v11730_v6 = vadd.f32 %v4195_v13, %v11696_v12  ;;  %v8648_v40 = vadd.f32 %v8647_v1, %v8646_v44  ;;  %v8649_v58 = vpop.f32.mrb[78].mxu0  ;;  %v11761_v8 = vadd.s32 4294967295, %v5742_v3  ;;  %v11777_v14 = vadd.s32 4294967295, %v5746_v60  ;;  %vm11884_vm10 = vmand %vm5759_vm5, %vm5769_vm6  ;;  %s13015_s7 = scalar_lea.vmem %s13082_s6, %s7900_s9 }
 0x1fb   : > { %v8650_v10 = vpop.f32.mrb[79].mxu0  ;;  %vm5760_vm2 = vcmp.ge.s32.totalorder %v11755_v59, 0  ;;  %vm5770_vm3 = vcmp.lt.s32.totalorder %v11755_v59, 16  ;;  %vm11907_vm11 = vmand %vm11884_vm10, %vm13183_vm8 }
 0x1fc   : > { %13289 = vst [vmem:[#allocation29_spill] sm:$0xff] %v11730_v6  ;;  %v8651_v28 = vadd.f32 %v8650_v10, %v8649_v58  ;;  %v11736_v57 = vadd.f32 %v9213_v52, %v8648_v40  ;;  %v5744_v52 = vadd.s32 5, %v11733_v36  ;;  %13295 = vst [vmem:[#allocation6_spill] sm:$0xff] %v11777_v14  ;;  %vm5761_vm14 = vcmp.ge.s32.totalorder %v11761_v8, 0 }
 0x1fd   : > { %vm11829_vm7 = vmand %vm5760_vm2, %vm5770_vm3  ;;  %vm5771_vm15 = vcmp.lt.s32.totalorder %v11761_v8, 16 }
 0x1fe   : > { %v9064_v0 = vpop.f32.mrb[0].mxu1  ;;  %v11744_v12 = vadd.f32 %v9219_v41, %v8651_v28  ;;  %v11758_v41 = vadd.s32 4294967295, %v11733_v36  ;;  %v11768_v16 = vadd.s32 4294967295, %v5744_v52  ;;  %v5747_v52 = vadd.s32 8, %v11733_v36  ;;  %vm5832_vm9 = vmand %vm11829_vm7, %vm13184_vm4 }
 0x1ff   : > { %v9200_v27 = vadd.f32 %v9199_v29, %v9064_v0  ;;  %v5160_v56 = vpop.f32.mrb[1].mxu1  ;;  %v11765_v29 = vadd.s32 4294967295, %v5743_v31  ;;  %vm11934_vm12 = vmand %vm11829_vm7, %vm13183_vm8 }
 0x200   : > { %v9203_v53 = vadd.f32 %v9202_v34, %v5160_v56  ;;  %v9065_v7 = vpop.f32.mrb[2].mxu1  ;;  %v8652_v18 = vpop.f32.mrb[80].mxu0  ;;  %13292 = vst [vmem:[#allocation27_spill] sm:$0xff] %v11758_v41  ;;  %vm5829_vm13 = vmand %vm11884_vm10, %vm13184_vm4 }
 0x201   : > { %v5286_v21 = vadd.f32 %v9200_v27, %v11742_v39  ;;  %v9206_v49 = vadd.f32 %v9205_v35, %v9065_v7  ;;  %v5163_v25 = vpop.f32.mrb[3].mxu1  ;;  %v8653_v43 = vpop.f32.mrb[81].mxu0  ;;  %v11770_v35 = vadd.s32 4294967295, %v5745_v26  ;;  %vm13181_vm2 = vmpackc.low %vm11884_vm10, %vm11907_vm11  ;;  %vm5762_vm3 = vcmp.ge.s32.totalorder %v11765_v29, 0 }
 0x202   : > { %v5284_v34 = vadd.f32 %v9203_v53, %v11742_v39  ;;  %v9209_v46 = vadd.f32 %v9208_v22, %v5163_v25  ;;  %v8654_v20 = vadd.f32 %v8653_v43, %v8652_v18  ;;  %v8655_v50 = vpop.f32.mrb[82].mxu0  ;;  %vm5772_vm5 = vcmp.lt.s32.totalorder %v11765_v29, 16  ;;  %vm12094_vm6 = vmand %vm5761_vm14, %vm5771_vm15  ;;  %v9555_v29 = vld [vmem:[%s13080_s4 + $0x18] sm:$0xff]  }
 0x203   : > { %v5309_v33 = vmax.f32 %v5286_v21, 0.0  ;;  %v5287_v48 = vadd.f32 %v9206_v49, %v11742_v39  ;;  %v8656_v23 = vpop.f32.mrb[83].mxu0  ;;  %13293 = vst [vmem:[#allocation4_spill] sm:$0xff] %v11770_v35  ;;  %vm12179_vm14 = vmpackc.low %vm11829_vm7, %vm11934_vm12  ;;  %vm5773_vm15 = vcmp.lt.s32.totalorder %v11768_v16, 16 }
 0x204   : > { %v5307_v42 = vmax.f32 %v5284_v34, 0.0  ;;  %v5285_v44 = vadd.f32 %v9209_v46, %v11742_v39  ;;  %v9211_v13 = vadd.f32 %v11704_v32, %v8654_v20  ;;  %v8657_v1 = vadd.f32 %v8656_v23, %v8655_v50 }
 0x205   : > { %v5387_v40 = vcombine.high %v5309_v33, %v5309_v33  ;;  %v11775_v22 = vrot.slane %v5309_v33, %v11748_v47  ;;  %v5310_v58 = vmax.f32 %v5287_v48, 0.0 }
 0x206   : > { %v5353_v10 = vcombine.high %v5307_v42, %v5307_v42  ;;  %v5360_v28 = vrot.slane %v5307_v42, %v11748_v47  ;;  %v5308_v5 = vmax.f32 %v5285_v44, 0.0  ;;  %v9068_v3 = vpop.f32.mrb[4].mxu1  ;;  %v9217_v0 = vadd.f32 %v11707_v54, %v8657_v1 }
 0x207   : > { %13294 = vst [vmem:[#allocation5_spill] sm:$0xff] %v11775_v22  ;;  %v5401_v32 = vrot.slane %v5387_v40, %v11748_v47  ;;  %v5402_v31 = vcombine.high %v11775_v22, %v11775_v22  ;;  %v5404_v27 = vcombine.high %v5310_v58, %v5310_v58  ;;  %v5176_v56 = vpop.f32.mrb[5].mxu1  ;;  %v5411_v7 = vrot.slane %v5310_v58, %v11748_v47 }
 0x208   : > { %v5367_v26 = vrot.slane %v5353_v10, %v11748_v47  ;;  %v5368_v53 = vcombine.high %v5360_v28, %v5360_v28  ;;  %v5370_v18 = vcombine.high %v5308_v5, %v5308_v5  ;;  %v9069_v21 = vpop.f32.mrb[6].mxu1  ;;  %v8658_v49 = vpop.f32.mrb[84].mxu0  ;;  %v5377_v60 = vrot.slane %v5308_v5, %v11748_v47 }
 0x209   : > { %v5895_v25 = vcombine.low %v5402_v31, %v5401_v32  ;;  %v5403_v43 = vcombine.high %v5401_v32, %v5401_v32  ;;  %v11790_v54 = vrot.slane %v5404_v27, %v11748_v47  ;;  %v5179_v34 = vpop.f32.mrb[7].mxu1  ;;  %v8659_v46 = vpop.f32.mrb[85].mxu0  ;;  %v5419_v33 = vcombine.high %v5411_v7, %v5411_v7 }
 0x20a   : > { %v5369_v20 = vcombine.high %v5367_v26, %v5367_v26  ;;  %v5854_v50 = vcombine.low %v5360_v28, %v5368_v53  ;;  %v5384_v48 = vrot.slane %v5370_v18, %v11748_v47  ;;  %v8661_v23 = vpop.f32.mrb[86].mxu0  ;;  %v5385_v44 = vcombine.high %v5377_v60, %v5377_v60 }
 0x20b   : > { %v5896_v42 = vcombine.low %v5403_v43, %v5411_v7  ;;  %v9212_v1 = vadd.f32 %v9211_v13, %v9068_v3  ;;  %v8662_v40 = vpop.f32.mrb[87].mxu0  ;;  %v11795_v58 = vadd.s32 4294967295, %v5747_v52  ;;  %v5903_v10 = vrot.slane %v5895_v25, %v11748_v47 }
 0x20c   : > { %v5855_v32 = vcombine.low %v5367_v26, %v5369_v20  ;;  %v5862_v5 = vrot.slane %v5854_v50, %v11748_v47  ;;  %v5386_v31 = vcombine.high %v5384_v48, %v5384_v48  ;;  %v5871_v27 = vcombine.low %v5377_v60, %v5385_v44 }
 0x20d   : > { %13296 = vst [vmem:[#allocation7_spill] sm:$0xff] %v11795_v58  ;;  %v5910_v28 = vrot.slane %v5896_v42, %v11748_v47  ;;  %v5290_v53 = vadd.f32 %v9212_v1, %v11742_v39  ;;  %v9215_v7 = vadd.f32 %v11736_v57, %v5176_v56  ;;  %v11804_v3 = vcombine.low %v5419_v33, %v11790_v54 }
 0x20e   : > { %v5869_v13 = vrot.slane %v5855_v32, %v11748_v47  ;;  %v5872_v52 = vcombine.low %v5384_v48, %v5386_v31  ;;  %v5420_v18 = vcombine.high %v11790_v54, %v11790_v54  ;;  %v11808_v26 = vpop.f32.mrb[8].mxu1  ;;  %v5879_v43 = vrot.slane %v5871_v27, %v11748_v47 }
 0x20f   : > { %v11810_v25 = vcombine.low %v5903_v10, %v5910_v28  ;;  %v5313_v60 = vmax.f32 %v5290_v53, 0.0  ;;  %v5288_v20 = vadd.f32 %v9215_v7, %v11742_v39  ;;  %v5192_v50 = vpop.f32.mrb[9].mxu1  ;;  %v9218_v33 = vadd.f32 %v9217_v0, %v9069_v21  ;;  %v9552_v10 = vld [vmem:[%s13080_s4 + $0x10] sm:$0xff]  }
 0x210   : > { %v11816_v57 = vcombine.low %v5862_v5, %v5869_v13  ;;  %v5886_v56 = vrot.slane %v5872_v52, %v11748_v47  ;;  %v9221_v54 = vadd.f32 %v11744_v12, %v5179_v34  ;;  %v11820_v48 = vpop.f32.mrb[10].mxu1  ;;  %v11822_v42 = vpop.f32.mrb[88].mxu0  ;;  %v8660_v5 = vadd.f32 %v8659_v46, %v8658_v49 }
 0x211   : > { %v5455_v44 = vcombine.high %v5313_v60, %v5313_v60  ;;  %v5462_v1 = vrot.slane %v5313_v60, %v11748_v47  ;;  %v5311_v32 = vmax.f32 %v5288_v20, 0.0  ;;  %v11833_v0 = vpop.f32.mrb[11].mxu1  ;;  %v8665_v12 = vpop.f32.mrb[89].mxu0  ;;  %v5291_v34 = vadd.f32 %v9218_v33, %v11742_v39 }
 0x212   : > { %13297 = vst [vmem:[#allocation3_spill] sm:$0xff] %v11816_v57  ;;  %v11835_v21 = vcombine.low %v5879_v43, %v5886_v56  ;;  %v5289_v31 = vadd.f32 %v9221_v54, %v11742_v39  ;;  %v8663_v28 = vadd.f32 %v8662_v40, %v8661_v23  ;;  %v8667_v27 = vpop.f32.mrb[90].mxu0  ;;  %v9226_v23 = vadd.f32 %v11716_v11, %v8660_v5 }
 0x213   : > { %v5469_v59 = vrot.slane %v5455_v44, %v11748_v47  ;;  %v5470_v53 = vcombine.high %v5462_v1, %v5462_v1  ;;  %v5421_v7 = vcombine.high %v5311_v32, %v5311_v32  ;;  %v5428_v13 = vrot.slane %v5311_v32, %v11748_v47  ;;  %v8668_v49 = vpop.f32.mrb[91].mxu0 }
 0x214   : > { %13300 = vst [vmem:[#allocation10_spill] sm:$0xff] %v11835_v21  ;;  %v5314_v52 = vmax.f32 %v5291_v34, 0.0  ;;  %v5312_v43 = vmax.f32 %v5289_v31, 0.0  ;;  %v5920_v34 = vrot.slane %v11804_v3, %v11748_v47 }
 0x215   : > { %v11849_v40 = vcombine.low %v5462_v1, %v5470_v53  ;;  %v5976_v60 = vrot.slane %v5469_v59, %v11748_v47  ;;  %v5435_v20 = vrot.slane %v5421_v7, %v11748_v47  ;;  %v5436_v56 = vcombine.high %v5428_v13, %v5428_v13 }
 0x216   : > { %v5913_v33 = vcombine.low %v5420_v18, %v5428_v13  ;;  %v5471_v54 = vcombine.high %v5469_v59, %v5469_v59  ;;  %v5472_v44 = vcombine.high %v5314_v52, %v5314_v52  ;;  %v5479_v32 = vrot.slane %v5314_v52, %v11748_v47  ;;  %v11854_v46 = vpop.f32.mrb[12].mxu1 }
 0x217   : > { %v6302_v1 = vsel %vm5832_vm9, %v5976_v60, 0.0  ;;  %v5437_v5 = vcombine.high %v5435_v20, %v5435_v20  ;;  %v11860_v31 = vpop.f32.mrb[13].mxu1  ;;  %v11864_v18 = vrot.slane %v5436_v56, %v11748_v47  ;;  %v5438_v21 = vcombine.high %v5312_v43, %v5312_v43  ;;  %vm12135_vm9 = vmand %vm12094_vm6, %vm13183_vm8 }
 0x218   : > { %v5927_v53 = vrot.slane %v5913_v33, %v11748_v47  ;;  %v5486_v59 = vrot.slane %v5472_v44, %v11748_v47  ;;  %v5487_v7 = vcombine.high %v5479_v32, %v5479_v32  ;;  %v11867_v13 = vpop.f32.mrb[14].mxu1  ;;  %v11869_v52 = vpop.f32.mrb[92].mxu0  ;;  %v5977_v57 = vcombine.low %v5471_v54, %v5479_v32 }
 0x219   : > { %v5936_v3 = vcombine.low %v5435_v20, %v5437_v5  ;;  %v5445_v60 = vrot.slane %v5312_v43, %v11748_v47  ;;  %v11872_v11 = vpop.f32.mrb[15].mxu1  ;;  %v11874_v22 = vpop.f32.mrb[93].mxu0  ;;  %v11876_v33 = vpack.c.bf16 %v6302_v1, %v6302_v1  ;;  %v9227_v44 = vadd.f32 %v9226_v23, %v5192_v50 }
 0x21a   : > { %v11878_v56 = vcombine.low %v5920_v34, %v5927_v53  ;;  %v5978_v37 = vcombine.low %v5487_v7, %v5486_v59  ;;  %v13301_v20 = vmov 0  ;;  %v11888_v54 = vpop.f32.mrb[94].mxu0  ;;  %v5985_v32 = vrot.slane %v5977_v57, %v11748_v47 }
 0x21b   : > { %v13302_v20 = vsel %vm11884_vm10, 4294967295, %v13301_v20  ;;  %v5944_v43 = vrot.slane %v5936_v3, %v11748_v47  ;;  %v5452_v1 = vrot.slane %v5438_v21, %v11748_v47  ;;  %v5453_v34 = vcombine.high %v5445_v60, %v5445_v60  ;;  %v11893_v5 = vpop.f32.mrb[95].mxu0 }
 0x21c   : > { %13303 = vst [vmem:[#allocation8_spill] sm:$0xff] %v13302_v20  ;;  %v11897_v50 = vpack.c.bf16 %v11878_v56, %v11810_v25  ;;  %v5992_v23 = vrot.slane %v5978_v37, %v11748_v47  ;;  %v5292_v53 = vadd.f32 %v9227_v44, %v11742_v39  ;;  %v9232_v7 = vadd.f32 %v11719_v24, %v8663_v28 }
 0x21d   : > { %v5454_v36 = vcombine.high %v5452_v1, %v5452_v1  ;;  %v5937_v41 = vcombine.low %v5445_v60, %v5453_v34  ;;  %v8666_v3 = vadd.f32 %v8665_v12, %v11822_v42  ;;  %v8669_v57 = vadd.f32 %v8668_v49, %v8667_v27 }
 0x21e   : > { %v13304_v21 = vmov 0  ;;  %v11911_v6 = vcombine.low %v5985_v32, %v5992_v23  ;;  %v5315_v37 = vmax.f32 %v5292_v53, 0.0  ;;  %v5488_v58 = vcombine.high %v5486_v59, %v5486_v59  ;;  %v11914_v24 = vpop.f32.mrb[16].mxu1 }
 0x21f   : > { %v13305_v21 = vsel %vm11907_vm11, 4294967295, %v13304_v21  ;;  %v9233_v44 = vadd.f32 %v9232_v7, %v11833_v0  ;;  %13307 = vst [vmem:[#allocation9_spill] sm:$0xff] %v11914_v24  ;;  %v5951_v28 = vrot.slane %v5937_v41, %v11748_v47  ;;  %v5953_v42 = vcombine.low %v5452_v1, %v5454_v36  ;;  %v11919_v49 = vpop.f32.mrb[17].mxu1 }
 0x220   : > { %13306 = vst [vmem:[#allocation11_spill] sm:$0xff] %v13305_v21  ;;  %v9223_v12 = vadd.f32 %v11628_v17, %v8666_v3  ;;  %v9229_v27 = vadd.f32 %v11636_v61, %v8669_v57  ;;  %v5489_v60 = vcombine.high %v5315_v37, %v5315_v37  ;;  %v5496_v34 = vrot.slane %v5315_v37, %v11748_v47  ;;  %v11926_v59 = vpop.f32.mrb[18].mxu1  ;;  %v11928_v23 = vpop.f32.mrb[96].mxu0 }
 0x221   : > { %v5293_v32 = vadd.f32 %v9233_v44, %v11742_v39  ;;  %v6297_v0 = vsel %vm11907_vm11, %v11810_v25, 0.0  ;;  %13308 = vst [vmem:[#allocation13_spill] sm:$0xff] %v11926_v59  ;;  %v11938_v61 = vcombine.low %v5944_v43, %v5951_v28  ;;  %v5961_v36 = vrot.slane %v5953_v42, %v11748_v47  ;;  %v11943_v1 = vpop.f32.mrb[19].mxu1  ;;  %v11945_v53 = vpop.f32.mrb[97].mxu0 }
 0x222   : > { %v9224_v41 = vadd.f32 %v9223_v12, %v11808_v26  ;;  %v9230_v25 = vadd.f32 %v9229_v27, %v11820_v48  ;;  %v11948_v7 = vrot.slane %v5489_v60, %v11748_v47  ;;  %v5504_v3 = vcombine.high %v5496_v34, %v5496_v34  ;;  %v11950_v44 = vpop.f32.mrb[98].mxu0 }
 0x223   : > { %v5994_v57 = vcombine.low %v5488_v58, %v5496_v34  ;;  %v5316_v37 = vmax.f32 %v5293_v32, 0.0  ;;  %v13311_v43 = vrot.slane %v11849_v40, %v11748_v47  ;;  %v6298_v58 = vsel %vm11884_vm10, %v11878_v56, 0.0  ;;  %v11966_v42 = vpop.f32.mrb[99].mxu0 }
 0x224   : > { %v5294_v26 = vadd.f32 %v9224_v41, %v11742_v39  ;;  %v5295_v48 = vadd.f32 %v9230_v25, %v11742_v39  ;;  %v6300_v40 = vsel %vm11934_vm12, %v11938_v61, 0.0  ;;  %v5995_v12 = vcombine.low %v5504_v3, %v11948_v7 }
 0x225   : > { %v11955_v28 = vcombine.low %v5961_v36, %v13311_v43  ;;  %v6002_v27 = vrot.slane %v5994_v57, %v11748_v47  ;;  %v5506_v60 = vcombine.high %v5316_v37, %v5316_v37  ;;  %v5513_v32 = vrot.slane %v5316_v37, %v11748_v47 }
 0x226   : > { %v5317_v36 = vmax.f32 %v5294_v26, 0.0  ;;  %v5318_v41 = vmax.f32 %v5295_v48, 0.0  ;;  %v6009_v25 = vrot.slane %v5995_v12, %v11748_v47  ;;  %v6299_v51 = vsel %vm5829_vm13, %v11864_v18, 0.0  ;;  %v11982_v3 = vpop.f32.mrb[56].mxu1  ;;  %vm12155_vm13 = vmand %vm12094_vm6, %vm13184_vm4 }
 0x227   : > { %v6301_v34 = vsel %vm11829_vm7, %v11955_v28, 0.0  ;;  %v5520_v43 = vrot.slane %v5506_v60, %v11748_v47  ;;  %13312 = vst [vmem:[#allocation12_spill] sm:$0xff] %v11982_v3  ;;  %v5521_v57 = vcombine.high %v5513_v32, %v5513_v32  ;;  %v11985_v24 = vpop.f32.mrb[57].mxu1  ;;  %vm12223_vm7 = vmand %vm5762_vm3, %vm5772_vm5  ;;  %vm5763_vm12 = vcmp.ge.s32.totalorder %v11768_v16, 0 }
 0x228   : > { %v11977_v56 = vpack.c.bf16 %v6301_v34, %v6300_v40  ;;  %v5523_v14 = vcombine.high %v5317_v36, %v5317_v36  ;;  %v5530_v59 = vrot.slane %v5317_v36, %v11748_v47  ;;  %v5540_v35 = vcombine.high %v5318_v41, %v5318_v41  ;;  %13313 = vst [vmem:[#allocation17_spill] sm:$0xff] %v11985_v24  ;;  %v11992_v12 = vpop.f32.mrb[100].mxu0  ;;  %v9085_v60 = vpop.f32.mrb[58].mxu1  ;;  %vm12258_vm3 = vmand %vm12223_vm7, %vm13183_vm8 }
 0x229   : > { %v11987_v37 = vcombine.low %v6002_v27, %v6009_v25  ;;  %v5522_v26 = vcombine.high %v5520_v43, %v5520_v43  ;;  %v11990_v48 = vrot.slane %v5318_v41, %v11748_v47  ;;  %v6326_v40 = vpack.c.bf16 %v6298_v58, %v6297_v0  ;;  %v11998_v36 = vpop.f32.mrb[101].mxu0  ;;  %v12000_v24 = vpop.f32.mrb[59].mxu1  ;;  %vm12274_vm5 = vmand %vm12223_vm7, %vm13184_vm4 }
 0x22a   : > { %v6018_v18 = vcombine.low %v5513_v32, %v5521_v57  ;;  %v5537_v34 = vrot.slane %v5523_v14, %v11748_v47  ;;  %v5538_v3 = vcombine.high %v5530_v59, %v5530_v59  ;;  %v11996_v30 = vrot.slane %v5540_v35, %v11748_v47  ;;  %13314 = vst [vmem:[#allocation14_spill] sm:$0xff] %v12000_v24  ;;  %v12004_v58 = vpop.f32.mrb[102].mxu0 }
 0x22b   : > { %v6019_v27 = vcombine.low %v5520_v43, %v5522_v26  ;;  %v5555_v41 = vcombine.high %v11990_v48, %v11990_v48  ;;  %v6327_v25 = vpack.c.bf16 %v6299_v51, %v6299_v51  ;;  %v6497_v0 = vrot.slane %v6326_v40, 1  ;;  %v12014_v43 = vpop.f32.mrb[103].mxu0 }
 0x22c   : > { %v5539_v14 = vcombine.high %v5537_v34, %v5537_v34  ;;  %v12008_v57 = vcombine.low %v5530_v59, %v5538_v3  ;;  %v8672_v35 = vadd.f32 %v11874_v22, %v11869_v52  ;;  %v6026_v51 = vrot.slane %v6018_v18, %v11748_v47 }
 0x22d   : > { %v6033_v26 = vrot.slane %v6019_v27, %v11748_v47  ;;  %v12019_v60 = vcombine.low %v5555_v41, %v11996_v30  ;;  %v6498_v32 = vrot.slane %v6327_v25, 1  ;;  %v5556_v22 = vcombine.high %v11996_v30, %v11996_v30 }
 0x22e   : > { %v12021_v24 = vcombine.low %v5537_v34, %v5539_v14  ;;  %v9238_v59 = vadd.f32 %v11653_v4, %v8672_v35  ;;  %v8675_v52 = vadd.f32 %v11893_v5, %v11888_v54  ;;  %v6357_v34 = vshrl.u32 %v6326_v40, 16 }
 0x22f   : > { %v12028_v3 = vcombine.low %v6026_v51, %v6033_v26  ;;  %v12035_v41 = vsel %vm13182_vm0, %v6497_v0, %v6498_v32  ;;  %v6359_v14 = vshll.u32 %v6326_v40, 16  ;;  %v6364_v54 = vshll.u32 %v6327_v25, 16  ;;  %v9544_v40 = vld [vmem:[%s13080_s4 + $0x88] sm:$0xff]  }
 0x230   : > { %9102 = vmatprep.mubr.bf16.mxu1 %v12035_v41  ;;  %v9239_v4 = vadd.f32 %v9238_v59, %v11860_v31  ;;  %v9244_v30 = vadd.f32 %v11662_v63, %v8675_v52  ;;  %v6500_v5 = vrot.slane %v11977_v56, 1  ;;  %v6501_v35 = vrot.slane %v11876_v33, 1  ;;  %v12044_v26 = vpop.f32.mrb[104].mxu0 }
 0x231   : > { %v8678_v51 = vadd.f32 %v11945_v53, %v11928_v23  ;;  %v6361_v27 = vrot.slane %v6359_v14, 1  ;;  %v6369_v31 = vshrl.u32 %v11977_v56, 16  ;;  %v12049_v63 = vpop.f32.mrb[105].mxu0  ;;  %v6366_v25 = vrot.slane %v6364_v54, 1 }
 0x232   : > { %v5296_v0 = vadd.f32 %v9239_v4, %v11742_v39  ;;  %v9245_v32 = vadd.f32 %v9244_v30, %v11872_v11  ;;  %v12055_v59 = vsel %vm13182_vm0, %v6500_v5, %v6501_v35  ;;  %v6371_v53 = vshll.u32 %v11977_v56, 16  ;;  %v12059_v52 = vpop.f32.mrb[106].mxu0 }
 0x233   : > { %v9235_v23 = vadd.f32 %v11666_v38, %v8678_v51  ;;  %v6362_v30 = vor.u32 %v6361_v27, %v6357_v34  ;;  %9103 = vmatmul.mubr.bf16.vlgmr.msra.gmra.mrb[60].mxu1 %v12055_v59  ;;  %v6376_v14 = vshll.u32 %v11876_v33, 16  ;;  %v12064_v18 = vpop.f32.mrb[107].mxu0  ;;  %v8681_v54 = vadd.f32 %v11966_v42, %v11950_v44  ;;  %v9546_v33 = vld [vmem:[%s13080_s4] sm:$0xff]   ;;  %v9547_v51 = vld [vmem:[%s13080_s4 + $0x90] sm:$0xff]  }
 0x234   : > { %v5319_v11 = vmax.f32 %v5296_v0, 0.0  ;;  %v5297_v4 = vadd.f32 %v9245_v32, %v11742_v39  ;;  %v6373_v56 = vrot.slane %v6371_v53, 1  ;;  %v12075_v27 = vpack.c.bf16 %v11955_v28, %v11938_v61  ;;  %9119 = vmatpush3.bf16.msra.mxu1 %v11712_v19  ;;  %v9559_v42 = vld [vmem:[%s13080_s4 + $0xb0] sm:$0xff]  }
 0x235   : > { %v9236_v38 = vadd.f32 %v9235_v23, %v11854_v46  ;;  %v12083_v46 = vsel %vm13185_vm1, %v6362_v30, %v6366_v25  ;;  %9120 = vmatprep.subr.bf16.mxu1 %v9544_v40  ;;  %v6378_v44 = vrot.slane %v6376_v14, 1  ;;  %v9241_v28 = vadd.f32 %v11670_v9, %v8681_v54  ;;  %v9548_v9 = vld [vmem:[%s13080_s4 + $0x48] sm:$0xff]   ;;  %v9550_v54 = vld [vmem:[%s13080_s4 + $0x98] sm:$0xff]  }
 0x236   : > { %13315 = vst [vmem:[#allocation15_spill] sm:$0xff] %v12075_v27  ;;  %v5557_v34 = vcombine.high %v5319_v11, %v5319_v11  ;;  %v5564_v5 = vrot.slane %v5319_v11, %v11748_v47  ;;  %v5320_v35 = vmax.f32 %v5297_v4, 0.0  ;;  %6807 = vmatprep.mubr.bf16.mxu0 %v12083_v46  ;;  %v6374_v61 = vor.u32 %v6373_v56, %v6369_v31  ;;  %v9549_v4 = vld [vmem:[%s13080_s4 + $0x8] sm:$0xff]  }
 0x237   : > { %v5298_v19 = vadd.f32 %v9236_v38, %v11742_v39  ;;  %8224 = vmatmul.mubr.msk.bf16.vlgmr.msra.gmra.mrb[116].mxu0 %vm13181_vm2, %v11897_v50  ;;  %vm12412_vm2 = vmpackc.low %vm12223_vm7, %vm12258_vm3 }
 0x238   : > { %v5571_v0 = vrot.slane %v5557_v34, %v11748_v47  ;;  %v5572_v32 = vcombine.high %v5564_v5, %v5564_v5  ;;  %v12102_v25 = vcombine.low %v5556_v22, %v5564_v5  ;;  %v5574_v31 = vcombine.high %v5320_v35, %v5320_v35  ;;  %v12120_v11 = vpop.f32.mrb[108].mxu0  ;;  %9121 = vmatpush3.bf16.msra.mxu1 %v9544_v40 }
 0x239   : > { %v12114_v8 = vrot.slane %v5320_v35, %v11748_v47  ;;  %v5321_v23 = vmax.f32 %v5298_v19, 0.0  ;;  %v12117_v53 = vsel %vm13185_vm1, %v6374_v61, %v6378_v44  ;;  %v9242_v22 = vadd.f32 %v9241_v28, %v11867_v13  ;;  %8807 = vmatpush3.bf16.msra.mxu0 %v9546_v33  ;;  %v12139_v40 = vpop.f32.mrb[109].mxu0  ;;  %v9551_v33 = vld [vmem:[%s13080_s4 + $0x50] sm:$0xff]   ;;  %9122 = vmatprep.subr.bf16.mxu1 %v9547_v51  ;;  %v9554_v61 = vld [vmem:[%s13080_s4 + $0x58] sm:$0xff]  }
 0x23a   : > { %13318 = vst [vmem:[#allocation19_spill] sm:$0xff] %v12117_v53  ;;  %v12127_v14 = vcombine.low %v5572_v32, %v5571_v0  ;;  %v5573_v38 = vcombine.high %v5571_v0, %v5571_v0  ;;  %v5588_v56 = vrot.slane %v5574_v31, %v11748_v47  ;;  %6815 = vmatprep.mubr.bf16.mxu0 %v12117_v53  ;;  %v12159_v44 = vpop.f32.mrb[110].mxu0 }
 0x23b   : > { %v5591_v5 = vcombine.high %v5321_v23, %v5321_v23  ;;  %v5598_v35 = vrot.slane %v5321_v23, %v11748_v47  ;;  %v5299_v19 = vadd.f32 %v9242_v22, %v11742_v39  ;;  %v13323_v31 = vcombine.high %v11948_v7, %v11948_v7  ;;  %v12170_v22 = vpop.f32.mrb[111].mxu0  ;;  %8808 = vmatprep.subr.bf16.mxu0 %v9548_v9 }
 0x23c   : > { %v5590_v0 = vcombine.high %v5588_v56, %v5588_v56  ;;  %v12164_v32 = vcombine.low %v5573_v38, %v12114_v8  ;;  %v13324_v38 = vmov 0  ;;  %9123 = vmatpush3.bf16.msra.mxu1 %v9547_v51  ;;  %v6303_v9 = vsel %vm12135_vm9, %v11911_v6, 0.0  ;;  %v9553_v51 = vld [vmem:[%s13080_s4 + $0xa0] sm:$0xff]  }
 0x23d   : > { %v6017_v23 = vrot.slane %v13323_v31, %v11748_v47  ;;  %v5605_v30 = vrot.slane %v5591_v5, %v11748_v47  ;;  %v5606_v53 = vcombine.high %v5598_v35, %v5598_v35  ;;  %v5322_v21 = vmax.f32 %v5299_v19, 0.0  ;;  %8809 = vmatpush3.bf16.msra.mxu0 %v9549_v4  ;;  %9124 = vmatprep.subr.bf16.mxu1 %v9550_v54 }
 0x23e   : > { %v13325_v38 = vsel %vm12179_vm14, 4294967295, %v13324_v38  ;;  %v12183_v7 = vcombine.low %v5588_v56, %v5590_v0  ;;  %v6304_v5 = vsel %vm12094_vm6, %v11987_v37, 0.0  ;;  %8810 = vmatprep.subr.bf16.mxu0 %v9551_v33 }
 0x23f   : > { %13326 = vst [vmem:[#allocation18_spill] sm:$0xff] %v13325_v38  ;;  %v6305_v17 = vsel %vm12155_vm13, %v6017_v23, 0.0  ;;  %v5607_v4 = vcombine.high %v5605_v30, %v5605_v30  ;;  %v12199_v56 = vcombine.low %v5598_v35, %v5606_v53  ;;  %v5608_v19 = vcombine.high %v5322_v21, %v5322_v21  ;;  %8227 = vmatmul.mubr.msk.bf16.gmra.mrb[120].mxu0 %vm12179_vm14, %v12075_v27  ;;  %vm12292_vm13 = vmpackc.low %vm12094_vm6, %vm12135_vm9 }
 0x240   : > { %v5615_v0 = vrot.slane %v5322_v21, %v11748_v47  ;;  %v6330_v31 = vpack.c.bf16 %v6304_v5, %v6303_v9  ;;  %v6331_v23 = vpack.c.bf16 %v6305_v17, %v6305_v17  ;;  %v8684_v53 = vadd.f32 %v11998_v36, %v11992_v12  ;;  %v12227_v9 = vpop.f32.mrb[112].mxu0  ;;  %9125 = vmatpush3.bf16.msra.mxu1 %v9550_v54  ;;  %v9556_v12 = vld [vmem:[%s13080_s4 + $0xa8] sm:$0xff]   ;;  %vm12359_vm6 = vmand %vm5763_vm12, %vm5773_vm15 }
 0x241   : > { %v12214_v21 = vcombine.low %v5605_v30, %v5607_v4  ;;  %v12217_v28 = vrot.slane %v5608_v19, %v11748_v47  ;;  %v12233_v17 = vpop.f32.mrb[113].mxu0  ;;  %8811 = vmatpush3.bf16.msra.mxu0 %v9552_v10  ;;  %9126 = vmatprep.subr.bf16.mxu1 %v9553_v51  ;;  %v9557_v10 = vld [vmem:[%s13080_s4 + $0x60] sm:$0xff]   ;;  %vm12385_vm15 = vmand %vm12359_vm6, %vm13183_vm8 }
 0x242   : > { %v5623_v34 = vcombine.high %v5615_v0, %v5615_v0  ;;  %v6503_v36 = vrot.slane %v6330_v31, 1  ;;  %v6504_v30 = vrot.slane %v6331_v23, 1  ;;  %v6383_v5 = vshll.u32 %v6330_v31, 16  ;;  %8812 = vmatprep.subr.bf16.mxu0 %v9554_v61  ;;  %v8703_v38 = vpop.f32.mrb[114].mxu0 }
 0x243   : > { %v6381_v4 = vshrl.u32 %v6330_v31, 16  ;;  %v6388_v19 = vshll.u32 %v6331_v23, 16  ;;  %v9250_v35 = vadd.f32 %v11683_v55, %v8684_v53  ;;  %v8687_v31 = vadd.f32 %v12014_v43, %v12004_v58  ;;  %v8704_v61 = vpop.f32.mrb[115].mxu0 }
 0x244   : > { %v12247_v27 = vcombine.low %v5615_v0, %v5623_v34  ;;  %v12250_v20 = vsel %vm13182_vm0, %v6503_v36, %v6504_v30  ;;  %v6385_v54 = vrot.slane %v6383_v5, 1  ;;  %v5624_v0 = vcombine.high %v12217_v28, %v12217_v28  ;;  %9127 = vmatpush3.bf16.msra.mxu1 %v9553_v51  ;;  %v9589_v51 = vld [vmem:[%s13080_s4 + $0x230] sm:$0xff]  }
 0x245   : > { %9106 = vmatprep.mubr.bf16.mxu1 %v12250_v20  ;;  %v6390_v34 = vrot.slane %v6388_v19, 1  ;;  %v9251_v38 = vadd.f32 %v9250_v35, %v11919_v49  ;;  %v12268_v58 = vpack.c.bf16 %v11987_v37, %v11911_v6  ;;  %v9256_v53 = vadd.f32 %v11686_v45, %v8687_v31  ;;  %8813 = vmatpush3.bf16.msra.mxu0 %v9555_v29 }
 0x246   : > { %v6386_v23 = vor.u32 %v6385_v54, %v6381_v4  ;;  %v13333_v49 = vrot.slane %v12021_v24, %v11748_v47  ;;  %v13334_v35 = vrot.slane %v12008_v57, %v11748_v47  ;;  %v6058_v37 = vrot.slane %v11990_v48, %v11748_v47  ;;  %9128 = vmatprep.subr.bf16.mxu1 %v9556_v12  ;;  %v9558_v57 = vld [vmem:[%s13080_s4 + $0x20] sm:$0xff]   ;;  %v13337_v4 = vld [vmem:[#allocation16_spill] sm:$0xff] }
 0x247   : > { %v5300_v36 = vadd.f32 %v9251_v38, %v11742_v39  ;;  %v6306_v45 = vsel %vm12258_vm3, %v12028_v3, 0.0  ;;  %v8690_v24 = vadd.f32 %v12049_v63, %v12044_v26  ;;  %v8693_v48 = vadd.f32 %v12064_v18, %v12059_v52  ;;  %8814 = vmatprep.subr.bf16.mxu0 %v9557_v10  ;;  %v9560_v63 = vld [vmem:[%s13080_s4 + $0x68] sm:$0xff]  }
 0x248   : > { %v6051_v6 = vcombine.low %v13334_v35, %v13333_v49  ;;  %v12310_v13 = vsel %vm13185_vm1, %v6386_v23, %v6390_v34  ;;  %v9257_v30 = vadd.f32 %v9256_v53, %v11943_v1  ;;  %v6308_v18 = vsel %vm12274_vm5, %v6058_v37, 0.0  ;;  %9129 = vmatpush3.bf16.msra.mxu1 %v9556_v12  ;;  %v13340_v53 = vld [vmem:[#allocation9_spill] sm:$0xff]  ;;  %vm12401_vm5 = vmand %vm12359_vm6, %vm13184_vm4 }
 0x249   : > { %6823 = vmatprep.mubr.bf16.mxu0 %v12310_v13  ;;  %v5323_v52 = vmax.f32 %v5300_v36, 0.0  ;;  %v6333_v29 = vpack.c.bf16 %v6308_v18, %v6308_v18  ;;  %v9247_v54 = vadd.f32 %v11689_v2, %v8690_v24  ;;  %v9253_v19 = vadd.f32 %v13337_v4, %v8693_v48  ;;  %v9562_v2 = vld [vmem:[%s13080_s4 + $0xb8] sm:$0xff]   ;;  %8815 = vmatpush3.bf16.msra.mxu0 %v9558_v57  ;;  %v9565_v18 = vld [vmem:[%s13080_s4 + $0x1c0] sm:$0xff]  }
 0x24a   : > { %v6307_v26 = vsel %vm12223_vm7, %v6051_v6, 0.0  ;;  %v5301_v1 = vadd.f32 %v9257_v30, %v11742_v39  ;;  %8230 = vmatmul.mubr.msk.bf16.gmra.mrb[124].mxu0 %vm12292_vm13, %v12268_v58  ;;  %v12328_v10 = vpack.c.bf16 %v6051_v6, %v12028_v3  ;;  %v13338_v31 = vrot.slane %v12102_v25, %v11748_v47  ;;  %9130 = vmatprep.subr.bf16.mxu1 %v9559_v42  ;;  %v9561_v3 = vld [vmem:[%s13080_s4 + $0x28] sm:$0xff]   ;;  %v9563_v6 = vld [vmem:[%s13080_s4 + $0x70] sm:$0xff]  }
 0x24b   : > { %v6332_v5 = vpack.c.bf16 %v6307_v26, %v6306_v45  ;;  %v13339_v61 = vrot.slane %v12019_v60, %v11748_v47  ;;  %v5625_v12 = vcombine.high %v5323_v52, %v5323_v52  ;;  %v5632_v38 = vrot.slane %v5323_v52, %v11748_v47  ;;  %8816 = vmatprep.subr.bf16.mxu0 %v9560_v63 }
 0x24c   : > { %v6507_v23 = vrot.slane %v6333_v29, 1  ;;  %v5324_v25 = vmax.f32 %v5301_v1, 0.0  ;;  %v9248_v60 = vadd.f32 %v9247_v54, %v13340_v53  ;;  %9131 = vmatpush3.bf16.msra.mxu1 %v9559_v42  ;;  %v6132_v16 = vrot.slane %v12247_v27, %v11748_v47  ;;  %v9564_v54 = vld [vmem:[%s13080_s4 + $0x30] sm:$0xff]  }
 0x24d   : > { %v12336_v34 = vcombine.low %v13339_v61, %v13338_v31  ;;  %v6506_v43 = vrot.slane %v6332_v5, 1  ;;  %v6393_v49 = vshrl.u32 %v6332_v5, 16  ;;  %v6395_v35 = vshll.u32 %v6332_v5, 16  ;;  %9132 = vmatprep.subr.bf16.mxu1 %v9562_v2  ;;  %v13343_v5 = vld [vmem:[#allocation4_spill] sm:$0xff]  ;;  %8817 = vmatpush3.bf16.msra.mxu0 %v9561_v3  ;;  %v13346_v3 = vld [vmem:[#allocation13_spill] sm:$0xff] }
 0x24e   : > { %v5639_v37 = vrot.slane %v5625_v12, %v11748_v47  ;;  %v5640_v36 = vcombine.high %v5632_v38, %v5632_v38  ;;  %v12350_v45 = vcombine.low %v5624_v0, %v5632_v38  ;;  %v5642_v57 = vcombine.high %v5324_v25, %v5324_v25  ;;  %8818 = vmatprep.subr.bf16.mxu0 %v9563_v6  ;;  %v9567_v12 = vld [vmem:[%s13080_s4 + $0x78] sm:$0xff]  }
 0x24f   : > { %v12353_v24 = vsel %vm13182_vm0, %v6506_v43, %v6507_v23  ;;  %v5649_v30 = vrot.slane %v5324_v25, %v11748_v47  ;;  %v5302_v0 = vadd.f32 %v9248_v60, %v11742_v39  ;;  %v6397_v26 = vrot.slane %v6395_v35, 1 }
 0x250   : > { %9107 = vmatmul.mubr.bf16.gmra.mrb[64].mxu1 %v12353_v24  ;;  %v12371_v63 = vcombine.low %v5640_v36, %v5639_v37  ;;  %v5641_v52 = vcombine.high %v5639_v37, %v5639_v37  ;;  %v6400_v42 = vshll.u32 %v6333_v29, 16  ;;  %vm5764_vm9 = vcmp.ge.s32.totalorder %v13343_v5, 0 }
 0x251   : > { %vm5774_vm12 = vcmp.lt.s32.totalorder %v13343_v5, 16  ;;  %v12379_v1 = vrot.slane %v5642_v57, %v11748_v47  ;;  %v5657_v4 = vcombine.high %v5649_v30, %v5649_v30  ;;  %v5325_v31 = vmax.f32 %v5302_v0, 0.0  ;;  %9133 = vmatpush3.bf16.msra.mxu1 %v9562_v2  ;;  %8819 = vmatpush3.bf16.msra.mxu0 %v9564_v54 }
 0x252   : > { %v6398_v61 = vor.u32 %v6397_v26, %v6393_v49  ;;  %v6149_v38 = vrot.slane %v12350_v45, %v11748_v47  ;;  %v12394_v43 = vcombine.low %v5641_v52, %v5649_v30  ;;  %v6402_v23 = vrot.slane %v6400_v42, 1  ;;  %8886 = vmatprep.subr.bf16.mxu1 %v9565_v18  ;;  %8820 = vmatprep.subr.bf16.mxu0 %v9567_v12 }
 0x253   : > { %v9254_v25 = vadd.f32 %v9253_v19, %v13346_v3  ;;  %v6156_v60 = vrot.slane %v12371_v63, %v11748_v47  ;;  %v5659_v49 = vcombine.high %v5325_v31, %v5325_v31  ;;  %v5666_v35 = vrot.slane %v5325_v31, %v11748_v47  ;;  %v13354_v3 = vld [vmem:[#allocation17_spill] sm:$0xff] }
 0x254   : > { %v13351_v6 = vrot.slane %v12164_v32, %v11748_v47  ;;  %v13352_v2 = vrot.slane %v12127_v14, %v11748_v47  ;;  %v12423_v36 = vcombine.low %v5657_v4, %v12379_v1  ;;  %v12426_v57 = vsel %vm13185_vm1, %v6398_v61, %v6402_v23  ;;  %v9568_v14 = vld [vmem:[%s13080_s4 + $0x38] sm:$0xff]  }
 0x255   : > { %v5303_v33 = vadd.f32 %v9254_v25, %v11742_v39  ;;  %v13353_v55 = vcombine.high %v12114_v8, %v12114_v8  ;;  %v6166_v32 = vrot.slane %v12394_v43, %v11748_v47  ;;  %v5673_v0 = vrot.slane %v5659_v49, %v11748_v47  ;;  %6831 = vmatprep.mubr.bf16.mxu0 %v12426_v57 }
 0x256   : > { %v6092_v37 = vcombine.low %v13352_v2, %v13351_v6  ;;  %v5674_v26 = vcombine.high %v5666_v35, %v5666_v35  ;;  %v6309_v39 = vsel %vm12385_vm15, %v12336_v34, 0.0  ;;  %8233 = vmatmul.mubr.msk.bf16.gmra.mrb[128].mxu0 %vm12412_vm2, %v12328_v10  ;;  %v8696_v42 = vadd.f32 %v12139_v40, %v12120_v11 }
 0x257   : > { %v6099_v30 = vrot.slane %v13353_v55, %v11748_v47  ;;  %v5326_v8 = vmax.f32 %v5303_v33, 0.0  ;;  %v5675_v54 = vcombine.high %v5673_v0, %v5673_v0  ;;  %v8699_v49 = vadd.f32 %v12170_v22, %v12159_v44  ;;  %8821 = vmatpush3.bf16.msra.mxu0 %v9568_v14 }
 0x258   : > { %v6310_v18 = vsel %vm12359_vm6, %v6092_v37, 0.0  ;;  %v12452_v4 = vcombine.low %v5666_v35, %v5674_v26  ;;  %v5241_v25 = vadd.f32 %v8696_v42, %v13354_v3  ;;  %v6173_v53 = vrot.slane %v12423_v36, %v11748_v47  ;;  %v13355_v35 = vld [vmem:[#allocation6_spill] sm:$0xff] }
 0x259   : > { %v6311_v52 = vsel %vm12401_vm5, %v6099_v30, 0.0  ;;  %v6334_v31 = vpack.c.bf16 %v6310_v18, %v6309_v39  ;;  %v5676_v12 = vcombine.high %v5326_v8, %v5326_v8  ;;  %v5683_v23 = vrot.slane %v5326_v8, %v11748_v47  ;;  %v13356_v30 = vld [vmem:[#allocation30_spill] sm:$0xff]  ;;  %vm12475_vm5 = vmand %vm5764_vm9, %vm5774_vm12 }
 0x25a   : > { %v6335_v61 = vpack.c.bf16 %v6311_v52, %v6311_v52  ;;  %v12460_v6 = vcombine.low %v5673_v0, %v5675_v54  ;;  %vm5765_vm7 = vcmp.ge.s32.totalorder %v13355_v35, 0  ;;  %vm5775_vm3 = vcmp.lt.s32.totalorder %v13355_v35, 16  ;;  %v9592_v52 = vld [vmem:[%s13079_s3] ss:$0 sm:$0xff]  ;;  %vm12495_vm9 = vmand %vm12475_vm5, %vm13183_vm8 }
 0x25b   : > { %v6509_v11 = vrot.slane %v6334_v31, 1  ;;  %v6190_v2 = vrot.slane %v12452_v4, %v11748_v47  ;;  %v5690_v33 = vrot.slane %v5676_v12, %v11748_v47  ;;  %v5691_v55 = vcombine.high %v5683_v23, %v5683_v23  ;;  %v13359_v54 = vld [vmem:[#allocation14_spill] sm:$0xff]  ;;  %vm5844_vm8 = vmand %vm12475_vm5, %vm13184_vm4  ;;  %v13389_v4 = vld [vmem:[#allocation5_spill] sm:$0xff] }
 0x25c   : > { %v6510_v40 = vrot.slane %v6335_v61, 1  ;;  %v5274_v44 = vadd.f32 %v5241_v25, %v13356_v30  ;;  %v6405_v14 = vshrl.u32 %v6334_v31, 16  ;;  %v6407_v0 = vshll.u32 %v6334_v31, 16  ;;  %vm12531_vm4 = vmpackc.low %vm12359_vm6, %vm12385_vm15 }
 0x25d   : > { %v6412_v26 = vshll.u32 %v6335_v61, 16  ;;  %v5692_v8 = vcombine.high %v5690_v33, %v5690_v33  ;;  %v12479_v18 = vcombine.low %v5683_v23, %v5691_v55  ;;  %v5244_v31 = vadd.f32 %v8699_v49, %v13359_v54  ;;  %v13365_v55 = vld [vmem:[#allocation29_spill] sm:$0xff] }
 0x25e   : > { %v12469_v22 = vsel %vm13182_vm0, %v6509_v11, %v6510_v40  ;;  %v5304_v42 = vadd.f32 %v9592_v52, %v5274_v44  ;;  %v6197_v61 = vrot.slane %v12460_v6, %v11748_v47  ;;  %v6409_v5 = vrot.slane %v6407_v0, 1  ;;  %v13364_v11 = vld [vmem:[#allocation7_spill] sm:$0xff] }
 0x25f   : > { %9110 = vmatprep.mubr.bf16.mxu1 %v12469_v22  ;;  %v12489_v12 = vpack.c.bf16 %v6092_v37, %v12336_v34  ;;  %v13362_v3 = vrot.slane %v12199_v56, %v11748_v47  ;;  %v13363_v25 = vrot.slane %v12183_v7, %v11748_v47  ;;  %vm5766_vm12 = vcmp.ge.s32.totalorder %v13364_v11, 0 }
 0x260   : > { %vm5776_vm0 = vcmp.lt.s32.totalorder %v13364_v11, 16  ;;  %v12507_v34 = vcombine.low %v5690_v33, %v5692_v8  ;;  %v5327_v37 = vmax.f32 %v5304_v42, 0.0  ;;  %v6414_v40 = vrot.slane %v6412_v26, 1 }
 0x261   : > { %v6116_v49 = vcombine.low %v13363_v25, %v13362_v3  ;;  %v5275_v30 = vadd.f32 %v5244_v31, %v13365_v55  ;;  %v6207_v56 = vrot.slane %v12479_v18, %v11748_v47  ;;  %v6410_v7 = vor.u32 %v6409_v5, %v6405_v14  ;;  %v13369_v3 = vld [vmem:[#allocation27_spill] sm:$0xff]  ;;  %v13370_v25 = vld [vmem:[#allocation12_spill] sm:$0xff] }
 0x262   : > { %v13366_v33 = vrot.slane %v12214_v21, %v11748_v47  ;;  %v6140_v0 = vrot.slane %v12217_v28, %v11748_v47  ;;  %v5693_v26 = vcombine.high %v5327_v37, %v5327_v37  ;;  %v12525_v8 = vrot.slane %v5327_v37, %v11748_v47 }
 0x263   : > { %v5305_v42 = vadd.f32 %v9592_v52, %v5275_v30  ;;  %v6312_v27 = vsel %vm12495_vm9, %v6116_v49, 0.0  ;;  %v12538_v21 = vsel %vm13185_vm1, %v6410_v7, %v6414_v40  ;;  %v8702_v54 = vadd.f32 %v12233_v17, %v12227_v9 }
 0x264   : > { %v6133_v44 = vcombine.low %v13366_v33, %v6132_v16  ;;  %v6314_v16 = vsel %vm5844_vm8, %v6140_v0, 0.0  ;;  %v6214_v48 = vrot.slane %v12507_v34, %v11748_v47  ;;  %v5707_v29 = vrot.slane %v5693_v26, %v11748_v47  ;;  %6839 = vmatprep.mubr.bf16.mxu0 %v12538_v21  ;;  %vm12563_vm8 = vmand %vm5765_vm7, %vm5775_vm3 }
 0x265   : > { %v5708_v31 = vcombine.high %v12525_v8, %v12525_v8  ;;  %v5328_v5 = vmax.f32 %v5305_v42, 0.0  ;;  %8236 = vmatmul.mubr.msk.bf16.gmra.mrb[132].mxu0 %vm12531_vm4, %v12489_v12  ;;  %v6337_v17 = vpack.c.bf16 %v6314_v16, %v6314_v16  ;;  %v5249_v34 = vadd.f32 %v13370_v25, %v8702_v54 }
 0x266   : > { %v6313_v28 = vsel %vm12475_vm5, %v6133_v44, 0.0  ;;  %v12556_v37 = vpack.c.bf16 %v6133_v44, %v6116_v49  ;;  %v5709_v55 = vcombine.high %v5707_v29, %v5707_v29  ;;  %v6222_v0 = vrot.slane %v12525_v8, %v11748_v47  ;;  %v13373_v49 = vld [vmem:[#allocation28_spill] sm:$0xff] }
 0x267   : > { %v6336_v9 = vpack.c.bf16 %v6313_v28, %v6312_v27  ;;  %v6223_v40 = vcombine.low %v5708_v31, %v5707_v29  ;;  %v5710_v30 = vcombine.high %v5328_v5, %v5328_v5  ;;  %v5717_v7 = vrot.slane %v5328_v5, %v11748_v47 }
 0x268   : > { %v6513_v42 = vrot.slane %v6337_v17, 1  ;;  %v5276_v44 = vadd.f32 %v5249_v34, %v13373_v49  ;;  %vm13374_vm6 = vcmask 1046528   ;;  %v6424_v5 = vshll.u32 %v6337_v17, 16 }
 0x269   : > { %v6512_v26 = vrot.slane %v6336_v9, 1  ;;  %v5724_v27 = vrot.slane %v5710_v30, %v11748_v47  ;;  %v5725_v28 = vcombine.high %v5717_v7, %v5717_v7  ;;  %v6224_v16 = vcombine.low %v5709_v55, %v5717_v7 }
 0x26a   : > { %v6417_v54 = vshrl.u32 %v6336_v9, 16  ;;  %v5306_v35 = vadd.f32 %v9592_v52, %v5276_v44  ;;  %v6419_v31 = vshll.u32 %v6336_v9, 16  ;;  %vm13375_vm7 = vcmp.ge.s32.totalorder %v13291_v15, 1 }
 0x26b   : > { %v12572_v29 = vsel %vm13374_vm6, %v6512_v26, %v6513_v42  ;;  %vm12578_vm3 = vmand %vm12563_vm8, %vm13375_vm7  ;;  %v6231_v25 = vrot.slane %v6223_v40, %v11748_v47  ;;  %v5726_v34 = vcombine.high %v5724_v27, %v5724_v27  ;;  %v6238_v55 = vrot.slane %v6224_v16, %v11748_v47 }
 0x26c   : > { %9111 = vmatmul.mubr.bf16.gmra.mrb[68].mxu1 %v12572_v29  ;;  %v5658_v52 = vcombine.high %v12379_v1, %v12379_v1  ;;  %vm12591_vm6 = vmand %vm5766_vm12, %vm5776_vm0  ;;  %v6240_v17 = vcombine.low %v5725_v28, %v5724_v27  ;;  %v5329_v30 = vmax.f32 %v5306_v35, 0.0  ;;  %v6421_v7 = vrot.slane %v6419_v31, 1  ;;  %v9575_v27 = vld [vmem:[%s13080_s4 + $0x1e0] sm:$0xff]  }
 0x26d   : > { %vm13380_vm7 = vcmp.le.s32.totalorder %v11753_v62, 16  ;;  %v6157_v1 = vcombine.low %v6149_v38, %v6156_v60  ;;  %v12605_v11 = vcombine.low %v6231_v25, %v6238_v55  ;;  %v6426_v40 = vrot.slane %v6424_v5, 1  ;;  %vm12611_vm0 = vmpackc.low %vm12475_vm5, %vm12495_vm9 }
 0x26e   : > { %vm5847_vm15 = vmand %vm12563_vm8, %vm13380_vm7  ;;  %v13381_v26 = vmov 0  ;;  %v6174_v63 = vcombine.low %v6166_v32, %v6173_v53  ;;  %v6181_v45 = vrot.slane %v5658_v52, %v11748_v47  ;;  %v12623_v38 = vrot.slane %v5329_v30, %v11748_v47  ;;  %v13398_v30 = vld [vmem:[#allocation10_spill] sm:$0xff] }
 0x26f   : > { %v13382_v26 = vsel %vm12611_vm0, 4294967295, %v13381_v26  ;;  %v6422_v60 = vor.u32 %v6421_v7, %v6417_v54  ;;  %v6315_v39 = vsel %vm12578_vm3, %v6157_v1, 0.0  ;;  %vm13383_vm5 = vmmov %vm13380_vm7  ;;  %v6198_v43 = vcombine.low %v6190_v2, %v6197_v61 }
 0x270   : > { %vm12631_vm9 = vmand %vm12591_vm6, %vm13383_vm5  ;;  %v6316_v36 = vsel %vm12563_vm8, %v6174_v63, 0.0  ;;  %v6317_v32 = vsel %vm5847_vm15, %v6181_v45, 0.0  ;;  %v12643_v53 = vpack.c.bf16 %v6174_v63, %v6157_v1  ;;  %vm13386_vm12 = vcmp.ge.s32.totalorder %v13291_v15, 1  ;;  %v13400_v45 = vld [vmem:[#allocation3_spill] sm:$0xff] }
 0x271   : > { %vm12649_vm7 = vmand %vm12591_vm6, %vm13386_vm12  ;;  %v6215_v6 = vcombine.low %v6207_v56, %v6214_v48  ;;  %v5894_v2 = vrot.slane %v13389_v4, %v11748_v47  ;;  %v6241_v61 = vcombine.low %v5726_v34, %v12623_v38  ;;  %v12660_v49 = vsel %vm13185_vm1, %v6422_v60, %v6426_v40 }
 0x272   : > { %v6338_v44 = vpack.c.bf16 %v6316_v36, %v6315_v39  ;;  %vm13390_vm15 = vcmp.lt.s32.totalorder %v13369_v3, 16  ;;  %vm13391_vm5 = vcmp.ge.s32.totalorder %v13369_v3, 0  ;;  %v6248_v18 = vrot.slane %v6240_v17, %v11748_v47  ;;  %6847 = vmatprep.mubr.bf16.mxu0 %v12660_v49 }
 0x273   : > { %vm12666_vm12 = vmand %vm13391_vm5, %vm13390_vm15  ;;  %v6339_v56 = vpack.c.bf16 %v6317_v32, %v6317_v32  ;;  %v6319_v48 = vsel %vm12591_vm6, %v6215_v6, 0.0  ;;  %v6320_v28 = vsel %vm12631_vm9, %v6222_v0, 0.0  ;;  %v6255_v16 = vrot.slane %v6241_v61, %v11748_v47  ;;  %8239 = vmatmul.mubr.msk.bf16.gmra.mrb[136].mxu0 %vm12611_vm0, %v12556_v37 }
 0x274   : > { %v6515_v3 = vrot.slane %v6338_v44, 1  ;;  %v6431_v54 = vshll.u32 %v6338_v44, 16  ;;  %v6318_v35 = vsel %vm12649_vm7, %v6198_v43, 0.0  ;;  %vm13394_vm15 = vcmp.ge.s32.totalorder %v13291_v15, 1 }
 0x275   : > { %vm12686_vm5 = vmand %vm12666_vm12, %vm13394_vm15  ;;  %v6516_v0 = vrot.slane %v6339_v56, 1  ;;  %v6436_v5 = vshll.u32 %v6339_v56, 16  ;;  %v6340_v25 = vpack.c.bf16 %v6319_v48, %v6318_v35  ;;  %v6341_v34 = vpack.c.bf16 %v6320_v28, %v6320_v28 }
 0x276   : > { %vm13397_vm9 = vcmp.le.s32.totalorder %v11753_v62, 16  ;;  %v12694_v55 = vcombine.low %v6248_v18, %v6255_v16  ;;  %v6429_v52 = vshrl.u32 %v6338_v44, 16  ;;  %v6433_v17 = vrot.slane %v6431_v54, 1 }
 0x277   : > { %vm5826_vm1 = vmand %vm12666_vm12, %vm13397_vm9  ;;  %v6295_v7 = vsel %vm12666_vm12, %v13398_v30, 0.0  ;;  %vm13399_vm15 = vcmask 1046528   ;;  %v6518_v40 = vrot.slane %v6340_v25, 1  ;;  %v6519_v63 = vrot.slane %v6341_v34, 1 }
 0x278   : > { %v12700_v1 = vsel %vm13399_vm15, %v6515_v3, %v6516_v0  ;;  %v6294_v60 = vsel %vm12686_vm5, %v13400_v45, 0.0  ;;  %v6434_v39 = vor.u32 %v6433_v17, %v6429_v52  ;;  %v6438_v23 = vrot.slane %v6436_v5, 1  ;;  %vm12710_vm9 = vmpackc.low %vm12563_vm8, %vm12578_vm3  ;;  %v13404_v0 = vld [vmem:[#allocation31_spill] sm:$0xff] }
 0x279   : > { %9114 = vmatprep.mubr.bf16.mxu1 %v12700_v1  ;;  %v6296_v36 = vsel %vm5826_vm1, %v5894_v2, 0.0  ;;  %v6324_v32 = vpack.c.bf16 %v6295_v7, %v6294_v60  ;;  %v13401_v4 = vmov 0  ;;  %v12715_v61 = vsel %vm13399_vm15, %v6518_v40, %v6519_v63  ;;  %vm13405_vm1 = vmmov %vm13399_vm15  ;;  %v9566_v60 = vld [vmem:[%s13080_s4 + $0x180] sm:$0xff]  }
 0x27a   : > { %v13402_v4 = vsel %vm12710_vm9, 4294967295, %v13401_v4  ;;  %v6325_v44 = vpack.c.bf16 %v6296_v36, %v6296_v36  ;;  %v6443_v18 = vshll.u32 %v6340_v25, 16  ;;  %v6448_v56 = vshll.u32 %v6341_v34, 16  ;;  %9115 = vmatmul.mubr.bf16.gmra.mrb[72].mxu1 %v12715_v61 }
 0x27b   : > { %v5734_v48 = vcombine.high %v12623_v38, %v12623_v38  ;;  %vm13403_vm0 = vsmask.f32 7424  ;;  %v6494_v8 = vrot.slane %v6324_v32, 1  ;;  %v12723_v33 = vpack.c.bf16 %v6215_v6, %v6198_v43 }
 0x27c   : > { %v12720_v2 = vsel %vm13403_vm0, %v6434_v39, %v6438_v23  ;;  %v6495_v28 = vrot.slane %v6325_v44, 1  ;;  %v6441_v16 = vshrl.u32 %v6340_v25, 16  ;;  %v6445_v3 = vrot.slane %v6443_v18, 1  ;;  %vm13406_vm8 = vmmov %vm13403_vm0  ;;  %v9569_v39 = vld [vmem:[%s13080_s4 + $0x1c8] sm:$0xff]  }
 0x27d   : > { %6855 = vmatprep.mubr.bf16.mxu0 %v12720_v2  ;;  %v6347_v54 = vshll.u32 %v6324_v32, 16  ;;  %v6345_v35 = vshrl.u32 %v6324_v32, 16  ;;  %v6352_v38 = vshll.u32 %v6325_v44, 16  ;;  %v5748_v5 = vadd.s32 9, %v13404_v0  ;;  %v9570_v18 = vld [vmem:[%s13080_s4 + $0x188] sm:$0xff]  }
 0x27e   : > { %8242 = vmatmul.mubr.msk.bf16.gmra.mrb[140].mxu0 %vm12710_vm9, %v12643_v53  ;;  %v8388_v34 = vpack.c.bf16 %v12694_v55, %v12605_v11  ;;  %v6496_v43 = vsel %vm13405_vm1, %v6494_v8, %v6495_v28  ;;  %v6446_v6 = vor.u32 %v6445_v3, %v6441_v16  ;;  %v6450_v52 = vrot.slane %v6448_v56, 1  ;;  %vm13407_vm1 = vmmov %vm13406_vm8  ;;  %v9572_v16 = vld [vmem:[%s13080_s4 + $0x190] sm:$0xff]  }
 0x27f   : > { %v6349_v17 = vrot.slane %v6347_v54, 1  ;;  %9134 = vmatprep.mubr.bf16.mxu1 %v6496_v43  ;;  %v8149_v25 = vadd.s32 4294967295, %v5748_v5  ;;  %v6354_v63 = vrot.slane %v6352_v38, 1  ;;  %v6263_v23 = vrot.slane %v5734_v48, %v11748_v47 }
 0x280   : > { %v12734_v7 = vsel %vm13406_vm8, %v6446_v6, %v6450_v52  ;;  %vm13410_vm9 = vcmp.ge.s32.totalorder %v13291_v15, 1  ;;  %v9574_v52 = vld [vmem:[%s13080_s4 + $0x198] sm:$0xff]   ;;  %v13416_v31 = vpack.c.bf16 %v13398_v30, %v13400_v45  ;;  %v9577_v30 = vld [vmem:[%s13080_s4 + $0x1e8] sm:$0xff]  }
 0x281   : > { %v6350_v40 = vor.u32 %v6349_v17, %v6345_v35  ;;  %6863 = vmatprep.mubr.bf16.mxu0 %v12734_v7  ;;  %vm5767_vm0 = vcmp.ge.s32.totalorder %v8149_v25, 0  ;;  %vm5777_vm15 = vcmp.lt.s32.totalorder %v8149_v25, 16  ;;  %v9573_v35 = vld [vmem:[%s13080_s4 + $0x1d8] sm:$0xff]   ;;  %v9576_v25 = vld [vmem:[%s13080_s4 + $0x1a0] sm:$0xff]   ;;  %v9578_v45 = vld [vmem:[%s13080_s4 + $0x1a8] sm:$0xff]  }
 0x282   : > { %vm12749_vm8 = vmand %vm5767_vm0, %vm5777_vm15  ;;  %9135 = vmatmul.mubr.bf16.vlgmr.msra.gmra.mrb[60].mxu1 %v12035_v41  ;;  %vm13413_vm0 = vcmp.le.s32.totalorder %v11753_v62, 16  ;;  %v9571_v41 = vld [vmem:[%s13080_s4 + $0x1d0] sm:$0xff]  }
 0x283   : > { %v6355_v36 = vsel %vm13407_vm1, %v6350_v40, %v6354_v63  ;;  %vm12758_vm3 = vmand %vm12749_vm8, %vm13410_vm9  ;;  %v6322_v47 = vsel %vm12749_vm8, %v12694_v55, 0.0  ;;  %8887 = vmatpush3.bf16.msra.mxu1 %v9566_v60  ;;  %9138 = vmatprep.mubr.bf16.mxu1 %v12055_v59  ;;  %v9579_v63 = vld [vmem:[%s13080_s4 + $0x1f0] sm:$0xff]   ;;  %v13421_v60 = vld [vmem:[#allocation19_spill] sm:$0xff] }
 0x284   : > { %vm5853_vm15 = vmand %vm12749_vm8, %vm13413_vm0  ;;  %v6321_v15 = vsel %vm12758_vm3, %v12605_v11, 0.0  ;;  %8888 = vmatprep.subr.bf16.mxu1 %v9569_v39  ;;  %vm13415_vm0 = vcmask 1046528   ;;  %v9580_v39 = vld [vmem:[%s13080_s4 + $0x1b0] sm:$0xff]  }
 0x285   : > { %vm13414_vm9 = vmpackc.low %vm12591_vm6, %vm12649_vm7  ;;  %v6323_v62 = vsel %vm5853_vm15, %v6263_v23, 0.0  ;;  %v6342_v56 = vpack.c.bf16 %v6322_v47, %v6321_v15  ;;  %v9581_v23 = vld [vmem:[%s13080_s4 + $0x1f8] sm:$0xff]   ;;  %v9584_v15 = vld [vmem:[%s13080_s4 + $0x208] sm:$0xff]  }
 0x286   : > { %8245 = vmatmul.mubr.msk.bf16.gmra.mrb[144].mxu0 %vm13414_vm9, %v12723_v33  ;;  %v6343_v48 = vpack.c.bf16 %v6323_v62, %v6323_v62  ;;  %vm8270_vm1 = vmpackc.low %vm12666_vm12, %vm12686_vm5  ;;  %vm13417_vm12 = vsmask.f32 7424  ;;  %v9586_v62 = vld [vmem:[%s13080_s4 + $0x218] sm:$0xff]  }
 0x287   : > { %7145 = vmatprep.mubr.bf16.mxu0 %v6355_v36  ;;  %v6455_v8 = vshll.u32 %v6342_v56, 16  ;;  %v6521_v28 = vrot.slane %v6342_v56, 1  ;;  %8889 = vmatpush3.bf16.msra.mxu1 %v9570_v18  ;;  %v6453_v38 = vshrl.u32 %v6342_v56, 16  ;;  %vm13420_vm5 = vmpackc.low %vm11884_vm10, %vm11907_vm11  ;;  %v13422_v36 = vld [vmem:[#allocation15_spill] sm:$0xff]  ;;  %v9583_v18 = vld [vmem:[%s13080_s4 + $0x200] sm:$0xff]   ;;  %vm13424_vm10 = vnez %v13382_v26 }
 0x288   : > { %v6460_v3 = vshll.u32 %v6343_v48, 16  ;;  %v6522_v54 = vrot.slane %v6343_v48, 1  ;;  %8890 = vmatprep.subr.bf16.mxu1 %v9571_v41  ;;  %v9585_v41 = vld [vmem:[%s13080_s4 + $0x210] sm:$0xff]   ;;  %vm13426_vm11 = vmmov %vm13414_vm9 }
 0x289   : > { %v6457_v0 = vrot.slane %v6455_v8, 1 }
 0x28a   : > { %v12796_v5 = vsel %vm13415_vm0, %v6521_v28, %v6522_v54  ;;  %9139 = vmatmul.mubr.bf16.gmra.mrb[64].mxu1 %v12250_v20  ;;  %v6462_v6 = vrot.slane %v6460_v3, 1 }
 0x28b   : > { %v6458_v43 = vor.u32 %v6457_v0, %v6453_v38  ;;  %8891 = vmatpush3.bf16.msra.mxu1 %v9572_v16  ;;  %9142 = vmatprep.mubr.bf16.mxu1 %v12353_v24 }
 0x28c   : > { %8892 = vmatprep.subr.bf16.mxu1 %v9573_v35 }
 0x28d   : > { %v12810_v17 = vsel %vm13417_vm12, %v6458_v43, %v6462_v6 }
 0x28e   : > { %8272 = vmatmul.mubr.msk.bf16.vlgmr.msra.gmra.mrb[148].mxu0 %vm8270_vm1, %v13416_v31 }
 0x28f   : > { %7153 = vmatprep.mubr.bf16.mxu0 %v12083_v46  ;;  %8893 = vmatpush3.bf16.msra.mxu1 %v9574_v52 }
 0x290   : > { %8894 = vmatprep.subr.bf16.mxu1 %v9575_v27 }
 0x292   : > { %9143 = vmatmul.mubr.bf16.gmra.mrb[68].mxu1 %v12469_v22 }
 0x293   : > { %8895 = vmatpush3.bf16.msra.mxu1 %v9576_v25  ;;  %9146 = vmatprep.mubr.bf16.mxu1 %v12572_v29 }
 0x294   : > { %8896 = vmatprep.subr.bf16.mxu1 %v9577_v30 }
 0x296   : > { %8275 = vmatmul.mubr.msk.bf16.gmra.mrb[152].mxu0 %vm13420_vm5, %v11897_v50  ;;  %v9582_v50 = vld [vmem:[%s13080_s4 + $0x1b8] sm:$0xff]  }
 0x297   : > { %7161 = vmatprep.mubr.bf16.mxu0 %v13421_v60  ;;  %8897 = vmatpush3.bf16.msra.mxu1 %v9578_v45 }
 0x298   : > { %8898 = vmatprep.subr.bf16.mxu1 %v9579_v63 }
 0x29a   : > { %9147 = vmatmul.mubr.bf16.gmra.mrb[72].mxu1 %v12700_v1 }
 0x29b   : > { %8899 = vmatpush3.bf16.msra.mxu1 %v9580_v39  ;;  %7532 = vmatprep.mubr.bf16.mxu1 %v13421_v60 }
 0x29c   : > { %8900 = vmatprep.subr.bf16.mxu1 %v9581_v23 }
 0x29e   : > { %8278 = vmatmul.mubr.msk.bf16.gmra.mrb[156].mxu0 %vm12179_vm14, %v13422_v36 }
 0x29f   : > { %7169 = vmatprep.mubr.bf16.mxu0 %v12310_v13  ;;  %8901 = vmatpush3.bf16.msra.mxu1 %v9582_v50 }
 0x2a0   : > { %9150 = vmatprep.subr.bf16.mxu1 %v9583_v18 }
 0x2a2   : > { %8368 = vmatmul.mubr.msk.bf16.vlgmr.msra.gmra.mrb[76].mxu1 %vm12179_vm14, %v13422_v36 }
 0x2a3   : > { %9151 = vmatpush3.bf16.msra.mxu1 %v9583_v18  ;;  %7540 = vmatprep.mubr.bf16.mxu1 %v12310_v13  ;;  %v9587_v13 = vld [vmem:[%s13080_s4 + $0x220] sm:$0xff]  }
 0x2a4   : > { %9152 = vmatprep.subr.bf16.mxu1 %v9584_v15 }
 0x2a6   : > { %8281 = vmatmul.mubr.msk.bf16.gmra.mrb[160].mxu0 %vm12292_vm13, %v12268_v58 }
 0x2a7   : > { %7177 = vmatprep.mubr.bf16.mxu0 %v12426_v57  ;;  %9153 = vmatpush3.bf16.msra.mxu1 %v9584_v15 }
 0x2a8   : > { %9154 = vmatprep.subr.bf16.mxu1 %v9585_v41 }
 0x2aa   : > { %8371 = vmatmul.mubr.msk.bf16.gmra.mrb[80].mxu1 %vm12292_vm13, %v12268_v58  ;;  %v9588_v58 = vld [vmem:[%s13080_s4 + $0x228] sm:$0xff]  }
 0x2ab   : > { %7548 = vmatprep.mubr.bf16.mxu1 %v12426_v57  ;;  %9155 = vmatpush3.bf16.msra.mxu1 %v9585_v41 }
 0x2ac   : > { %9156 = vmatprep.subr.bf16.mxu1 %v9586_v62 }
 0x2ae   : > { %8284 = vmatmul.mubr.msk.bf16.gmra.mrb[164].mxu0 %vm12412_vm2, %v12328_v10 }
 0x2af   : > { %7185 = vmatprep.mubr.bf16.mxu0 %v12538_v21  ;;  %9157 = vmatpush3.bf16.msra.mxu1 %v9586_v62 }
 0x2b0   : > { %9158 = vmatprep.subr.bf16.mxu1 %v9587_v13 }
 0x2b2   : > { %8374 = vmatmul.mubr.msk.bf16.gmra.mrb[84].mxu1 %vm12412_vm2, %v12328_v10  ;;  %v9590_v10 = vld [vmem:[%s13080_s4 + $0x238] sm:$0xff]   ;;  %vm8387_vm2 = vmpackc.low %vm12749_vm8, %vm12758_vm3 }
 0x2b3   : > { %7556 = vmatprep.mubr.bf16.mxu1 %v12538_v21  ;;  %9159 = vmatpush3.bf16.msra.mxu1 %v9587_v13 }
 0x2b4   : > { %9160 = vmatprep.subr.bf16.mxu1 %v9588_v58 }
 0x2b6   : > { %8287 = vmatmul.mubr.msk.bf16.gmra.mrb[168].mxu0 %vm12531_vm4, %v12489_v12 }
 0x2b7   : > { %7193 = vmatprep.mubr.bf16.mxu0 %v12660_v49  ;;  %9161 = vmatpush3.bf16.msra.mxu1 %v9588_v58 }
 0x2b8   : > { %9162 = vmatprep.subr.bf16.mxu1 %v9589_v51 }
 0x2ba   : > { %8377 = vmatmul.mubr.msk.bf16.gmra.mrb[88].mxu1 %vm12531_vm4, %v12489_v12  ;;  %vm13425_vm4 = vnez %v13402_v4 }
 0x2bb   : > { %7564 = vmatprep.mubr.bf16.mxu1 %v12660_v49  ;;  %9163 = vmatpush3.bf16.msra.mxu1 %v9589_v51 }
 0x2bc   : > { %9164 = vmatprep.subr.bf16.mxu1 %v9590_v10 }
 0x2be   : > { %8290 = vmatmul.mubr.msk.bf16.gmra.mrb[172].mxu0 %vm13424_vm10, %v12556_v37 }
 0x2bf   : > { %7201 = vmatprep.mubr.bf16.mxu0 %v12720_v2  ;;  %9165 = vmatpush3.bf16.msra.mxu1 %v9590_v10 }
 0x2c2   : > { %8380 = vmatmul.mubr.msk.bf16.gmra.mrb[92].mxu1 %vm13424_vm10, %v12556_v37 }
 0x2c3   : > { %7572 = vmatprep.mubr.bf16.mxu1 %v12720_v2 }
 0x2c6   : > { %8293 = vmatmul.mubr.msk.bf16.gmra.mrb[176].mxu0 %vm13425_vm4, %v12643_v53 }
 0x2ca   : > { %8383 = vmatmul.mubr.msk.bf16.gmra.mrb[96].mxu1 %vm13425_vm4, %v12643_v53 }
 0x2cb   : > { %7580 = vmatprep.mubr.bf16.mxu1 %v12734_v7 }
 0x2d2   : > { %8386 = vmatmul.mubr.msk.bf16.gmra.mrb[100].mxu1 %vm13426_vm11, %v12723_v33 }
 0x2d3   : > { %7588 = vmatprep.mubr.bf16.mxu1 %v12810_v17 }
 0x2da   : > { %8389 = vmatmul.mubr.msk.bf16.gmra.mrb[104].mxu1 %vm8387_vm2, %v8388_v34 }
 0x2db   : > { %9166 = vmatprep.mubr.bf16.mxu1 %v12055_v59 }
 0x2e2   : > { %9167 = vmatmul.mubr.bf16.vlgmr.msra.gmra.mrb[60].mxu1 %v12250_v20 }
 0x2e3   : > { %9170 = vmatprep.mubr.bf16.mxu1 %v12353_v24 }
 0x2ea   : > { %9171 = vmatmul.mubr.bf16.gmra.mrb[64].mxu1 %v12469_v22 }
 0x2eb   : > { %9174 = vmatprep.mubr.bf16.mxu1 %v12572_v29 }
 0x2f2   : > { %9175 = vmatmul.mubr.bf16.gmra.mrb[68].mxu1 %v12700_v1 }
 0x2f3   : > { %9178 = vmatprep.mubr.bf16.mxu1 %v12715_v61 }
 0x2fa   : > { %9179 = vmatmul.mubr.bf16.gmra.mrb[72].mxu1 %v12796_v5 }
 0x30a   : > { %v8742_v19 = vpop.f32.mrb[116].mxu0 }
 0x30b   : > { %v8743_v57 = vpop.f32.mrb[117].mxu0 }
 0x30c   : > { %v8744_v12 = vadd.f32 %v8743_v57, %v8742_v19  ;;  %v8745_v14 = vpop.f32.mrb[118].mxu0 }
 0x30d   : > { %v8746_v21 = vpop.f32.mrb[119].mxu0 }
 0x30e   : > { %v8747_v59 = vadd.f32 %v8746_v21, %v8745_v14 }
 0x312   : > { %v8748_v37 = vpop.f32.mrb[120].mxu0 }
 0x313   : > { %v8749_v20 = vpop.f32.mrb[121].mxu0 }
 0x314   : > { %v8750_v9 = vadd.f32 %v8749_v20, %v8748_v37  ;;  %v8751_v24 = vpop.f32.mrb[122].mxu0 }
 0x315   : > { %v8752_v11 = vpop.f32.mrb[123].mxu0 }
 0x316   : > { %v8753_v22 = vadd.f32 %v8752_v11, %v8751_v24 }
 0x31d   : > { %v8754_v26 = vpop.f32.mrb[124].mxu0 }
 0x31e   : > { %v8755_v29 = vpop.f32.mrb[125].mxu0 }
 0x31f   : > { %v8756_v53 = vadd.f32 %v8755_v29, %v8754_v26  ;;  %v8757_v42 = vpop.f32.mrb[126].mxu0 }
 0x320   : > { %v8758_v49 = vpop.f32.mrb[127].mxu0 }
 0x321   : > { %v8759_v55 = vadd.f32 %v8758_v49, %v8757_v42 }
 0x329   : > { %v8760_v1 = vpop.f32.mrb[128].mxu0 }
 0x32a   : > { %v8761_v4 = vpop.f32.mrb[129].mxu0 }
 0x32b   : > { %v12938_v61 = vadd.f32 %v8761_v4, %v8760_v1  ;;  %v8763_v2 = vpop.f32.mrb[130].mxu0 }
 0x32c   : > { %v8764_v33 = vpop.f32.mrb[131].mxu0 }
 0x32d   : > { %v12940_v34 = vadd.f32 %v8764_v33, %v8763_v2 }
 0x338   : > { %v8766_v7 = vpop.f32.mrb[132].mxu0 }
 0x339   : > { %v8767_v32 = vpop.f32.mrb[133].mxu0 }
 0x33a   : > { %v12942_v44 = vadd.f32 %v8767_v32, %v8766_v7  ;;  %v8769_v56 = vpop.f32.mrb[134].mxu0 }
 0x33b   : > { %v8770_v48 = vpop.f32.mrb[135].mxu0 }
 0x33c   : > { %v12944_v8 = vadd.f32 %v8770_v48, %v8769_v56 }
 0x346   : > { %v8772_v28 = vpop.f32.mrb[136].mxu0 }
 0x347   : > { %v8773_v16 = vpop.f32.mrb[137].mxu0 }
 0x348   : > { %v12946_v3 = vadd.f32 %v8773_v16, %v8772_v28  ;;  %v8775_v54 = vpop.f32.mrb[138].mxu0 }
 0x349   : > { %v8776_v35 = vpop.f32.mrb[139].mxu0 }
 0x34a   : > { %v12948_v38 = vadd.f32 %v8776_v35, %v8775_v54 }
 0x351   : > { %v8778_v0 = vpop.f32.mrb[140].mxu0 }
 0x352   : > { %v8779_v5 = vpop.f32.mrb[141].mxu0 }
 0x353   : > { %v12950_v43 = vadd.f32 %v8779_v5, %v8778_v0  ;;  %v8781_v6 = vpop.f32.mrb[142].mxu0 }
 0x354   : > { %v8782_v52 = vpop.f32.mrb[143].mxu0 }
 0x355   : > { %v12952_v31 = vadd.f32 %v8782_v52, %v8781_v6 }
 0x359   : > { %v8784_v27 = vpop.f32.mrb[144].mxu0 }
 0x35a   : > { %v8785_v17 = vpop.f32.mrb[145].mxu0 }
 0x35b   : > { %v12954_v25 = vadd.f32 %v8785_v17, %v8784_v27  ;;  %v8787_v30 = vpop.f32.mrb[146].mxu0 }
 0x35c   : > { %v8788_v45 = vpop.f32.mrb[147].mxu0 }
 0x35d   : > { %v12956_v46 = vadd.f32 %v8788_v45, %v8787_v30 }
 0x361   : > { %v8822_v40 = vpop.f32.mrb[148].mxu0 }
 0x362   : > { %v8823_v63 = vpop.f32.mrb[149].mxu0 }
 0x363   : > { %v8824_v60 = vadd.f32 %v8823_v63, %v8822_v40  ;;  %v8825_v39 = vpop.f32.mrb[150].mxu0 }
 0x364   : > { %v8826_v23 = vpop.f32.mrb[151].mxu0 }
 0x365   : > { %v9261_v50 = vadd.f32 %v8824_v60, %v8744_v12  ;;  %v8827_v36 = vadd.f32 %v8826_v23, %v8825_v39 }
 0x367   : > { %v9267_v47 = vadd.f32 %v8827_v36, %v8747_v59 }
 0x369   : > { %v8828_v18 = vpop.f32.mrb[152].mxu0 }
 0x36a   : > { %v8829_v15 = vpop.f32.mrb[153].mxu0 }
 0x36b   : > { %v8830_v41 = vadd.f32 %v8829_v15, %v8828_v18  ;;  %v8831_v62 = vpop.f32.mrb[154].mxu0 }
 0x36c   : > { %v8832_v13 = vpop.f32.mrb[155].mxu0 }
 0x36d   : > { %v9258_v58 = vadd.f32 %v8830_v41, %v8750_v9  ;;  %v8833_v51 = vadd.f32 %v8832_v13, %v8831_v62 }
 0x36f   : > { %v9264_v10 = vadd.f32 %v8833_v51, %v8753_v22 }
 0x371   : > { %v8834_v19 = vpop.f32.mrb[156].mxu0 }
 0x372   : > { %v8835_v57 = vpop.f32.mrb[157].mxu0 }
 0x373   : > { %v8836_v14 = vadd.f32 %v8835_v57, %v8834_v19  ;;  %v8837_v21 = vpop.f32.mrb[158].mxu0 }
 0x374   : > { %v8838_v37 = vpop.f32.mrb[159].mxu0 }
 0x375   : > { %v9273_v20 = vadd.f32 %v8836_v14, %v8756_v53  ;;  %v8839_v24 = vadd.f32 %v8838_v37, %v8837_v21  ;;  %v8902_v26 = vpop.f32.mrb[76].mxu1 }
 0x376   : > { %v8903_v12 = vpop.f32.mrb[77].mxu1 }
 0x377   : > { %v9279_v11 = vadd.f32 %v8839_v24, %v8759_v55  ;;  %v8904_v59 = vadd.f32 %v8903_v12, %v8902_v26  ;;  %v8905_v42 = vpop.f32.mrb[78].mxu1 }
 0x378   : > { %v8906_v1 = vpop.f32.mrb[79].mxu1 }
 0x379   : > { %v8840_v29 = vpop.f32.mrb[160].mxu0  ;;  %v8907_v9 = vadd.f32 %v8906_v1, %v8905_v42  ;;  %v12958_v33 = vadd.f32 %v9261_v50, %v8904_v59 }
 0x37a   : > { %v8841_v49 = vpop.f32.mrb[161].mxu0 }
 0x37b   : > { %v8842_v4 = vadd.f32 %v8841_v49, %v8840_v29  ;;  %v8843_v2 = vpop.f32.mrb[162].mxu0  ;;  %v12961_v56 = vadd.f32 %v9267_v47, %v8907_v9 }
 0x37c   : > { %v8844_v22 = vpop.f32.mrb[163].mxu0 }
 0x37d   : > { %v9270_v7 = vadd.f32 %v8842_v4, %v12938_v61  ;;  %v8845_v32 = vadd.f32 %v8844_v22, %v8843_v2  ;;  %v8908_v55 = vpop.f32.mrb[80].mxu1 }
 0x37e   : > { %v8909_v48 = vpop.f32.mrb[81].mxu1 }
 0x37f   : > { %v9276_v53 = vadd.f32 %v8845_v32, %v12940_v34  ;;  %v8910_v16 = vadd.f32 %v8909_v48, %v8908_v55  ;;  %v8911_v54 = vpop.f32.mrb[82].mxu1 }
 0x380   : > { %v8912_v0 = vpop.f32.mrb[83].mxu1 }
 0x381   : > { %v8846_v28 = vpop.f32.mrb[164].mxu0  ;;  %v8913_v52 = vadd.f32 %v8912_v0, %v8911_v54  ;;  %v12964_v27 = vadd.f32 %v9258_v58, %v8910_v16 }
 0x382   : > { %v8847_v35 = vpop.f32.mrb[165].mxu0 }
 0x383   : > { %v8848_v5 = vadd.f32 %v8847_v35, %v8846_v28  ;;  %v8849_v6 = vpop.f32.mrb[166].mxu0  ;;  %v12967_v45 = vadd.f32 %v9264_v10, %v8913_v52 }
 0x384   : > { %v8850_v17 = vpop.f32.mrb[167].mxu0 }
 0x385   : > { %v9285_v61 = vadd.f32 %v8848_v5, %v12942_v44  ;;  %v8851_v30 = vadd.f32 %v8850_v17, %v8849_v6  ;;  %v8914_v40 = vpop.f32.mrb[84].mxu1 }
 0x386   : > { %v8915_v63 = vpop.f32.mrb[85].mxu1 }
 0x387   : > { %v9291_v34 = vadd.f32 %v8851_v30, %v12944_v8  ;;  %v8916_v39 = vadd.f32 %v8915_v63, %v8914_v40  ;;  %v8917_v23 = vpop.f32.mrb[86].mxu1 }
 0x388   : > { %v8918_v36 = vpop.f32.mrb[87].mxu1 }
 0x389   : > { %v8852_v60 = vpop.f32.mrb[168].mxu0  ;;  %v8919_v15 = vadd.f32 %v8918_v36, %v8917_v23  ;;  %v12970_v41 = vadd.f32 %v9273_v20, %v8916_v39 }
 0x38a   : > { %v8853_v50 = vpop.f32.mrb[169].mxu0 }
 0x38b   : > { %v8854_v47 = vadd.f32 %v8853_v50, %v8852_v60  ;;  %v8855_v18 = vpop.f32.mrb[170].mxu0  ;;  %v12973_v58 = vadd.f32 %v9279_v11, %v8919_v15 }
 0x38c   : > { %v8856_v62 = vpop.f32.mrb[171].mxu0 }
 0x38d   : > { %v9282_v44 = vadd.f32 %v8854_v47, %v12946_v3  ;;  %v8857_v13 = vadd.f32 %v8856_v62, %v8855_v18  ;;  %v8920_v51 = vpop.f32.mrb[88].mxu1 }
 0x38e   : > { %v8921_v10 = vpop.f32.mrb[89].mxu1 }
 0x38f   : > { %v9288_v8 = vadd.f32 %v8857_v13, %v12948_v38  ;;  %v8922_v57 = vadd.f32 %v8921_v10, %v8920_v51  ;;  %v8923_v14 = vpop.f32.mrb[90].mxu1 }
 0x390   : > { %v8924_v37 = vpop.f32.mrb[91].mxu1 }
 0x391   : > { %v8858_v19 = vpop.f32.mrb[172].mxu0  ;;  %v8925_v12 = vadd.f32 %v8924_v37, %v8923_v14  ;;  %v12976_v20 = vadd.f32 %v9270_v7, %v8922_v57 }
 0x392   : > { %v8859_v21 = vpop.f32.mrb[173].mxu0 }
 0x393   : > { %v8860_v24 = vadd.f32 %v8859_v21, %v8858_v19  ;;  %v8861_v26 = vpop.f32.mrb[174].mxu0  ;;  %v12979_v11 = vadd.f32 %v9276_v53, %v8925_v12 }
 0x394   : > { %v8862_v29 = vpop.f32.mrb[175].mxu0 }
 0x395   : > { %v9297_v3 = vadd.f32 %v8860_v24, %v12950_v43  ;;  %v8863_v59 = vadd.f32 %v8862_v29, %v8861_v26  ;;  %v8926_v42 = vpop.f32.mrb[92].mxu1 }
 0x396   : > { %v8927_v49 = vpop.f32.mrb[93].mxu1 }
 0x397   : > { %v9303_v38 = vadd.f32 %v8863_v59, %v12952_v31  ;;  %v8928_v4 = vadd.f32 %v8927_v49, %v8926_v42  ;;  %v8929_v2 = vpop.f32.mrb[94].mxu1 }
 0x398   : > { %v8930_v22 = vpop.f32.mrb[95].mxu1 }
 0x399   : > { %v8864_v1 = vpop.f32.mrb[176].mxu0  ;;  %v8931_v48 = vadd.f32 %v8930_v22, %v8929_v2  ;;  %v12982_v7 = vadd.f32 %v9285_v61, %v8928_v4 }
 0x39a   : > { %v8865_v9 = vpop.f32.mrb[177].mxu0 }
 0x39b   : > { %v8866_v32 = vadd.f32 %v8865_v9, %v8864_v1  ;;  %v8867_v55 = vpop.f32.mrb[178].mxu0  ;;  %v12985_v53 = vadd.f32 %v9291_v34, %v8931_v48 }
 0x39c   : > { %v8868_v28 = vpop.f32.mrb[179].mxu0 }
 0x39d   : > { %v9294_v43 = vadd.f32 %v8866_v32, %v12954_v25  ;;  %v8869_v16 = vadd.f32 %v8868_v28, %v8867_v55  ;;  %v8932_v54 = vpop.f32.mrb[96].mxu1 }
 0x39e   : > { %v8933_v35 = vpop.f32.mrb[97].mxu1 }
 0x39f   : > { %v9300_v31 = vadd.f32 %v8869_v16, %v12956_v46  ;;  %v8934_v0 = vadd.f32 %v8933_v35, %v8932_v54  ;;  %v8935_v5 = vpop.f32.mrb[98].mxu1 }
 0x3a0   : > { %v8936_v6 = vpop.f32.mrb[99].mxu1 }
 0x3a1   : > { %v8937_v52 = vadd.f32 %v8936_v6, %v8935_v5  ;;  %v12988_v17 = vadd.f32 %v9282_v44, %v8934_v0 }
 0x3a3   : > { %v12990_v61 = vadd.f32 %v9288_v8, %v8937_v52  ;;  %v13006_v8 = vld [vmem:[%s13081_s5] ss:$0 sm:$0xff] }
 0x3a5   : > { %v8938_v30 = vpop.f32.mrb[100].mxu1 }
 0x3a6   : > { %v8939_v25 = vpop.f32.mrb[101].mxu1 }
 0x3a7   : > { %v8940_v40 = vadd.f32 %v8939_v25, %v8938_v30  ;;  %v8941_v63 = vpop.f32.mrb[102].mxu1 }
 0x3a8   : > { %v8942_v34 = vpop.f32.mrb[103].mxu1 }
 0x3a9   : > { %v8943_v60 = vadd.f32 %v8942_v34, %v8941_v63  ;;  %v12993_v46 = vadd.f32 %v9297_v3, %v8940_v40 }
 0x3ab   : > { %v12995_v39 = vadd.f32 %v9303_v38, %v8943_v60 }
 0x3ad   : > { %v8944_v23 = vpop.f32.mrb[104].mxu1 }
 0x3ae   : > { %v8945_v50 = vpop.f32.mrb[105].mxu1 }
 0x3af   : > { %v8946_v36 = vadd.f32 %v8945_v50, %v8944_v23  ;;  %v8947_v47 = vpop.f32.mrb[106].mxu1 }
 0x3b0   : > { %v8948_v18 = vpop.f32.mrb[107].mxu1 }
 0x3b1   : > { %v8949_v15 = vadd.f32 %v8948_v18, %v8947_v47  ;;  %v12999_v62 = vadd.f32 %v9294_v43, %v8946_v36 }
 0x3b3   : > { %v13001_v44 = vadd.f32 %v9300_v31, %v8949_v15 }
 0x3b5   : > { %v9168_v13 = vpop.f32.mrb[60].mxu1 }
 0x3b6   : > { %v9260_v51 = vadd.f32 %v12964_v27, %v9168_v13  ;;  %v7631_v10 = vpop.f32.mrb[61].mxu1 }
 0x3b7   : > { %v9263_v19 = vadd.f32 %v12958_v33, %v7631_v10  ;;  %v9169_v57 = vpop.f32.mrb[62].mxu1 }
 0x3b8   : > { %v7719_v14 = vadd.f32 %v9260_v51, %v13006_v8  ;;  %v9266_v21 = vadd.f32 %v12967_v45, %v9169_v57  ;;  %v7634_v37 = vpop.f32.mrb[63].mxu1 }
 0x3b9   : > { %v7717_v27 = vadd.f32 %v9263_v19, %v13006_v8  ;;  %v9269_v24 = vadd.f32 %v12961_v56, %v7634_v37 }
 0x3ba   : > { %v7735_v33 = vmax.f32 %v7719_v14, 0.0  ;;  %v7720_v26 = vadd.f32 %v9266_v21, %v13006_v8 }
 0x3bb   : > { %v7733_v12 = vmax.f32 %v7717_v27, 0.0  ;;  %v7718_v45 = vadd.f32 %v9269_v24, %v13006_v8 }
 0x3bc   : > { %7751 = vst [vmem:[%s13015_s7 + $0x10] sm:$0xff] %v7735_v33  ;;  %v7736_v29 = vmax.f32 %v7720_v26, 0.0 }
 0x3bd   : > { %7749 = vst [vmem:[%s13015_s7] sm:$0xff] %v7733_v12  ;;  %v7734_v3 = vmax.f32 %v7718_v45, 0.0  ;;  %v9172_v59 = vpop.f32.mrb[64].mxu1 }
 0x3be   : > { %7752 = vst [vmem:[%s13015_s7 + $0x18] sm:$0xff] %v7736_v29  ;;  %v9272_v38 = vadd.f32 %v12976_v20, %v9172_v59  ;;  %v7647_v42 = vpop.f32.mrb[65].mxu1 }
 0x3bf   : > { %7750 = vst [vmem:[%s13015_s7 + $0x8] sm:$0xff] %v7734_v3  ;;  %v9275_v56 = vadd.f32 %v12970_v41, %v7647_v42  ;;  %v9173_v49 = vpop.f32.mrb[66].mxu1 }
 0x3c0   : > { %v7723_v1 = vadd.f32 %v9272_v38, %v13006_v8  ;;  %v9278_v4 = vadd.f32 %v12979_v11, %v9173_v49  ;;  %v7650_v2 = vpop.f32.mrb[67].mxu1 }
 0x3c1   : > { %v7721_v9 = vadd.f32 %v9275_v56, %v13006_v8  ;;  %v9281_v22 = vadd.f32 %v12973_v58, %v7650_v2 }
 0x3c2   : > { %v7739_v32 = vmax.f32 %v7723_v1, 0.0  ;;  %v7724_v20 = vadd.f32 %v9278_v4, %v13006_v8 }
 0x3c3   : > { %v7737_v55 = vmax.f32 %v7721_v9, 0.0  ;;  %v7722_v48 = vadd.f32 %v9281_v22, %v13006_v8 }
 0x3c4   : > { %7755 = vst [vmem:[%s13015_s7 + $0x30] sm:$0xff] %v7739_v32  ;;  %v7740_v41 = vmax.f32 %v7724_v20, 0.0 }
 0x3c5   : > { %7753 = vst [vmem:[%s13015_s7 + $0x20] sm:$0xff] %v7737_v55  ;;  %v7738_v28 = vmax.f32 %v7722_v48, 0.0  ;;  %v9176_v43 = vpop.f32.mrb[68].mxu1 }
 0x3c6   : > { %7756 = vst [vmem:[%s13015_s7 + $0x38] sm:$0xff] %v7740_v41  ;;  %v9284_v11 = vadd.f32 %v12988_v17, %v9176_v43  ;;  %v7663_v16 = vpop.f32.mrb[69].mxu1 }
 0x3c7   : > { %7754 = vst [vmem:[%s13015_s7 + $0x28] sm:$0xff] %v7738_v28  ;;  %v9287_v58 = vadd.f32 %v12982_v7, %v7663_v16  ;;  %v9177_v31 = vpop.f32.mrb[70].mxu1 }
 0x3c8   : > { %v7727_v54 = vadd.f32 %v9284_v11, %v13006_v8  ;;  %v9290_v35 = vadd.f32 %v12990_v61, %v9177_v31  ;;  %v7666_v0 = vpop.f32.mrb[71].mxu1 }
 0x3c9   : > { %v7725_v5 = vadd.f32 %v9287_v58, %v13006_v8  ;;  %v9293_v6 = vadd.f32 %v12985_v53, %v7666_v0 }
 0x3ca   : > { %v7743_v52 = vmax.f32 %v7727_v54, 0.0  ;;  %v7728_v17 = vadd.f32 %v9290_v35, %v13006_v8 }
 0x3cb   : > { %v7741_v30 = vmax.f32 %v7725_v5, 0.0  ;;  %v7726_v25 = vadd.f32 %v9293_v6, %v13006_v8 }
 0x3cc   : > { %7759 = vst [vmem:[%s13015_s7 + $0x50] sm:$0xff] %v7743_v52  ;;  %v7744_v7 = vmax.f32 %v7728_v17, 0.0 }
 0x3cd   : > { %7757 = vst [vmem:[%s13015_s7 + $0x40] sm:$0xff] %v7741_v30  ;;  %v7742_v40 = vmax.f32 %v7726_v25, 0.0  ;;  %v9180_v63 = vpop.f32.mrb[72].mxu1 }
 0x3ce   : > { %7760 = vst [vmem:[%s13015_s7 + $0x58] sm:$0xff] %v7744_v7  ;;  %v9296_v61 = vadd.f32 %v12999_v62, %v9180_v63  ;;  %v7679_v34 = vpop.f32.mrb[73].mxu1 }
 0x3cf   : > { %7758 = vst [vmem:[%s13015_s7 + $0x48] sm:$0xff] %v7742_v40  ;;  %v9299_v53 = vadd.f32 %v12993_v46, %v7679_v34  ;;  %v9181_v60 = vpop.f32.mrb[74].mxu1 }
 0x3d0   : > { %v7731_v23 = vadd.f32 %v9296_v61, %v13006_v8  ;;  %v9302_v50 = vadd.f32 %v13001_v44, %v9181_v60  ;;  %v7682_v36 = vpop.f32.mrb[75].mxu1 }
 0x3d1   : > { %v7729_v47 = vadd.f32 %v9299_v53, %v13006_v8  ;;  %v9305_v18 = vadd.f32 %v12995_v39, %v7682_v36 }
 0x3d2   : > { %v7747_v15 = vmax.f32 %v7731_v23, 0.0  ;;  %v7732_v62 = vadd.f32 %v9302_v50, %v13006_v8 }
 0x3d3   : > { %v7745_v13 = vmax.f32 %v7729_v47, 0.0  ;;  %v7730_v51 = vadd.f32 %v9305_v18, %v13006_v8 }
 0x3d4   : > { %7763 = vst [vmem:[%s13015_s7 + $0x70] sm:$0xff] %v7747_v15  ;;  %v7748_v10 = vmax.f32 %v7732_v62, 0.0 }
 0x3d5   : > { %7761 = vst [vmem:[%s13015_s7 + $0x60] sm:$0xff] %v7745_v13  ;;  %v7746_v46 = vmax.f32 %v7730_v51, 0.0 }
 0x3d6   : > { %7764 = vst [vmem:[%s13015_s7 + $0x78] sm:$0xff] %v7748_v10 }
 0x3d7   : > { %7762 = vst [vmem:[%s13015_s7 + $0x68] sm:$0xff] %v7746_v46 }
 0x3d8 PF: > { %s16_s25 = sadd.s32 1, %s9631_s25   ;;  %s13427_s21 = smov %s9623_s23 }
 0x3d9   : > { %p13_p9 = scmp.ge.s32.totalorder %s16_s25, 6   ;;  %s13428_s22 = smov %s9627_s24 }
 0x3da   : > { %s13429_s23 = smov %s13432_s26  ;;  %s13430_s24 = smov %s13436_s27 }
 0x3db   :  { %15 = sbr.rel (!%p13_p9) target bundleno = 3 (0x3), region = 81 }

</bundles_post_ra>
